<compile_context>
chip_gen: v7x
topology: tpu7x:2x2x1
jax: 0.10.0
libtpu: 0.0.40
codegen_flags: <defaults>
</compile_context>

<pallas_src>
import jax
import jax.numpy as jnp
from jax.experimental import pallas as pl
from jax.experimental.pallas import tpu as pltpu

# Static model dimensions (Linear(448) implies input length 42).
L_IN = 42
C1_OUT, K1 = 32, 10
C2_OUT, K2 = 64, 3
L1 = L_IN - K1 + 1            # 33 conv1 out length
P1 = L1 // 2                  # 16 pool1 out length
L2 = P1 - K2 + 1              # 14 conv2 out length
P2 = L2 // 2                  # 7  pool2 out length
FLAT = C2_OUT * P2            # 448
D1 = C1_OUT * P1              # 512 pooled-1 feature rows (c*16 + p)
D2 = C2_OUT * P2              # 448 pooled-2 feature rows (o*7 + q)
MAX_TB = 512                  # default batch tile (lane width)


def _forward_kernel(x_ref, g1e_ref, g1o_ref, b1_ref,
                    g2e_ref, g2o_ref, b2_ref, g3_ref, bl_ref, o_ref):
    x = x_ref[0]                                   # (TB, 42) bf16, batch on sublanes
    dn = (((1,), (1,)), ((), ()))                  # contract weight K with x's last dim

    # Conv1 (even/odd output positions) + bias + ReLU, pool = elementwise max.
    h1e = jax.lax.dot_general(g1e_ref[...], x, dn, preferred_element_type=jnp.float32)
    h1o = jax.lax.dot_general(g1o_ref[...], x, dn, preferred_element_type=jnp.float32)
    b1 = b1_ref[...]                               # (512, 1) f32, lane-broadcast
    p1 = jnp.maximum(jnp.maximum(h1e + b1, 0.0),
                     jnp.maximum(h1o + b1, 0.0)).astype(jnp.bfloat16)   # (512, TB)

    # Conv2 (even/odd) + bias + ReLU, pool = elementwise max.
    h2e = jnp.dot(g2e_ref[...], p1, preferred_element_type=jnp.float32)
    h2o = jnp.dot(g2o_ref[...], p1, preferred_element_type=jnp.float32)
    b2 = b2_ref[...]                               # (448, 1) f32
    p2 = jnp.maximum(jnp.maximum(h2e + b2, 0.0),
                     jnp.maximum(h2o + b2, 0.0)).astype(jnp.bfloat16)   # (448, TB)

    # Flatten + Dropout(eval => identity) + Linear(448 -> 1).
    out = jnp.dot(g3_ref[...], p2, preferred_element_type=jnp.float32)  # (1, TB)
    o_ref[0] = out + bl_ref[...]                   # lane-dense store


def _build_matrices(params):
    """Fold conv/pool indexing and tap weights into dense even/odd matrices."""
    w1, b1, w2, b2, wl, bl = params                # PyTorch layouts
    w1_ck = w1[:, 0, :]                            # (32, 10) [c, k]

    # --- Conv1: G (512, 42), row r = c*16 + p maps x -> conv1 output at l=offset[p].
    j = jnp.arange(L_IN)[None, :]                  # (1, 42)
    p = jnp.arange(P1)                             # (16,)

    def conv1_mat(offsets):                        # offsets: (16,) positions
        k = j - offsets[:, None]                   # (16, 42) tap index
        valid = (k >= 0) & (k < K1)
        kc = jnp.clip(k, 0, K1 - 1)
        m = w1_ck[:, kc] * valid[None, :, :]       # (32, 16, 42) [c, p, j]
        return m.reshape(D1, L_IN)

    g1e = conv1_mat(2 * p)                         # even conv1 positions 0,2,...,30
    g1o = conv1_mat(2 * p + 1)                     # odd  conv1 positions 1,3,...,31
    b1r = jnp.repeat(b1, P1).reshape(D1, 1)

    # --- Conv2: G (448, 512), row s = o*7 + q, col r = cin*16 + p.
    q = jnp.arange(P2)                             # (7,)
    pp = jnp.arange(P1)[None, :]                   # (1, 16)

    def conv2_mat(offsets):                        # offsets: (7,) positions
        k = pp - offsets[:, None]                  # (7, 16)
        valid = (k >= 0) & (k < K2)
        kc = jnp.clip(k, 0, K2 - 1)
        m = w2[:, :, kc] * valid[None, None, :, :] # (64, 32, 7, 16) [o, cin, q, p]
        m = jnp.transpose(m, (0, 2, 1, 3))         # (64, 7, 32, 16) [o, q, cin, p]
        return m.reshape(D2, D1)

    g2e = conv2_mat(2 * q)                         # even conv2 positions 0,2,...,12
    g2o = conv2_mat(2 * q + 1)                     # odd  conv2 positions 1,3,...,13
    b2r = jnp.repeat(b2, P2).reshape(D2, 1)

    # --- Linear: PyTorch flatten order is (C, L) -> index o*7 + q, same as rows.
    g3 = wl.reshape(1, FLAT)
    blr = bl.reshape(1, 1)
    return g1e, g1o, b1r, g2e, g2o, b2r, g3, blr


def _pick_tb(batch, max_tb=MAX_TB):
    """Multiple of 128, <= max_tb; prefer >=2 grid steps when batch allows (megacore)."""
    tb = max_tb
    while tb > 128 and batch <= tb:
        tb //= 2
    return tb


def model_forward(x_ncl, params, max_tb=MAX_TB):
    """x_ncl: (B, 1, 42) float32, PyTorch NCL layout. Returns (B, 1) float32."""
    B = x_ncl.shape[0]
    g1e, g1o, b1r, g2e, g2o, b2r, g3, blr = _build_matrices(params)
    # bf16 MXU operands, f32 accumulation/bias (per review); biases stay f32.
    g1e, g1o, g2e, g2o, g3 = (m.astype(jnp.bfloat16) for m in (g1e, g1o, g2e, g2o, g3))

    tb = _pick_tb(B, max_tb)
    nt = pl.cdiv(B, tb)
    b_pad = nt * tb
    x_flat = x_ncl.reshape(B, L_IN).astype(jnp.bfloat16)
    x_flat = jnp.pad(x_flat, ((0, b_pad - B), (0, 0)))
    x_tiles = x_flat.reshape(nt, tb, L_IN)          # batch stays last-dim-free; no transpose

    out = pl.pallas_call(
        _forward_kernel,
        out_shape=jax.ShapeDtypeStruct((nt, 1, tb), jnp.float32),
        grid=(nt,),
        in_specs=[
            pl.BlockSpec((1, tb, L_IN), lambda i: (i, 0, 0)),   # per-tile input (TB, 42)
            pl.BlockSpec(g1e.shape, lambda i: (0, 0)),          # conv1 even (512, 42)
            pl.BlockSpec(g1o.shape, lambda i: (0, 0)),          # conv1 odd  (512, 42)
            pl.BlockSpec(b1r.shape, lambda i: (0, 0)),          # b1 (512, 1)
            pl.BlockSpec(g2e.shape, lambda i: (0, 0)),          # conv2 even (448, 512)
            pl.BlockSpec(g2o.shape, lambda i: (0, 0)),          # conv2 odd  (448, 512)
            pl.BlockSpec(b2r.shape, lambda i: (0, 0)),          # b2 (448, 1)
            pl.BlockSpec(g3.shape, lambda i: (0, 0)),           # linear (1, 448)
            pl.BlockSpec(blr.shape, lambda i: (0, 0)),          # linear bias (1, 1)
        ],
        out_specs=pl.BlockSpec((1, 1, tb), lambda i: (i, 0, 0)),  # lane-dense output
        compiler_params=pltpu.CompilerParams(
            dimension_semantics=("parallel",)),
    )(x_tiles, g1e, g1o, b1r, g2e, g2o, b2r, g3, blr)

    return out.reshape(b_pad, 1)[:B]


def ref_forward(x_ncl, params):
    """Pure-JAX f32 reference with PyTorch (NCL / OIH) conventions."""
    w1, b1, w2, b2, wl, bl = params
    dn1 = jax.lax.conv_dimension_numbers(x_ncl.shape, w1.shape, ('NCH', 'OIH', 'NCH'))
    y = jax.lax.conv_general_dilated(x_ncl, w1, (1,), 'VALID', dimension_numbers=dn1)
    y = jnp.maximum(y + b1[None, :, None], 0.0)
    y = jax.lax.reduce_window(y, -jnp.inf, jax.lax.max, (1, 1, 2), (1, 1, 2), 'VALID')
    dn2 = jax.lax.conv_dimension_numbers(y.shape, w2.shape, ('NCH', 'OIH', 'NCH'))
    y = jax.lax.conv_general_dilated(y, w2, (1,), 'VALID', dimension_numbers=dn2)
    y = jnp.maximum(y + b2[None, :, None], 0.0)
    y = jax.lax.reduce_window(y, -jnp.inf, jax.lax.max, (1, 1, 2), (1, 1, 2), 'VALID')
    y = y.reshape(y.shape[0], -1)                   # (B, 448), PyTorch (C, L) flatten
    return y @ wl.T + bl[None, :]                   # Dropout is identity at inference


def init_params(key):
    """Deterministic, PyTorch-shaped parameters (uniform, fan-in scaled)."""
    ks = jax.random.split(key, 6)
    bnd1 = 1.0 / jnp.sqrt(1.0 * K1)
    bnd2 = 1.0 / jnp.sqrt(float(C1_OUT * K2))
    bndl = 1.0 / jnp.sqrt(float(FLAT))
    w1 = jax.random.uniform(ks[0], (C1_OUT, 1, K1), jnp.float32, -bnd1, bnd1)
    b1 = jax.random.uniform(ks[1], (C1_OUT,), jnp.float32, -bnd1, bnd1)
    w2 = jax.random.uniform(ks[2], (C2_OUT, C1_OUT, K2), jnp.float32, -bnd2, bnd2)
    b2 = jax.random.uniform(ks[3], (C2_OUT,), jnp.float32, -bnd2, bnd2)
    wl = jax.random.uniform(ks[4], (1, FLAT), jnp.float32, -bndl, bndl)
    bl = jax.random.uniform(ks[5], (1,), jnp.float32, -bndl, bndl)
    return (w1, b1, w2, b2, wl, bl)


if __name__ == "__main__":
    key = jax.random.PRNGKey(0)
    k_x, k_p = jax.random.split(key)
    B = 2
    x = jax.random.normal(k_x, (B, 1, L_IN), jnp.float32)   # PyTorch NCL input
    params = init_params(k_p)

    fwd = jax.jit(lambda xx: model_forward(xx, params))
    out = jax.block_until_ready(fwd(x))

    ref = ref_forward(x, params)
    assert out.shape == (B, 1), out.shape
    # bf16 MXU operands with f32 accumulation: validate at bf16-appropriate tolerance.
    assert jnp.allclose(out, ref, rtol=1e-2, atol=1e-2), (out, ref)
    print("KERNEL_OK")
    # TODO(synk): Dropout(p=0.25) is implemented as inference-mode identity; the
    # module's training loop (MSELoss, SGD, training-mode dropout) is not translated.
</pallas_src>

<mosaic_0001>
module attributes {stable_mosaic.version = 11 : i64} {
  func.func @_forward_kernel(%arg0: i32, %arg1: memref<1x128x42xbf16, #tpu.memory_space<vmem>>, %arg2: memref<512x42xbf16, #tpu.memory_space<vmem>>, %arg3: memref<512x42xbf16, #tpu.memory_space<vmem>>, %arg4: memref<512x1xf32, #tpu.memory_space<vmem>>, %arg5: memref<448x512xbf16, #tpu.memory_space<vmem>>, %arg6: memref<448x512xbf16, #tpu.memory_space<vmem>>, %arg7: memref<448x1xf32, #tpu.memory_space<vmem>>, %arg8: memref<1x448xbf16, #tpu.memory_space<vmem>>, %arg9: memref<1x1xf32, #tpu.memory_space<vmem>>, %arg10: memref<1x1x128xf32, #tpu.memory_space<vmem>>) attributes {dimension_semantics = [#tpu.dimension_semantics<parallel>], iteration_bounds = array<i64: 1>, scalar_prefetch = 0 : i64, scratch_operands = 0 : i64, tpu.core_type = #tpu.core_type<tc>, window_params = [{transform_indices = @transform_0, window_bounds = array<i64: 1, 128, 42>}, {pipeline_mode = #tpu.pipeline_mode<synchronous>, transform_indices = @transform_1, window_bounds = array<i64: 512, 42>}, {pipeline_mode = #tpu.pipeline_mode<synchronous>, transform_indices = @transform_2, window_bounds = array<i64: 512, 42>}, {pipeline_mode = #tpu.pipeline_mode<synchronous>, transform_indices = @transform_3, window_bounds = array<i64: 512, 1>}, {pipeline_mode = #tpu.pipeline_mode<synchronous>, transform_indices = @transform_4, window_bounds = array<i64: 448, 512>}, {pipeline_mode = #tpu.pipeline_mode<synchronous>, transform_indices = @transform_5, window_bounds = array<i64: 448, 512>}, {pipeline_mode = #tpu.pipeline_mode<synchronous>, transform_indices = @transform_6, window_bounds = array<i64: 448, 1>}, {pipeline_mode = #tpu.pipeline_mode<synchronous>, transform_indices = @transform_7, window_bounds = array<i64: 1, 448>}, {pipeline_mode = #tpu.pipeline_mode<synchronous>, transform_indices = @transform_8, window_bounds = array<i64: 1, 1>}, {transform_indices = @transform_9, window_bounds = array<i64: 1, 1, 128>}]} {
    %c0 = arith.constant 0 : index
    %c0_0 = arith.constant 0 : index
    %c0_1 = arith.constant 0 : index
    %0 = vector.load %arg1[%c0, %c0_0, %c0_1] : memref<1x128x42xbf16, #tpu.memory_space<vmem>>, vector<1x128x42xbf16>
    %1 = vector.shape_cast %0 : vector<1x128x42xbf16> to vector<128x42xbf16>
    %c0_2 = arith.constant 0 : index
    %c0_3 = arith.constant 0 : index
    %2 = vector.load %arg2[%c0_2, %c0_3] : memref<512x42xbf16, #tpu.memory_space<vmem>>, vector<512x42xbf16>
    %cst = arith.constant dense<0.000000e+00> : vector<512x128xf32>
    %3 = tpu.matmul %2, %1, %cst {dimension_numbers = #tpu.dot_dimension_numbers<[1], [1], [0], [0], [0, 0, 1, 0], [], []>} : vector<512x42xbf16>, vector<128x42xbf16>, vector<512x128xf32> -> vector<512x128xf32>
    %c0_4 = arith.constant 0 : index
    %c0_5 = arith.constant 0 : index
    %4 = vector.load %arg3[%c0_4, %c0_5] : memref<512x42xbf16, #tpu.memory_space<vmem>>, vector<512x42xbf16>
    %cst_6 = arith.constant dense<0.000000e+00> : vector<512x128xf32>
    %5 = tpu.matmul %4, %1, %cst_6 {dimension_numbers = #tpu.dot_dimension_numbers<[1], [1], [0], [0], [0, 0, 1, 0], [], []>} : vector<512x42xbf16>, vector<128x42xbf16>, vector<512x128xf32> -> vector<512x128xf32>
    %c0_7 = arith.constant 0 : index
    %c0_8 = arith.constant 0 : index
    %6 = vector.load %arg4[%c0_7, %c0_8] : memref<512x1xf32, #tpu.memory_space<vmem>>, vector<512x1xf32>
    %7 = vector.broadcast %6 : vector<512x1xf32> to vector<512x128xf32>
    %8 = arith.addf %3, %7 : vector<512x128xf32>
    %cst_9 = arith.constant 0.000000e+00 : f32
    %9 = vector.broadcast %cst_9 : f32 to vector<512x128xf32>
    %10 = arith.maximumf %8, %9 : vector<512x128xf32>
    %11 = vector.broadcast %6 : vector<512x1xf32> to vector<512x128xf32>
    %12 = arith.addf %5, %11 : vector<512x128xf32>
    %cst_10 = arith.constant 0.000000e+00 : f32
    %13 = vector.broadcast %cst_10 : f32 to vector<512x128xf32>
    %14 = arith.maximumf %12, %13 : vector<512x128xf32>
    %15 = arith.maximumf %10, %14 : vector<512x128xf32>
    %16 = arith.truncf %15 : vector<512x128xf32> to vector<512x128xbf16>
    %c0_11 = arith.constant 0 : index
    %c0_12 = arith.constant 0 : index
    %17 = vector.load %arg5[%c0_11, %c0_12] : memref<448x512xbf16, #tpu.memory_space<vmem>>, vector<448x512xbf16>
    %cst_13 = arith.constant dense<0.000000e+00> : vector<448x128xf32>
    %18 = tpu.matmul %17, %16, %cst_13 {dimension_numbers = #tpu.dot_dimension_numbers<[1], [0], [0], [1], [0, 0, 1, 1], [], []>} : vector<448x512xbf16>, vector<512x128xbf16>, vector<448x128xf32> -> vector<448x128xf32>
    %c0_14 = arith.constant 0 : index
    %c0_15 = arith.constant 0 : index
    %19 = vector.load %arg6[%c0_14, %c0_15] : memref<448x512xbf16, #tpu.memory_space<vmem>>, vector<448x512xbf16>
    %cst_16 = arith.constant dense<0.000000e+00> : vector<448x128xf32>
    %20 = tpu.matmul %19, %16, %cst_16 {dimension_numbers = #tpu.dot_dimension_numbers<[1], [0], [0], [1], [0, 0, 1, 1], [], []>} : vector<448x512xbf16>, vector<512x128xbf16>, vector<448x128xf32> -> vector<448x128xf32>
    %c0_17 = arith.constant 0 : index
    %c0_18 = arith.constant 0 : index
    %21 = vector.load %arg7[%c0_17, %c0_18] : memref<448x1xf32, #tpu.memory_space<vmem>>, vector<448x1xf32>
    %22 = vector.broadcast %21 : vector<448x1xf32> to vector<448x128xf32>
    %23 = arith.addf %18, %22 : vector<448x128xf32>
    %cst_19 = arith.constant 0.000000e+00 : f32
    %24 = vector.broadcast %cst_19 : f32 to vector<448x128xf32>
    %25 = arith.maximumf %23, %24 : vector<448x128xf32>
    %26 = vector.broadcast %21 : vector<448x1xf32> to vector<448x128xf32>
    %27 = arith.addf %20, %26 : vector<448x128xf32>
    %cst_20 = arith.constant 0.000000e+00 : f32
    %28 = vector.broadcast %cst_20 : f32 to vector<448x128xf32>
    %29 = arith.maximumf %27, %28 : vector<448x128xf32>
    %30 = arith.maximumf %25, %29 : vector<448x128xf32>
    %31 = arith.truncf %30 : vector<448x128xf32> to vector<448x128xbf16>
    %c0_21 = arith.constant 0 : index
    %c0_22 = arith.constant 0 : index
    %32 = vector.load %arg8[%c0_21, %c0_22] : memref<1x448xbf16, #tpu.memory_space<vmem>>, vector<1x448xbf16>
    %cst_23 = arith.constant dense<0.000000e+00> : vector<1x128xf32>
    %33 = tpu.matmul %32, %31, %cst_23 {dimension_numbers = #tpu.dot_dimension_numbers<[1], [0], [0], [1], [0, 0, 1, 1], [], []>} : vector<1x448xbf16>, vector<448x128xbf16>, vector<1x128xf32> -> vector<1x128xf32>
    %c0_24 = arith.constant 0 : index
    %c0_25 = arith.constant 0 : index
    %34 = vector.load %arg9[%c0_24, %c0_25] : memref<1x1xf32, #tpu.memory_space<vmem>>, vector<1x1xf32>
    %35 = vector.broadcast %34 : vector<1x1xf32> to vector<1x128xf32>
    %36 = arith.addf %33, %35 : vector<1x128xf32>
    %c0_26 = arith.constant 0 : index
    %c0_27 = arith.constant 0 : index
    %c0_28 = arith.constant 0 : index
    %37 = vector.load %arg10[%c0_26, %c0_27, %c0_28] : memref<1x1x128xf32, #tpu.memory_space<vmem>>, vector<1x1x128xf32>
    %38 = vector.shape_cast %37 : vector<1x1x128xf32> to vector<1x128xf32>
    %39 = vector.shape_cast %36 : vector<1x128xf32> to vector<1x1x128xf32>
    tpu.vector_store %arg10[%c0_26, %c0_27, %c0_28], %39 {strides = array<i32>} : memref<1x1x128xf32, #tpu.memory_space<vmem>>, vector<1x1x128xf32>,
    return
  }
  func.func @transform_0(%arg0: i32) -> (i32, i32, i32) {
    %c0_i32 = arith.constant 0 : i32
    %c0_i32_0 = arith.constant 0 : i32
    %c0_i32_1 = arith.constant 0 : i32
    return %arg0, %c0_i32, %c0_i32_0 : i32, i32, i32
  }
  func.func @transform_1(%arg0: i32) -> (i32, i32) {
    %c0_i32 = arith.constant 0 : i32
    %c0_i32_0 = arith.constant 0 : i32
    %c0_i32_1 = arith.constant 0 : i32
    return %c0_i32, %c0_i32_0 : i32, i32
  }
  func.func @transform_2(%arg0: i32) -> (i32, i32) {
    %c0_i32 = arith.constant 0 : i32
    %c0_i32_0 = arith.constant 0 : i32
    %c0_i32_1 = arith.constant 0 : i32
    return %c0_i32, %c0_i32_0 : i32, i32
  }
  func.func @transform_3(%arg0: i32) -> (i32, i32) {
    %c0_i32 = arith.constant 0 : i32
    %c0_i32_0 = arith.constant 0 : i32
    %c0_i32_1 = arith.constant 0 : i32
    return %c0_i32, %c0_i32_0 : i32, i32
  }
  func.func @transform_4(%arg0: i32) -> (i32, i32) {
    %c0_i32 = arith.constant 0 : i32
    %c0_i32_0 = arith.constant 0 : i32
    %c0_i32_1 = arith.constant 0 : i32
    return %c0_i32, %c0_i32_0 : i32, i32
  }
  func.func @transform_5(%arg0: i32) -> (i32, i32) {
    %c0_i32 = arith.constant 0 : i32
    %c0_i32_0 = arith.constant 0 : i32
    %c0_i32_1 = arith.constant 0 : i32
    return %c0_i32, %c0_i32_0 : i32, i32
  }
  func.func @transform_6(%arg0: i32) -> (i32, i32) {
    %c0_i32 = arith.constant 0 : i32
    %c0_i32_0 = arith.constant 0 : i32
    %c0_i32_1 = arith.constant 0 : i32
    return %c0_i32, %c0_i32_0 : i32, i32
  }
  func.func @transform_7(%arg0: i32) -> (i32, i32) {
    %c0_i32 = arith.constant 0 : i32
    %c0_i32_0 = arith.constant 0 : i32
    %c0_i32_1 = arith.constant 0 : i32
    return %c0_i32, %c0_i32_0 : i32, i32
  }
  func.func @transform_8(%arg0: i32) -> (i32, i32) {
    %c0_i32 = arith.constant 0 : i32
    %c0_i32_0 = arith.constant 0 : i32
    %c0_i32_1 = arith.constant 0 : i32
    return %c0_i32, %c0_i32_0 : i32, i32
  }
  func.func @transform_9(%arg0: i32) -> (i32, i32, i32) {
    %c0_i32 = arith.constant 0 : i32
    %c0_i32_0 = arith.constant 0 : i32
    %c0_i32_1 = arith.constant 0 : i32
    return %arg0, %c0_i32, %c0_i32_0 : i32, i32, i32
  }
}

</mosaic_0001>

<bundles_post_ra>
// kernel: _lambda_.1
= control target key start
LH: loop header
LB: loop body
LE: loop exit
PB: predicated region body
PF: predicated region fallthrough
CT: control target
= control target key end

     0   :  { %v8369_v0 = vmov 0   ;;  %vm763_vm0 = vcmask 343040   ;;  %vm4885_vm1 = vcmask 523264   ;;  %s8359_s3 = inlined_call_operand.vmem [shape: f32[512,1], index: 3, kind: input, shape index: {}]   ;;  %s8360_s0 = inlined_call_operand.vmem [shape: bf16[1,128,42], index: 0, kind: input, shape index: {}]   ;;  %s8361_s1 = inlined_call_operand.vmem [shape: bf16[512,42], index: 1, kind: input, shape index: {}]   ;;  %s8362_s2 = inlined_call_operand.vmem [shape: bf16[512,42], index: 2, kind: input, shape index: {}]   ;;  %s8363_s8 = inlined_call_operand.<no memory space> [shape: f32[1,1], index: 8, kind: input, shape index: {}]   ;;  %s8364_s6 = inlined_call_operand.vmem [shape: f32[448,1], index: 6, kind: input, shape index: {}]   ;;  %s8365_s4 = inlined_call_operand.vmem [shape: bf16[448,512], index: 4, kind: input, shape index: {}]   ;;  %s8366_s5 = inlined_call_operand.vmem [shape: bf16[448,512], index: 5, kind: input, shape index: {}]   ;;  %s8367_s7 = inlined_call_operand.vmem [shape: bf16[1,448], index: 7, kind: input, shape index: {}]   ;;  %s8368_s9 = inlined_call_operand.vmem [shape: f32[1,1,128], index: 9, kind: output, shape index: {}]  }
   0x1   :  { %5953 = vset.pattern.permute.xlu1 %v8369_v0  ;;  %5952 = vset.pattern.permute.xlu0 %v8369_v0  ;;  %v181_v1 = vld [vmem:[%s8359_s3 + $0x10] sm:$0xff]  ;;  %v179_v2 = vld [vmem:[%s8359_s3] sm:$0xff]  ;;  %v182_v4 = vld [vmem:[%s8359_s3 + $0x18] sm:$0xff] }
   0x2   :  { %255 = vperm.xlu1 %5953, %v181_v1   ;;  %245 = vperm.xlu0 %5952, %v179_v2   ;;  %v5954_v3 = vld [vmem:[%s8360_s0] sm:$0xff]   ;;  %v180_v5 = vld [vmem:[%s8359_s3 + $0x8] sm:$0xff]  ;;  %v186_v11 = vld [vmem:[%s8359_s3 + $0x38] sm:$0xff] }
   0x3   :  { %5934 = vmatprep.subr.msk.bf16.mxu0 %vm763_vm0, %v5954_v3  ;;  %5942 = vmatprep.subr.msk.bf16.mxu1 %vm763_vm0, %v5954_v3  ;;  %v861_v6 = vsel %vm763_vm0, %v5954_v3, 0  ;;  %v5955_v7 = vld [vmem:[%s8360_s0 + $0x8] sm:$0xff]   ;;  %v183_v9 = vld [vmem:[%s8359_s3 + $0x20] sm:$0xff]  ;;  %v185_v12 = vld [vmem:[%s8359_s3 + $0x30] sm:$0xff] }
   0x4   :  { %5439 = vmatpush3.bf16.xpose.msra.mxu0 %v861_v6  ;;  %5519 = vmatpush3.bf16.xpose.msra.mxu1 %v861_v6  ;;  %v184_v8 = vld [vmem:[%s8359_s3 + $0x28] sm:$0xff]  ;;  %v864_v10 = vsel %vm763_vm0, %v5955_v7, 0  ;;  %v5956_v13 = vld [vmem:[%s8360_s0 + $0x10] sm:$0xff]   ;;  %v187_v15 = vld [vmem:[%s8359_s3 + $0x40] sm:$0xff] }
   0x5   :  { %5935 = vmatprep.subr.msk.bf16.mxu0 %vm763_vm0, %v5955_v7  ;;  %5943 = vmatprep.subr.msk.bf16.mxu1 %vm763_vm0, %v5955_v7  ;;  %v188_v14 = vld [vmem:[%s8359_s3 + $0x48] sm:$0xff]  ;;  %v867_v16 = vsel %vm763_vm0, %v5956_v13, 0  ;;  %v190_v17 = vld [vmem:[%s8359_s3 + $0x58] sm:$0xff]  ;;  %v189_v18 = vld [vmem:[%s8359_s3 + $0x50] sm:$0xff] }
   0x6   :  { %260 = vperm.xlu1 %5953, %v182_v4   ;;  %250 = vperm.xlu0 %5952, %v180_v5   ;;  %v5957_v19 = vld [vmem:[%s8360_s0 + $0x18] sm:$0xff]   ;;  %v192_v20 = vld [vmem:[%s8359_s3 + $0x68] sm:$0xff]  ;;  %v5962_v21 = vld [vmem:[%s8361_s1] sm:$0xff]  }
   0x7   :  { %v5963_v22 = vld [vmem:[%s8362_s2] sm:$0xff]   ;;  %5454 = vmatprep.mubr.msk.bf16.mxu0 %vm763_vm0, %v5962_v21  ;;  %v194_v24 = vld [vmem:[%s8359_s3 + $0x78] sm:$0xff]  ;;  %v870_v25 = vsel %vm763_vm0, %v5957_v19, 0  ;;  %v193_v26 = vld [vmem:[%s8359_s3 + $0x70] sm:$0xff] }
   0x8   :  { %v191_v23 = vld [vmem:[%s8359_s3 + $0x60] sm:$0xff]  ;;  %5534 = vmatprep.mubr.msk.bf16.mxu1 %vm763_vm0, %v5963_v22  ;;  %v196_v28 = vld [vmem:[%s8359_s3 + $0x88] sm:$0xff]  ;;  %v198_v31 = vld [vmem:[%s8359_s3 + $0x98] sm:$0xff] }
   0x9   :  { %v5958_v27 = vld [vmem:[%s8360_s0 + $0x20] sm:$0xff]   ;;  %v197_v32 = vld [vmem:[%s8359_s3 + $0x90] sm:$0xff]  ;;  %v5959_v33 = vld [vmem:[%s8360_s0 + $0x28] sm:$0xff]  }
   0xa   :  { %270 = vperm.xlu1 %5953, %v184_v8   ;;  %265 = vperm.xlu0 %5952, %v183_v9   ;;  %v195_v29 = vld [vmem:[%s8359_s3 + $0x80] sm:$0xff]  ;;  %v873_v30 = vsel %vm763_vm0, %v5958_v27, 0  ;;  %v200_v34 = vld [vmem:[%s8359_s3 + $0xa8] sm:$0xff]  ;;  %v202_v36 = vld [vmem:[%s8359_s3 + $0xb8] sm:$0xff]  ;;  %v876_v37 = vsel %vm763_vm0, %v5959_v33, 0 }
   0xb   :  { %v199_v35 = vld [vmem:[%s8359_s3 + $0xa0] sm:$0xff]  ;;  %v201_v38 = vld [vmem:[%s8359_s3 + $0xb0] sm:$0xff]  ;;  %v204_v40 = vld [vmem:[%s8359_s3 + $0xc8] sm:$0xff] }
   0xc   :  { %5441 = vmatpush3.bf16.xpose.msra.mxu0 %v864_v10  ;;  %5521 = vmatpush3.bf16.xpose.msra.mxu1 %v864_v10  ;;  %v5960_v39 = vld [vmem:[%s8360_s0 + $0x30] sm:$0xff]   ;;  %v203_v41 = vld [vmem:[%s8359_s3 + $0xc0] sm:$0xff]  ;;  %v206_v43 = vld [vmem:[%s8359_s3 + $0xd8] sm:$0xff] }
   0xd   :  { %5936 = vmatprep.subr.msk.bf16.mxu0 %vm763_vm0, %v5956_v13  ;;  %5944 = vmatprep.subr.msk.bf16.mxu1 %vm763_vm0, %v5956_v13  ;;  %v879_v42 = vsel %vm763_vm0, %v5960_v39, 0  ;;  %v205_v44 = vld [vmem:[%s8359_s3 + $0xd0] sm:$0xff]  ;;  %v5961_v45 = vld [vmem:[%s8360_s0 + $0x38] sm:$0xff]   ;;  %v208_v46 = vld [vmem:[%s8359_s3 + $0xe8] sm:$0xff] }
   0xe   :  { %280 = vperm.xlu1 %5953, %v186_v11   ;;  %275 = vperm.xlu0 %5952, %v185_v12   ;;  %v207_v47 = vld [vmem:[%s8359_s3 + $0xe0] sm:$0xff]  ;;  %v882_v48 = vsel %vm763_vm0, %v5961_v45, 0  ;;  %v210_v49 = vld [vmem:[%s8359_s3 + $0xf8] sm:$0xff]  ;;  %v209_v50 = vld [vmem:[%s8359_s3 + $0xf0] sm:$0xff] }
   0xf   :  { %v212_v51 = vld [vmem:[%s8359_s3 + $0x108] sm:$0xff]  ;;  %v211_v52 = vld [vmem:[%s8359_s3 + $0x100] sm:$0xff]  ;;  %v5966_v55 = vld [vmem:[%s8361_s1 + $0x10] sm:$0xff]  }
  0x10   :  { %v5964_v53 = vld [vmem:[%s8361_s1 + $0x8] sm:$0xff]   ;;  %v5967_v56 = vld [vmem:[%s8362_s2 + $0x10] sm:$0xff]   ;;  %v214_v57 = vld [vmem:[%s8359_s3 + $0x118] sm:$0xff] }
  0x11   :  { %v5965_v54 = vld [vmem:[%s8362_s2 + $0x8] sm:$0xff]   ;;  %v213_v58 = vld [vmem:[%s8359_s3 + $0x110] sm:$0xff]  ;;  %v215_v60 = vld [vmem:[%s8359_s3 + $0x120] sm:$0xff] }
  0x12   :  { %290 = vperm.xlu1 %5953, %v188_v14   ;;  %285 = vperm.xlu0 %5952, %v187_v15   ;;  %v216_v59 = vld [vmem:[%s8359_s3 + $0x128] sm:$0xff]  ;;  %v5968_v61 = vld [vmem:[%s8361_s1 + $0x18] sm:$0xff]   ;;  %v5970_v63 = vld [vmem:[%s8361_s1 + $0x20] sm:$0xff]  }
  0x13   :  { %v5969_v62 = vld [vmem:[%s8362_s2 + $0x18] sm:$0xff]   ;;  %v5971_v1 = vld [vmem:[%s8362_s2 + $0x20] sm:$0xff]   ;;  %v217_v3 = vld [vmem:[%s8359_s3 + $0x130] sm:$0xff] }
  0x14   :  { %5443 = vmatpush3.bf16.xpose.msra.mxu0 %v867_v16  ;;  %5523 = vmatpush3.bf16.xpose.msra.mxu1 %v867_v16  ;;  %v218_v2 = vld [vmem:[%s8359_s3 + $0x138] sm:$0xff]  ;;  %v220_v4 = vld [vmem:[%s8359_s3 + $0x148] sm:$0xff]  ;;  %v219_v5 = vld [vmem:[%s8359_s3 + $0x140] sm:$0xff] }
  0x15   :  { %5937 = vmatprep.subr.msk.bf16.mxu0 %vm763_vm0, %v5957_v19  ;;  %5945 = vmatprep.subr.msk.bf16.mxu1 %vm763_vm0, %v5957_v19  ;;  %v5972_v6 = vld [vmem:[%s8361_s1 + $0x28] sm:$0xff]   ;;  %v5974_v8 = vld [vmem:[%s8361_s1 + $0x30] sm:$0xff]   ;;  %v222_v10 = vld [vmem:[%s8359_s3 + $0x158] sm:$0xff] }
  0x16   :  { %300 = vperm.xlu1 %5953, %v190_v17   ;;  %295 = vperm.xlu0 %5952, %v189_v18   ;;  %v5973_v7 = vld [vmem:[%s8362_s2 + $0x28] sm:$0xff]   ;;  %v5975_v9 = vld [vmem:[%s8362_s2 + $0x30] sm:$0xff]   ;;  %v223_v13 = vld [vmem:[%s8359_s3 + $0x160] sm:$0xff] }
  0x17   :  { %v221_v11 = vld [vmem:[%s8359_s3 + $0x150] sm:$0xff]  ;;  %v224_v12 = vld [vmem:[%s8359_s3 + $0x168] sm:$0xff]  ;;  %v5976_v14 = vld [vmem:[%s8361_s1 + $0x38] sm:$0xff]  }
  0x18   :  { %v5977_v15 = vld [vmem:[%s8362_s2 + $0x38] sm:$0xff]   ;;  %v5978_v16 = vld [vmem:[%s8361_s1 + $0x40] sm:$0xff]   ;;  %v225_v19 = vld [vmem:[%s8359_s3 + $0x170] sm:$0xff] }
  0x19   :  { %v5979_v17 = vld [vmem:[%s8362_s2 + $0x40] sm:$0xff]   ;;  %v226_v18 = vld [vmem:[%s8359_s3 + $0x178] sm:$0xff]  ;;  %v5980_v22 = vld [vmem:[%s8361_s1 + $0x48] sm:$0xff]  }
  0x1a   :  { %310 = vperm.xlu1 %5953, %v192_v20   ;;  %305 = vperm.xlu0 %5952, %v191_v23   ;;  %v228_v20 = vld [vmem:[%s8359_s3 + $0x188] sm:$0xff]  ;;  %v227_v21 = vld [vmem:[%s8359_s3 + $0x180] sm:$0xff] }
  0x1b   :  { %v5981_v23 = vld [vmem:[%s8362_s2 + $0x48] sm:$0xff]  }
  0x1c   :  { %5445 = vmatpush3.bf16.xpose.msra.mxu0 %v870_v25  ;;  %5525 = vmatpush3.bf16.xpose.msra.mxu1 %v870_v25  ;;  %v5983_v25 = vld [vmem:[%s8362_s2 + $0x50] sm:$0xff]  }
  0x1d   :  { %5938 = vmatprep.subr.msk.bf16.mxu0 %vm763_vm0, %v5958_v27  ;;  %5946 = vmatprep.subr.msk.bf16.mxu1 %vm763_vm0, %v5958_v27  ;;  %v229_v27 = vld [vmem:[%s8359_s3 + $0x190] sm:$0xff] }
  0x1e   :  { %320 = vperm.xlu1 %5953, %v194_v24   ;;  %315 = vperm.xlu0 %5952, %v193_v26   ;;  %v5982_v24 = vld [vmem:[%s8361_s1 + $0x50] sm:$0xff]   ;;  %v230_v26 = vld [vmem:[%s8359_s3 + $0x198] sm:$0xff] }
  0x22   :  { %330 = vperm.xlu1 %5953, %v196_v28   ;;  %325 = vperm.xlu0 %5952, %v195_v29   ;;  %v232_v28 = vld [vmem:[%s8359_s3 + $0x1a8] sm:$0xff]  ;;  %v231_v29 = vld [vmem:[%s8359_s3 + $0x1a0] sm:$0xff] }
  0x24   :  { %5447 = vmatpush3.bf16.xpose.msra.mxu0 %v873_v30  ;;  %5527 = vmatpush3.bf16.xpose.msra.mxu1 %v873_v30  ;;  %v5984_v30 = vld [vmem:[%s8361_s1 + $0x58] sm:$0xff]  }
  0x25   :  { %5939 = vmatprep.subr.msk.bf16.mxu0 %vm763_vm0, %v5959_v33  ;;  %5947 = vmatprep.subr.msk.bf16.mxu1 %vm763_vm0, %v5959_v33  ;;  %v5987_v33 = vld [vmem:[%s8362_s2 + $0x60] sm:$0xff]  }
  0x26   :  { %340 = vperm.xlu1 %5953, %v198_v31   ;;  %335 = vperm.xlu0 %5952, %v197_v32   ;;  %v5985_v31 = vld [vmem:[%s8362_s2 + $0x58] sm:$0xff]   ;;  %v5986_v32 = vld [vmem:[%s8361_s1 + $0x60] sm:$0xff]  }
  0x2a   :  { %350 = vperm.xlu1 %5953, %v200_v34   ;;  %345 = vperm.xlu0 %5952, %v199_v35   ;;  %v14_v34 = vstv %s8363_s8  ;;  %v234_v35 = vld [vmem:[%s8359_s3 + $0x1b8] sm:$0xff] }
  0x2b   :  { %15 = vst [vmem:[#allocation2] sm:$0x1] %v14_v34  ;;  %v6018_v34 = vld [vmem:[%s8361_s1 + $0xe0] sm:$0xff]  }
  0x2c   :  { %5449 = vmatpush3.bf16.xpose.msra.mxu0 %v876_v37  ;;  %5529 = vmatpush3.bf16.xpose.msra.mxu1 %v876_v37  ;;  %v236_v37 = vld [vmem:[%s8359_s3 + $0x1c8] sm:$0xff] }
  0x2d   :  { %5940 = vmatprep.subr.msk.bf16.mxu0 %vm763_vm0, %v5960_v39  ;;  %5948 = vmatprep.subr.msk.bf16.mxu1 %vm763_vm0, %v5960_v39  ;;  %v5988_v39 = vld [vmem:[%s8361_s1 + $0x68] sm:$0xff]  }
  0x2e   :  { %360 = vperm.xlu1 %5953, %v202_v36   ;;  %355 = vperm.xlu0 %5952, %v201_v38   ;;  %v233_v36 = vld [vmem:[%s8359_s3 + $0x1b0] sm:$0xff]  ;;  %v235_v38 = vld [vmem:[%s8359_s3 + $0x1c0] sm:$0xff] }
  0x32   :  { %370 = vperm.xlu1 %5953, %v204_v40   ;;  %365 = vperm.xlu0 %5952, %v203_v41   ;;  %v5989_v40 = vld [vmem:[%s8362_s2 + $0x68] sm:$0xff]   ;;  %v5990_v41 = vld [vmem:[%s8361_s1 + $0x70] sm:$0xff]  }
  0x34   :  { %5451 = vmatpush3.bf16.xpose.msra.mxu0 %v879_v42  ;;  %5531 = vmatpush3.bf16.xpose.msra.mxu1 %v879_v42  ;;  %v5991_v42 = vld [vmem:[%s8362_s2 + $0x70] sm:$0xff]  }
  0x35   :  { %5941 = vmatprep.subr.msk.bf16.mxu0 %vm763_vm0, %v5961_v45  ;;  %5949 = vmatprep.subr.msk.bf16.mxu1 %vm763_vm0, %v5961_v45  ;;  %v240_v45 = vld [vmem:[%s8359_s3 + $0x1e8] sm:$0xff] }
  0x36   :  { %380 = vperm.xlu1 %5953, %v206_v43   ;;  %375 = vperm.xlu0 %5952, %v205_v44   ;;  %v238_v43 = vld [vmem:[%s8359_s3 + $0x1d8] sm:$0xff]  ;;  %v237_v44 = vld [vmem:[%s8359_s3 + $0x1d0] sm:$0xff] }
  0x3a   :  { %390 = vperm.xlu1 %5953, %v208_v46   ;;  %385 = vperm.xlu0 %5952, %v207_v47   ;;  %v239_v46 = vld [vmem:[%s8359_s3 + $0x1e0] sm:$0xff]  ;;  %v5992_v47 = vld [vmem:[%s8361_s1 + $0x78] sm:$0xff]  }
  0x3c   :  { %5453 = vmatpush3.bf16.xpose.msra.mxu0 %v882_v48  ;;  %5533 = vmatpush3.bf16.xpose.msra.mxu1 %v882_v48  ;;  %v5993_v48 = vld [vmem:[%s8362_s2 + $0x78] sm:$0xff]  }
  0x3d   :  { %3062 = vmatprep.subr.bf16.mxu0 %v8369_v0  ;;  %4192 = vmatprep.subr.bf16.mxu1 %v8369_v0 }
  0x3e   :  { %400 = vperm.xlu1 %5953, %v210_v49   ;;  %395 = vperm.xlu0 %5952, %v209_v50   ;;  %v5994_v49 = vld [vmem:[%s8361_s1 + $0x80] sm:$0xff]  }
  0x3f   :  { %v5995_v50 = vld [vmem:[%s8362_s2 + $0x80] sm:$0xff]  }
  0x42   :  { %410 = vperm.xlu1 %5953, %v212_v51   ;;  %405 = vperm.xlu0 %5952, %v211_v52   ;;  %v242_v51 = vld [vmem:[%s8359_s3 + $0x1f8] sm:$0xff]  ;;  %v241_v52 = vld [vmem:[%s8359_s3 + $0x1f0] sm:$0xff] }
  0x43   :  { %5455 = vmatmul.mubr.msk.bf16.vlgmr.msra.gmra.mrb[0].mxu0 %vm763_vm0, %v5964_v53  ;;  %5535 = vmatmul.mubr.msk.bf16.vlgmr.msra.gmra.mrb[0].mxu1 %vm763_vm0, %v5965_v54  ;;  %v2199_v53 = vld [vmem:[%s8364_s6 + $0x108] sm:$0xff]  ;;  %v2198_v54 = vld [vmem:[%s8364_s6 + $0x100] sm:$0xff] }
  0x44   :  { %5458 = vmatprep.mubr.msk.bf16.mxu0 %vm763_vm0, %v5966_v55  ;;  %5538 = vmatprep.mubr.msk.bf16.mxu1 %vm763_vm0, %v5967_v56  ;;  %v5996_v55 = vld [vmem:[%s8361_s1 + $0x88] sm:$0xff]  }
  0x45   :  { %v5997_v56 = vld [vmem:[%s8362_s2 + $0x88] sm:$0xff]  }
  0x46   :  { %420 = vperm.xlu1 %5953, %v214_v57   ;;  %415 = vperm.xlu0 %5952, %v213_v58   ;;  %v5998_v57 = vld [vmem:[%s8361_s1 + $0x90] sm:$0xff]  }
  0x47   :  { %v5999_v58 = vld [vmem:[%s8362_s2 + $0x90] sm:$0xff]  }
  0x4a   :  { %430 = vperm.xlu1 %5953, %v216_v59   ;;  %425 = vperm.xlu0 %5952, %v215_v60   ;;  %v2201_v59 = vld [vmem:[%s8364_s6 + $0x118] sm:$0xff]  ;;  %v2200_v60 = vld [vmem:[%s8364_s6 + $0x110] sm:$0xff] }
  0x4b   :  { %5459 = vmatmul.mubr.msk.bf16.gmra.mrb[4].mxu0 %vm763_vm0, %v5968_v61  ;;  %5539 = vmatmul.mubr.msk.bf16.gmra.mrb[4].mxu1 %vm763_vm0, %v5969_v62  ;;  %v2203_v61 = vld [vmem:[%s8364_s6 + $0x128] sm:$0xff]  ;;  %v2202_v62 = vld [vmem:[%s8364_s6 + $0x120] sm:$0xff] }
  0x4c   :  { %5462 = vmatprep.mubr.msk.bf16.mxu0 %vm763_vm0, %v5970_v63  ;;  %5542 = vmatprep.mubr.msk.bf16.mxu1 %vm763_vm0, %v5971_v1  ;;  %v6000_v63 = vld [vmem:[%s8361_s1 + $0x98] sm:$0xff]  }
  0x4d   :  { %v6001_v1 = vld [vmem:[%s8362_s2 + $0x98] sm:$0xff]  }
  0x4e   :  { %440 = vperm.xlu1 %5953, %v218_v2   ;;  %435 = vperm.xlu0 %5952, %v217_v3   ;;  %v6002_v2 = vld [vmem:[%s8361_s1 + $0xa0] sm:$0xff]  }
  0x4f   :  { %v6003_v3 = vld [vmem:[%s8362_s2 + $0xa0] sm:$0xff]  }
  0x52   :  { %450 = vperm.xlu1 %5953, %v220_v4   ;;  %445 = vperm.xlu0 %5952, %v219_v5   ;;  %v2183_v4 = vld [vmem:[%s8364_s6 + $0x88] sm:$0xff]  ;;  %v2182_v5 = vld [vmem:[%s8364_s6 + $0x80] sm:$0xff] }
  0x53   :  { %5463 = vmatmul.mubr.msk.bf16.gmra.mrb[8].mxu0 %vm763_vm0, %v5972_v6  ;;  %5543 = vmatmul.mubr.msk.bf16.gmra.mrb[8].mxu1 %vm763_vm0, %v5973_v7  ;;  %v2167_v6 = vld [vmem:[%s8364_s6 + $0x8] sm:$0xff]  ;;  %v2166_v7 = vld [vmem:[%s8364_s6] sm:$0xff] }
  0x54   :  { %5466 = vmatprep.mubr.msk.bf16.mxu0 %vm763_vm0, %v5974_v8  ;;  %5546 = vmatprep.mubr.msk.bf16.mxu1 %vm763_vm0, %v5975_v9  ;;  %v6004_v8 = vld [vmem:[%s8361_s1 + $0xa8] sm:$0xff]  }
  0x55   :  { %v6005_v9 = vld [vmem:[%s8362_s2 + $0xa8] sm:$0xff]  }
  0x56   :  { %460 = vperm.xlu1 %5953, %v222_v10   ;;  %455 = vperm.xlu0 %5952, %v221_v11   ;;  %v6006_v10 = vld [vmem:[%s8361_s1 + $0xb0] sm:$0xff]  }
  0x57   :  { %v6007_v11 = vld [vmem:[%s8362_s2 + $0xb0] sm:$0xff]  }
  0x5a   :  { %470 = vperm.xlu1 %5953, %v224_v12   ;;  %465 = vperm.xlu0 %5952, %v223_v13   ;;  %v2205_v12 = vld [vmem:[%s8364_s6 + $0x138] sm:$0xff]  ;;  %v2204_v13 = vld [vmem:[%s8364_s6 + $0x130] sm:$0xff] }
  0x5b   :  { %5467 = vmatmul.mubr.msk.bf16.gmra.mrb[12].mxu0 %vm763_vm0, %v5976_v14  ;;  %5547 = vmatmul.mubr.msk.bf16.gmra.mrb[12].mxu1 %vm763_vm0, %v5977_v15  ;;  %v2185_v14 = vld [vmem:[%s8364_s6 + $0x98] sm:$0xff]  ;;  %v2184_v15 = vld [vmem:[%s8364_s6 + $0x90] sm:$0xff] }
  0x5c   :  { %5470 = vmatprep.mubr.msk.bf16.mxu0 %vm763_vm0, %v5978_v16  ;;  %5550 = vmatprep.mubr.msk.bf16.mxu1 %vm763_vm0, %v5979_v17  ;;  %v6008_v16 = vld [vmem:[%s8361_s1 + $0xb8] sm:$0xff]  }
  0x5d   :  { %v6009_v17 = vld [vmem:[%s8362_s2 + $0xb8] sm:$0xff]  }
  0x5e   :  { %480 = vperm.xlu1 %5953, %v226_v18   ;;  %475 = vperm.xlu0 %5952, %v225_v19   ;;  %v6010_v18 = vld [vmem:[%s8361_s1 + $0xc0] sm:$0xff]  }
  0x5f   :  { %v6011_v19 = vld [vmem:[%s8362_s2 + $0xc0] sm:$0xff]  }
  0x62   :  { %490 = vperm.xlu1 %5953, %v228_v20   ;;  %485 = vperm.xlu0 %5952, %v227_v21   ;;  %v2169_v20 = vld [vmem:[%s8364_s6 + $0x18] sm:$0xff]  ;;  %v2168_v21 = vld [vmem:[%s8364_s6 + $0x10] sm:$0xff] }
  0x63   :  { %5471 = vmatmul.mubr.msk.bf16.gmra.mrb[16].mxu0 %vm763_vm0, %v5980_v22  ;;  %5551 = vmatmul.mubr.msk.bf16.gmra.mrb[16].mxu1 %vm763_vm0, %v5981_v23  ;;  %v2207_v22 = vld [vmem:[%s8364_s6 + $0x148] sm:$0xff]  ;;  %v2206_v23 = vld [vmem:[%s8364_s6 + $0x140] sm:$0xff] }
  0x64   :  { %5474 = vmatprep.mubr.msk.bf16.mxu0 %vm763_vm0, %v5982_v24  ;;  %5554 = vmatprep.mubr.msk.bf16.mxu1 %vm763_vm0, %v5983_v25  ;;  %v6012_v24 = vld [vmem:[%s8361_s1 + $0xc8] sm:$0xff]  }
  0x65   :  { %v6013_v25 = vld [vmem:[%s8362_s2 + $0xc8] sm:$0xff]  }
  0x66   :  { %500 = vperm.xlu1 %5953, %v230_v26   ;;  %495 = vperm.xlu0 %5952, %v229_v27   ;;  %v6014_v26 = vld [vmem:[%s8361_s1 + $0xd0] sm:$0xff]  }
  0x67   :  { %v6015_v27 = vld [vmem:[%s8362_s2 + $0xd0] sm:$0xff]  }
  0x6a   :  { %510 = vperm.xlu1 %5953, %v232_v28   ;;  %505 = vperm.xlu0 %5952, %v231_v29   ;;  %v2187_v28 = vld [vmem:[%s8364_s6 + $0xa8] sm:$0xff]  ;;  %v2186_v29 = vld [vmem:[%s8364_s6 + $0xa0] sm:$0xff] }
  0x6b   :  { %5475 = vmatmul.mubr.msk.bf16.gmra.mrb[20].mxu0 %vm763_vm0, %v5984_v30  ;;  %5555 = vmatmul.mubr.msk.bf16.gmra.mrb[20].mxu1 %vm763_vm0, %v5985_v31  ;;  %v2171_v30 = vld [vmem:[%s8364_s6 + $0x28] sm:$0xff]  ;;  %v2170_v31 = vld [vmem:[%s8364_s6 + $0x20] sm:$0xff] }
  0x6c   :  { %5478 = vmatprep.mubr.msk.bf16.mxu0 %vm763_vm0, %v5986_v32  ;;  %5558 = vmatprep.mubr.msk.bf16.mxu1 %vm763_vm0, %v5987_v33  ;;  %v6016_v32 = vld [vmem:[%s8361_s1 + $0xd8] sm:$0xff]  }
  0x6d   :  { %v6017_v33 = vld [vmem:[%s8362_s2 + $0xd8] sm:$0xff]  }
  0x6e   :  { %520 = vperm.xlu1 %5953, %v234_v35   ;;  %515 = vperm.xlu0 %5952, %v233_v36   ;;  %v6019_v35 = vld [vmem:[%s8362_s2 + $0xe0] sm:$0xff]   ;;  %v2209_v36 = vld [vmem:[%s8364_s6 + $0x158] sm:$0xff] }
  0x72   :  { %530 = vperm.xlu1 %5953, %v236_v37   ;;  %525 = vperm.xlu0 %5952, %v235_v38   ;;  %v2208_v37 = vld [vmem:[%s8364_s6 + $0x150] sm:$0xff]  ;;  %v2189_v38 = vld [vmem:[%s8364_s6 + $0xb8] sm:$0xff] }
  0x73   :  { %5479 = vmatmul.mubr.msk.bf16.gmra.mrb[24].mxu0 %vm763_vm0, %v5988_v39  ;;  %5559 = vmatmul.mubr.msk.bf16.gmra.mrb[24].mxu1 %vm763_vm0, %v5989_v40  ;;  %v2188_v39 = vld [vmem:[%s8364_s6 + $0xb0] sm:$0xff] }
  0x74   :  { %5482 = vmatprep.mubr.msk.bf16.mxu0 %vm763_vm0, %v5990_v41  ;;  %5562 = vmatprep.mubr.msk.bf16.mxu1 %vm763_vm0, %v5991_v42  ;;  %v6020_v41 = vld [vmem:[%s8361_s1 + $0xe8] sm:$0xff]  }
  0x75   :  { %v6021_v42 = vld [vmem:[%s8362_s2 + $0xe8] sm:$0xff]  }
  0x76   :  { %540 = vperm.xlu1 %5953, %v238_v43   ;;  %535 = vperm.xlu0 %5952, %v237_v44   ;;  %v6022_v43 = vld [vmem:[%s8361_s1 + $0xf0] sm:$0xff]  }
  0x77   :  { %v6023_v44 = vld [vmem:[%s8362_s2 + $0xf0] sm:$0xff]  }
  0x7a   :  { %550 = vperm.xlu1 %5953, %v240_v45   ;;  %545 = vperm.xlu0 %5952, %v239_v46   ;;  %v2173_v46 = vld [vmem:[%s8364_s6 + $0x38] sm:$0xff] }
  0x7b   :  { %5483 = vmatmul.mubr.msk.bf16.gmra.mrb[28].mxu0 %vm763_vm0, %v5992_v47  ;;  %5563 = vmatmul.mubr.msk.bf16.gmra.mrb[28].mxu1 %vm763_vm0, %v5993_v48  ;;  %v2172_v47 = vld [vmem:[%s8364_s6 + $0x30] sm:$0xff] }
  0x7c   :  { %5486 = vmatprep.mubr.msk.bf16.mxu0 %vm763_vm0, %v5994_v49  ;;  %5566 = vmatprep.mubr.msk.bf16.mxu1 %vm763_vm0, %v5995_v50  ;;  %v2211_v49 = vld [vmem:[%s8364_s6 + $0x168] sm:$0xff]  ;;  %v2210_v50 = vld [vmem:[%s8364_s6 + $0x160] sm:$0xff] }
  0x7e   :  { %560 = vperm.xlu1 %5953, %v242_v51   ;;  %555 = vperm.xlu0 %5952, %v241_v52   ;;  %v6024_v52 = vld [vmem:[%s8361_s1 + $0xf8] sm:$0xff]  }
  0x81   :  { %v6971_v40 = vpop.permute.xlu0 %245  ;;  %v6985_v45 = vpop.permute.xlu1 %255 }
  0x82   :  { %2389 = vperm.xlu1 %5953, %v2199_v53   ;;  %2384 = vperm.xlu0 %5952, %v2198_v54   ;;  %v6025_v53 = vld [vmem:[%s8362_s2 + $0xf8] sm:$0xff]   ;;  %v2191_v54 = vld [vmem:[%s8364_s6 + $0xc8] sm:$0xff] }
  0x83   :  { %5487 = vmatmul.mubr.msk.bf16.gmra.mrb[32].mxu0 %vm763_vm0, %v5996_v55  ;;  %5567 = vmatmul.mubr.msk.bf16.gmra.mrb[32].mxu1 %vm763_vm0, %v5997_v56  ;;  %v2190_v55 = vld [vmem:[%s8364_s6 + $0xc0] sm:$0xff] }
  0x84   :  { %5490 = vmatprep.mubr.msk.bf16.mxu0 %vm763_vm0, %v5998_v57  ;;  %5570 = vmatprep.mubr.msk.bf16.mxu1 %vm763_vm0, %v5999_v58  ;;  %v2175_v58 = vld [vmem:[%s8364_s6 + $0x48] sm:$0xff] }
  0x85   :  { %v6997_v48 = vpop.permute.xlu0 %250  ;;  %v7005_v51 = vpop.permute.xlu1 %260 }
  0x86   :  { %2399 = vperm.xlu1 %5953, %v2201_v59   ;;  %2394 = vperm.xlu0 %5952, %v2200_v60   ;;  %v2174_v59 = vld [vmem:[%s8364_s6 + $0x40] sm:$0xff] }
  0x89   :  { %v7019_v56 = vpop.permute.xlu0 %265  ;;  %v7023_v57 = vpop.permute.xlu1 %270 }
  0x8a   :  { %2409 = vperm.xlu1 %5953, %v2203_v61   ;;  %2404 = vperm.xlu0 %5952, %v2202_v62   ;;  %v2213_v61 = vld [vmem:[%s8364_s6 + $0x178] sm:$0xff]  ;;  %v2212_v62 = vld [vmem:[%s8364_s6 + $0x170] sm:$0xff] }
  0x8b   :  { %5491 = vmatmul.mubr.msk.bf16.gmra.mrb[36].mxu0 %vm763_vm0, %v6000_v63  ;;  %5571 = vmatmul.mubr.msk.bf16.gmra.mrb[36].mxu1 %vm763_vm0, %v6001_v1  ;;  %v2193_v1 = vld [vmem:[%s8364_s6 + $0xd8] sm:$0xff] }
  0x8c   :  { %5494 = vmatprep.mubr.msk.bf16.mxu0 %vm763_vm0, %v6002_v2  ;;  %5574 = vmatprep.mubr.msk.bf16.mxu1 %vm763_vm0, %v6003_v3  ;;  %v2192_v2 = vld [vmem:[%s8364_s6 + $0xd0] sm:$0xff] }
  0x8d   :  { %v7031_v60 = vpop.permute.xlu0 %275  ;;  %v7039_v63 = vpop.permute.xlu1 %280 }
  0x8e   :  { %2309 = vperm.xlu1 %5953, %v2183_v4   ;;  %2304 = vperm.xlu0 %5952, %v2182_v5   ;;  %v2177_v5 = vld [vmem:[%s8364_s6 + $0x58] sm:$0xff] }
  0x91   :  { %v7047_v3 = vpop.permute.xlu0 %285  ;;  %v7049_v4 = vpop.permute.xlu1 %290 }
  0x92   :  { %2229 = vperm.xlu1 %5953, %v2167_v6   ;;  %2224 = vperm.xlu0 %5952, %v2166_v7   ;;  %v2176_v6 = vld [vmem:[%s8364_s6 + $0x50] sm:$0xff] }
  0x93   :  { %5495 = vmatmul.mubr.msk.bf16.gmra.mrb[40].mxu0 %vm763_vm0, %v6004_v8  ;;  %5575 = vmatmul.mubr.msk.bf16.gmra.mrb[40].mxu1 %vm763_vm0, %v6005_v9  ;;  %v2215_v8 = vld [vmem:[%s8364_s6 + $0x188] sm:$0xff]  ;;  %v2214_v9 = vld [vmem:[%s8364_s6 + $0x180] sm:$0xff] }
  0x94   :  { %5498 = vmatprep.mubr.msk.bf16.mxu0 %vm763_vm0, %v6006_v10  ;;  %5578 = vmatprep.mubr.msk.bf16.mxu1 %vm763_vm0, %v6007_v11  ;;  %v2195_v11 = vld [vmem:[%s8364_s6 + $0xe8] sm:$0xff] }
  0x95   :  { %v7057_v7 = vpop.permute.xlu0 %295  ;;  %v7065_v10 = vpop.permute.xlu1 %300 }
  0x96   :  { %2419 = vperm.xlu1 %5953, %v2205_v12   ;;  %2414 = vperm.xlu0 %5952, %v2204_v13   ;;  %v2194_v12 = vld [vmem:[%s8364_s6 + $0xe0] sm:$0xff] }
  0x99   :  { %v7073_v13 = vpop.permute.xlu0 %305 }
  0x9a   :  { %2319 = vperm.xlu1 %5953, %v2185_v14   ;;  %2314 = vperm.xlu0 %5952, %v2184_v15   ;;  %v7075_v14 = vpop.permute.xlu1 %310  ;;  %v2179_v15 = vld [vmem:[%s8364_s6 + $0x68] sm:$0xff] }
  0x9b   :  { %5499 = vmatmul.mubr.msk.bf16.gmra.mrb[44].mxu0 %vm763_vm0, %v6008_v16  ;;  %5579 = vmatmul.mubr.msk.bf16.gmra.mrb[44].mxu1 %vm763_vm0, %v6009_v17  ;;  %v2178_v16 = vld [vmem:[%s8364_s6 + $0x60] sm:$0xff] }
  0x9c   :  { %5502 = vmatprep.mubr.msk.bf16.mxu0 %vm763_vm0, %v6010_v18  ;;  %5582 = vmatprep.mubr.msk.bf16.mxu1 %vm763_vm0, %v6011_v19  ;;  %v2217_v18 = vld [vmem:[%s8364_s6 + $0x198] sm:$0xff]  ;;  %v2216_v19 = vld [vmem:[%s8364_s6 + $0x190] sm:$0xff] }
  0x9d   :  { %v7083_v17 = vpop.permute.xlu0 %315 }
  0x9e   :  { %2239 = vperm.xlu1 %5953, %v2169_v20   ;;  %2234 = vperm.xlu0 %5952, %v2168_v21   ;;  %v7091_v20 = vpop.permute.xlu1 %320  ;;  %v2197_v21 = vld [vmem:[%s8364_s6 + $0xf8] sm:$0xff] }
  0xa2   :  { %2429 = vperm.xlu1 %5953, %v2207_v22   ;;  %2424 = vperm.xlu0 %5952, %v2206_v23   ;;  %v2196_v22 = vld [vmem:[%s8364_s6 + $0xf0] sm:$0xff]  ;;  %v7099_v23 = vpop.permute.xlu0 %325 }
  0xa3   :  { %5503 = vmatmul.mubr.msk.bf16.gmra.mrb[48].mxu0 %vm763_vm0, %v6012_v24  ;;  %5583 = vmatmul.mubr.msk.bf16.gmra.mrb[48].mxu1 %vm763_vm0, %v6013_v25  ;;  %v6028_v24 = vld [vmem:[%s8365_s4 + $0x4] ss:$16 sps:$4 sm:$0xff]   ;;  %v2181_v25 = vld [vmem:[%s8364_s6 + $0x78] sm:$0xff] }
  0xa4   :  { %5506 = vmatprep.mubr.msk.bf16.mxu0 %vm763_vm0, %v6014_v26  ;;  %5586 = vmatprep.mubr.msk.bf16.mxu1 %vm763_vm0, %v6015_v27  ;;  %v7107_v26 = vpop.permute.xlu1 %330  ;;  %v2180_v27 = vld [vmem:[%s8364_s6 + $0x70] sm:$0xff] }
  0xa6   :  { %2329 = vperm.xlu1 %5953, %v2187_v28   ;;  %2324 = vperm.xlu0 %5952, %v2186_v29   ;;  %v6031_v28 = vld [vmem:[%s8366_s5 + $0x4] ss:$16 sps:$4 sm:$0xff]   ;;  %v2219_v29 = vld [vmem:[%s8364_s6 + $0x1a8] sm:$0xff] }
  0xaa   :  { %2249 = vperm.xlu1 %5953, %v2171_v30   ;;  %2244 = vperm.xlu0 %5952, %v2170_v31   ;;  %v2218_v30 = vld [vmem:[%s8364_s6 + $0x1a0] sm:$0xff]  ;;  %v7121_v31 = vpop.permute.xlu0 %335 }
  0xab   :  { %5507 = vmatmul.mubr.msk.bf16.gmra.mrb[52].mxu0 %vm763_vm0, %v6016_v32  ;;  %5587 = vmatmul.mubr.msk.bf16.gmra.mrb[52].mxu1 %vm763_vm0, %v6017_v33  ;;  %v7123_v32 = vpop.permute.xlu1 %340  ;;  %v2221_v33 = vld [vmem:[%s8364_s6 + $0x1b8] sm:$0xff] }
  0xac   :  { %5510 = vmatprep.mubr.msk.bf16.mxu0 %vm763_vm0, %v6018_v34  ;;  %5590 = vmatprep.mubr.msk.bf16.mxu1 %vm763_vm0, %v6019_v35  ;;  %v2220_v34 = vld [vmem:[%s8364_s6 + $0x1b0] sm:$0xff] }
  0xae   :  { %2439 = vperm.xlu1 %5953, %v2209_v36   ;;  %2434 = vperm.xlu0 %5952, %v2208_v37   ;;  %v7131_v35 = vpop.permute.xlu0 %345  ;;  %v4847_v36 = vld [vmem:[#allocation2] sm:$0x1] }
  0xaf   :  { %v7133_v37 = vpop.permute.xlu1 %350 }
  0xb2   :  { %2339 = vperm.xlu1 %5953, %v2189_v38   ;;  %2334 = vperm.xlu0 %5952, %v2188_v39   ;;  %v7135_v38 = vpop.permute.xlu0 %355 }
  0xb3   :  { %5511 = vmatmul.mubr.msk.bf16.gmra.mrb[56].mxu0 %vm763_vm0, %v6020_v41  ;;  %5591 = vmatmul.mubr.msk.bf16.gmra.mrb[56].mxu1 %vm763_vm0, %v6021_v42  ;;  %v7137_v39 = vpop.permute.xlu1 %360 }
  0xb4   :  { %5514 = vmatprep.mubr.msk.bf16.mxu0 %vm763_vm0, %v6022_v43  ;;  %5594 = vmatprep.mubr.msk.bf16.mxu1 %vm763_vm0, %v6023_v44 }
  0xb6   :  { %2259 = vperm.xlu1 %5953, %v2173_v46   ;;  %2254 = vperm.xlu0 %5952, %v2172_v47   ;;  %v7141_v42 = vpop.permute.xlu0 %365 }
  0xb7   :  { %v7139_v41 = vpop.permute.xlu1 %370 }
  0xba   :  { %2449 = vperm.xlu1 %5953, %v2211_v49   ;;  %2444 = vperm.xlu0 %5952, %v2210_v50   ;;  %v7145_v44 = vpop.permute.xlu0 %375 }
  0xbb   :  { %5515 = vmatmul.mubr.msk.bf16.gmra.mrb[60].mxu0 %vm763_vm0, %v6024_v52  ;;  %5595 = vmatmul.mubr.msk.bf16.gmra.mrb[60].mxu1 %vm763_vm0, %v6025_v53  ;;  %v7143_v43 = vpop.permute.xlu1 %380 }
  0xbc   :  { %3094 = vmatprep.mubr.bf16.mxu0 %v6028_v24  ;;  %4224 = vmatprep.mubr.bf16.mxu1 %v6031_v28 }
  0xbe   :  { %2349 = vperm.xlu1 %5953, %v2191_v54   ;;  %2344 = vperm.xlu0 %5952, %v2190_v55   ;;  %v7149_v47 = vpop.permute.xlu0 %385 }
  0xbf   :  { %v7147_v46 = vpop.permute.xlu1 %390 }
  0xc2   :  { %2269 = vperm.xlu1 %5953, %v2175_v58   ;;  %2264 = vperm.xlu0 %5952, %v2174_v59   ;;  %v7153_v50 = vpop.permute.xlu0 %395 }
  0xc3   :  { %v7151_v49 = vpop.permute.xlu1 %400 }
  0xc6   :  { %2459 = vperm.xlu1 %5953, %v2213_v61   ;;  %2454 = vperm.xlu0 %5952, %v2212_v62   ;;  %v7157_v53 = vpop.permute.xlu0 %405 }
  0xc7   :  { %v7155_v52 = vpop.permute.xlu1 %410 }
  0xca   :  { %2359 = vperm.xlu1 %5953, %v2193_v1   ;;  %2354 = vperm.xlu0 %5952, %v2192_v2   ;;  %v7169_v28 = vpop.permute.xlu0 %415 }
  0xce   :  { %2279 = vperm.xlu1 %5953, %v2177_v5   ;;  %2274 = vperm.xlu0 %5952, %v2176_v6  }
  0xd2   :  { %2469 = vperm.xlu1 %5953, %v2215_v8   ;;  %2464 = vperm.xlu0 %5952, %v2214_v9  }
  0xd6   :  { %2369 = vperm.xlu1 %5953, %v2195_v11   ;;  %2364 = vperm.xlu0 %5952, %v2194_v12  }
  0xda   :  { %2289 = vperm.xlu1 %5953, %v2179_v15   ;;  %2284 = vperm.xlu0 %5952, %v2178_v16  }
  0xde   :  { %2479 = vperm.xlu1 %5953, %v2217_v18   ;;  %2474 = vperm.xlu0 %5952, %v2216_v19  }
  0xe2   :  { %2379 = vperm.xlu1 %5953, %v2197_v21   ;;  %2374 = vperm.xlu0 %5952, %v2196_v22  }
  0xe6   :  { %2299 = vperm.xlu1 %5953, %v2181_v25   ;;  %2294 = vperm.xlu0 %5952, %v2180_v27   ;;  %v7167_v27 = vpop.permute.xlu1 %420 }
  0xea   :  { %2489 = vperm.xlu1 %5953, %v2219_v29   ;;  %2484 = vperm.xlu0 %5952, %v2218_v30  }
  0xee   :  { %2499 = vperm.xlu1 %5953, %v2221_v33   ;;  %2494 = vperm.xlu0 %5952, %v2220_v34  }
  0xf2   :  { %4850 = vperm.xlu0 %5952, %v4847_v36  }
 0x116   :  { %v5456_v54 = vpop.f32.mrb[0].mxu0  ;;  %v5536_v55 = vpop.f32.mrb[0].mxu1 }
 0x117   :  { %v927_v58 = vadd.f32 %v5456_v54, %v6985_v45  ;;  %v1536_v59 = vadd.f32 %v5536_v55, %v6985_v45  ;;  %v918_v61 = vpop.f32.mrb[1].mxu0  ;;  %v1527_v62 = vpop.f32.mrb[1].mxu1 }
 0x118   :  { %v919_v1 = vadd.f32 %v918_v61, %v6971_v40  ;;  %v1528_v2 = vadd.f32 %v1527_v62, %v6971_v40  ;;  %v5457_v8 = vpop.f32.mrb[2].mxu0  ;;  %v5537_v9 = vpop.f32.mrb[2].mxu1 }
 0x119   :  { %v1175_v5 = vmax.f32 %v927_v58, 0.0  ;;  %v1784_v6 = vmax.f32 %v1536_v59, 0.0  ;;  %v930_v15 = vadd.f32 %v5457_v8, %v7005_v51  ;;  %v1539_v16 = vadd.f32 %v5537_v9, %v7005_v51  ;;  %v921_v18 = vpop.f32.mrb[3].mxu0  ;;  %v1530_v19 = vpop.f32.mrb[3].mxu1 }
 0x11a   :  { %v1173_v11 = vmax.f32 %v919_v1, 0.0  ;;  %v1782_v12 = vmax.f32 %v1528_v2, 0.0  ;;  %v922_v45 = vadd.f32 %v921_v18, %v6997_v48  ;;  %v1531_v22 = vadd.f32 %v1530_v19, %v6997_v48 }
 0x11b   :  { %v1848_v21 = vmax.f32 %v1175_v5, %v1784_v6  ;;  %v1176_v25 = vmax.f32 %v930_v15, 0.0  ;;  %v1785_v40 = vmax.f32 %v1539_v16, 0.0 }
 0x11c   :  { %v1846_v24 = vmax.f32 %v1173_v11, %v1782_v12  ;;  %v1174_v29 = vmax.f32 %v922_v45, 0.0  ;;  %v1783_v30 = vmax.f32 %v1531_v22, 0.0 }
 0x11d   :  { %v1849_v33 = vmax.f32 %v1176_v25, %v1785_v40  ;;  %v7183_v25 = vpop.permute.xlu0 %425 }
 0x11e   :  { %v5460_v34 = vpop.f32.mrb[4].mxu0  ;;  %v5540_v36 = vpop.f32.mrb[4].mxu1  ;;  %v1847_v51 = vmax.f32 %v1174_v29, %v1783_v30 }
 0x11f   :  { %v943_v54 = vadd.f32 %v5460_v34, %v7031_v60  ;;  %v1552_v55 = vadd.f32 %v5540_v36, %v7031_v60  ;;  %v934_v58 = vpop.f32.mrb[5].mxu0  ;;  %v1543_v59 = vpop.f32.mrb[5].mxu1  ;;  %v1911_v48 = vpack.c.bf16 %v1849_v33, %v1848_v21 }
 0x120   :  { %v935_v61 = vadd.f32 %v934_v58, %v7019_v56  ;;  %v1544_v62 = vadd.f32 %v1543_v59, %v7019_v56  ;;  %v1910_v1 = vpack.c.bf16 %v1847_v51, %v1846_v24  ;;  %v5461_v6 = vpop.f32.mrb[6].mxu0  ;;  %v5541_v8 = vpop.f32.mrb[6].mxu1 }
 0x121   :  { %v1179_v2 = vmax.f32 %v943_v54, 0.0  ;;  %v1788_v5 = vmax.f32 %v1552_v55, 0.0  ;;  %v946_v12 = vadd.f32 %v5461_v6, %v7039_v63  ;;  %v1555_v15 = vadd.f32 %v5541_v8, %v7039_v63  ;;  %v937_v16 = vpop.f32.mrb[7].mxu0  ;;  %v1546_v60 = vpop.f32.mrb[7].mxu1 }
 0x122   :  { %v1177_v9 = vmax.f32 %v935_v61, 0.0  ;;  %v1786_v11 = vmax.f32 %v1544_v62, 0.0  ;;  %v938_v19 = vadd.f32 %v937_v16, %v7023_v57  ;;  %v1547_v21 = vadd.f32 %v1546_v60, %v7023_v57  ;;  %3063 = vmatpush1.bf16.msra.mxu0 %v1910_v1  ;;  %4193 = vmatpush1.bf16.msra.mxu1 %v1910_v1  ;;  %v7181_v24 = vpop.permute.xlu1 %430 }
 0x123   :  { %v1852_v18 = vmax.f32 %v1179_v2, %v1788_v5  ;;  %v1180_v45 = vmax.f32 %v946_v12, 0.0  ;;  %v1789_v22 = vmax.f32 %v1555_v15, 0.0  ;;  %3064 = vmatprep.subr.bf16.mxu0 %v8369_v0  ;;  %4194 = vmatprep.subr.bf16.mxu1 %v8369_v0 }
 0x124   :  { %v1850_v56 = vmax.f32 %v1177_v9, %v1786_v11  ;;  %v1178_v63 = vmax.f32 %v938_v19, 0.0  ;;  %v1787_v40 = vmax.f32 %v1547_v21, 0.0  ;;  %v7199_v21 = vpop.permute.xlu0 %435 }
 0x125   :  { %v1853_v29 = vmax.f32 %v1180_v45, %v1789_v22 }
 0x126   :  { %v5464_v30 = vpop.f32.mrb[8].mxu0  ;;  %v5544_v33 = vpop.f32.mrb[8].mxu1  ;;  %v1851_v34 = vmax.f32 %v1178_v63, %v1787_v40  ;;  %3065 = vmatpush1.bf16.msra.mxu0 %v1911_v48  ;;  %4195 = vmatpush1.bf16.msra.mxu1 %v1911_v48 }
 0x127   :  { %v959_v57 = vadd.f32 %v5464_v30, %v7057_v7  ;;  %v1568_v36 = vadd.f32 %v5544_v33, %v7057_v7  ;;  %v950_v51 = vpop.f32.mrb[9].mxu0  ;;  %v1559_v54 = vpop.f32.mrb[9].mxu1  ;;  %v1913_v55 = vpack.c.bf16 %v1853_v29, %v1852_v18  ;;  %3066 = vmatprep.subr.bf16.mxu0 %v8369_v0  ;;  %4196 = vmatprep.subr.bf16.mxu1 %v8369_v0 }
 0x128   :  { %v951_v58 = vadd.f32 %v950_v51, %v7047_v3  ;;  %v1560_v59 = vadd.f32 %v1559_v54, %v7047_v3  ;;  %v1912_v61 = vpack.c.bf16 %v1851_v34, %v1850_v56  ;;  %v5465_v2 = vpop.f32.mrb[10].mxu0  ;;  %v5545_v5 = vpop.f32.mrb[10].mxu1 }
 0x129   :  { %v1183_v62 = vmax.f32 %v959_v57, 0.0  ;;  %v1792_v1 = vmax.f32 %v1568_v36, 0.0  ;;  %v962_v48 = vadd.f32 %v5465_v2, %v7065_v10  ;;  %v1571_v8 = vadd.f32 %v5545_v5, %v7065_v10  ;;  %v953_v9 = vpop.f32.mrb[11].mxu0  ;;  %v1562_v11 = vpop.f32.mrb[11].mxu1 }
 0x12a   :  { %v1181_v6 = vmax.f32 %v951_v58, 0.0  ;;  %v1790_v7 = vmax.f32 %v1560_v59, 0.0  ;;  %v954_v3 = vadd.f32 %v953_v9, %v7049_v4  ;;  %v1563_v15 = vadd.f32 %v1562_v11, %v7049_v4  ;;  %3067 = vmatpush1.bf16.msra.mxu0 %v1912_v61  ;;  %4197 = vmatpush1.bf16.msra.mxu1 %v1912_v61  ;;  %v7197_v19 = vpop.permute.xlu1 %440 }
 0x12b   :  { %v1856_v12 = vmax.f32 %v1183_v62, %v1792_v1  ;;  %v1184_v60 = vmax.f32 %v962_v48, 0.0  ;;  %v1793_v18 = vmax.f32 %v1571_v8, 0.0  ;;  %3068 = vmatprep.subr.bf16.mxu0 %v8369_v0  ;;  %4198 = vmatprep.subr.bf16.mxu1 %v8369_v0 }
 0x12c   :  { %v1854_v16 = vmax.f32 %v1181_v6, %v1790_v7  ;;  %v1182_v10 = vmax.f32 %v954_v3, 0.0  ;;  %v1791_v56 = vmax.f32 %v1563_v15, 0.0 }
 0x12d   :  { %v1857_v45 = vmax.f32 %v1184_v60, %v1793_v18 }
 0x12e   :  { %v5468_v22 = vpop.f32.mrb[12].mxu0  ;;  %v5548_v63 = vpop.f32.mrb[12].mxu1  ;;  %v1855_v40 = vmax.f32 %v1182_v10, %v1791_v56  ;;  %3069 = vmatpush1.bf16.msra.mxu0 %v1913_v55  ;;  %4199 = vmatpush1.bf16.msra.mxu1 %v1913_v55 }
 0x12f   :  { %v975_v4 = vadd.f32 %v5468_v22, %v7083_v17  ;;  %v1584_v29 = vadd.f32 %v5548_v63, %v7083_v17  ;;  %v966_v30 = vpop.f32.mrb[13].mxu0  ;;  %v1575_v33 = vpop.f32.mrb[13].mxu1  ;;  %v1915_v34 = vpack.c.bf16 %v1857_v45, %v1856_v12  ;;  %3070 = vmatprep.subr.bf16.mxu0 %v8369_v0  ;;  %4200 = vmatprep.subr.bf16.mxu1 %v8369_v0 }
 0x130   :  { %v967_v57 = vadd.f32 %v966_v30, %v7073_v13  ;;  %v1576_v36 = vadd.f32 %v1575_v33, %v7073_v13  ;;  %v1914_v51 = vpack.c.bf16 %v1855_v40, %v1854_v16  ;;  %v5469_v59 = vpop.f32.mrb[14].mxu0  ;;  %v5549_v61 = vpop.f32.mrb[14].mxu1 }
 0x131   :  { %v1187_v54 = vmax.f32 %v975_v4, 0.0  ;;  %v1796_v58 = vmax.f32 %v1584_v29, 0.0  ;;  %v978_v55 = vadd.f32 %v5469_v59, %v7091_v20  ;;  %v1587_v1 = vadd.f32 %v5549_v61, %v7091_v20  ;;  %v969_v2 = vpop.f32.mrb[15].mxu0  ;;  %v1578_v5 = vpop.f32.mrb[15].mxu1 }
 0x132   :  { %v1185_v62 = vmax.f32 %v967_v57, 0.0  ;;  %v1794_v17 = vmax.f32 %v1576_v36, 0.0  ;;  %v970_v13 = vadd.f32 %v969_v2, %v7075_v14  ;;  %v1579_v7 = vadd.f32 %v1578_v5, %v7075_v14  ;;  %3071 = vmatpush1.bf16.msra.mxu0 %v1914_v51  ;;  %4201 = vmatpush1.bf16.msra.mxu1 %v1914_v51  ;;  %v7213_v11 = vpop.permute.xlu1 %450  ;;  %v7215_v12 = vpop.permute.xlu0 %445 }
 0x133   :  { %v1860_v6 = vmax.f32 %v1187_v54, %v1796_v58  ;;  %v1188_v8 = vmax.f32 %v978_v55, 0.0  ;;  %v1797_v9 = vmax.f32 %v1587_v1, 0.0  ;;  %3072 = vmatprep.subr.bf16.mxu0 %v8369_v0  ;;  %4202 = vmatprep.subr.bf16.mxu1 %v8369_v0 }
 0x134   :  { %v1858_v48 = vmax.f32 %v1185_v62, %v1794_v17  ;;  %v1186_v20 = vmax.f32 %v970_v13, 0.0  ;;  %v1795_v3 = vmax.f32 %v1579_v7, 0.0 }
 0x135   :  { %v1861_v15 = vmax.f32 %v1188_v8, %v1797_v9 }
 0x136   :  { %v5472_v16 = vpop.f32.mrb[16].mxu0  ;;  %v5552_v60 = vpop.f32.mrb[16].mxu1  ;;  %v1859_v18 = vmax.f32 %v1186_v20, %v1795_v3  ;;  %3073 = vmatpush1.bf16.msra.mxu0 %v1915_v34  ;;  %4203 = vmatpush1.bf16.msra.mxu1 %v1915_v34 }
 0x137   :  { %v991_v14 = vadd.f32 %v5472_v16, %v7121_v31  ;;  %v1600_v10 = vadd.f32 %v5552_v60, %v7121_v31  ;;  %v982_v56 = vpop.f32.mrb[17].mxu0  ;;  %v1591_v45 = vpop.f32.mrb[17].mxu1  ;;  %v1917_v22 = vpack.c.bf16 %v1861_v15, %v1860_v6  ;;  %3074 = vmatprep.subr.bf16.mxu0 %v8369_v0  ;;  %4204 = vmatprep.subr.bf16.mxu1 %v8369_v0 }
 0x138   :  { %v983_v63 = vadd.f32 %v982_v56, %v7099_v23  ;;  %v1592_v40 = vadd.f32 %v1591_v45, %v7099_v23  ;;  %v1916_v4 = vpack.c.bf16 %v1859_v18, %v1858_v48  ;;  %v5473_v33 = vpop.f32.mrb[18].mxu0  ;;  %v5553_v57 = vpop.f32.mrb[18].mxu1 }
 0x139   :  { %v1191_v29 = vmax.f32 %v991_v14, 0.0  ;;  %v1800_v30 = vmax.f32 %v1600_v10, 0.0  ;;  %v994_v34 = vadd.f32 %v5473_v33, %v7123_v32  ;;  %v1603_v51 = vadd.f32 %v5553_v57, %v7123_v32  ;;  %v985_v54 = vpop.f32.mrb[19].mxu0  ;;  %v1594_v58 = vpop.f32.mrb[19].mxu1 }
 0x13a   :  { %v1189_v36 = vmax.f32 %v983_v63, 0.0  ;;  %v1798_v31 = vmax.f32 %v1592_v40, 0.0  ;;  %v986_v23 = vadd.f32 %v985_v54, %v7107_v26  ;;  %v1595_v61 = vadd.f32 %v1594_v58, %v7107_v26  ;;  %3075 = vmatpush1.bf16.msra.mxu0 %v1916_v4  ;;  %4205 = vmatpush1.bf16.msra.mxu1 %v1916_v4  ;;  %v7229_v1 = vpop.permute.xlu1 %460  ;;  %v7231_v2 = vpop.permute.xlu0 %455 }
 0x13b   :  { %v1864_v59 = vmax.f32 %v1191_v29, %v1800_v30  ;;  %v1192_v17 = vmax.f32 %v994_v34, 0.0  ;;  %v1801_v55 = vmax.f32 %v1603_v51, 0.0  ;;  %3076 = vmatprep.subr.bf16.mxu0 %v8369_v0  ;;  %4206 = vmatprep.subr.bf16.mxu1 %v8369_v0 }
 0x13c   :  { %v1862_v62 = vmax.f32 %v1189_v36, %v1798_v31  ;;  %v1190_v32 = vmax.f32 %v986_v23, 0.0  ;;  %v1799_v5 = vmax.f32 %v1595_v61, 0.0 }
 0x13d   :  { %v1865_v6 = vmax.f32 %v1192_v17, %v1801_v55 }
 0x13e   :  { %v5476_v13 = vpop.f32.mrb[20].mxu0  ;;  %v5556_v7 = vpop.f32.mrb[20].mxu1  ;;  %v1863_v48 = vmax.f32 %v1190_v32, %v1799_v5  ;;  %3077 = vmatpush1.bf16.msra.mxu0 %v1917_v22  ;;  %4207 = vmatpush1.bf16.msra.mxu1 %v1917_v22 }
 0x13f   :  { %v1007_v26 = vadd.f32 %v5476_v13, %v7135_v38  ;;  %v1616_v8 = vadd.f32 %v5556_v7, %v7135_v38  ;;  %v998_v9 = vpop.f32.mrb[21].mxu0  ;;  %v1607_v20 = vpop.f32.mrb[21].mxu1  ;;  %v1919_v3 = vpack.c.bf16 %v1865_v6, %v1864_v59  ;;  %3078 = vmatprep.subr.bf16.mxu0 %v8369_v0  ;;  %4208 = vmatprep.subr.bf16.mxu1 %v8369_v0 }
 0x140   :  { %v999_v15 = vadd.f32 %v998_v9, %v7131_v35  ;;  %v1608_v16 = vadd.f32 %v1607_v20, %v7131_v35  ;;  %v1918_v60 = vpack.c.bf16 %v1863_v48, %v1862_v62  ;;  %v5477_v10 = vpop.f32.mrb[22].mxu0  ;;  %v5557_v56 = vpop.f32.mrb[22].mxu1 }
 0x141   :  { %v1195_v18 = vmax.f32 %v1007_v26, 0.0  ;;  %v1804_v14 = vmax.f32 %v1616_v8, 0.0  ;;  %v1010_v22 = vadd.f32 %v5477_v10, %v7137_v39  ;;  %v1619_v63 = vadd.f32 %v5557_v56, %v7137_v39  ;;  %v1001_v40 = vpop.f32.mrb[23].mxu0  ;;  %v1610_v4 = vpop.f32.mrb[23].mxu1 }
 0x142   :  { %v1193_v45 = vmax.f32 %v999_v15, 0.0  ;;  %v1802_v38 = vmax.f32 %v1608_v16, 0.0  ;;  %v1002_v35 = vadd.f32 %v1001_v40, %v7133_v37  ;;  %v1611_v30 = vadd.f32 %v1610_v4, %v7133_v37  ;;  %3079 = vmatpush1.bf16.msra.mxu0 %v1918_v60  ;;  %4209 = vmatpush1.bf16.msra.mxu1 %v1918_v60  ;;  %v7245_v31 = vpop.permute.xlu1 %470  ;;  %v7247_v34 = vpop.permute.xlu0 %465 }
 0x143   :  { %v1868_v29 = vmax.f32 %v1195_v18, %v1804_v14  ;;  %v1196_v57 = vmax.f32 %v1010_v22, 0.0  ;;  %v1805_v36 = vmax.f32 %v1619_v63, 0.0  ;;  %3080 = vmatprep.subr.bf16.mxu0 %v8369_v0  ;;  %4210 = vmatprep.subr.bf16.mxu1 %v8369_v0 }
 0x144   :  { %v1866_v33 = vmax.f32 %v1193_v45, %v1802_v38  ;;  %v1194_v39 = vmax.f32 %v1002_v35, 0.0  ;;  %v1803_v51 = vmax.f32 %v1611_v30, 0.0 }
 0x145   :  { %v1869_v54 = vmax.f32 %v1196_v57, %v1805_v36 }
 0x146   :  { %v5480_v58 = vpop.f32.mrb[24].mxu0  ;;  %v5560_v59 = vpop.f32.mrb[24].mxu1  ;;  %v1867_v23 = vmax.f32 %v1194_v39, %v1803_v51  ;;  %3081 = vmatpush1.bf16.msra.mxu0 %v1919_v3  ;;  %4211 = vmatpush1.bf16.msra.mxu1 %v1919_v3 }
 0x147   :  { %v1023_v37 = vadd.f32 %v5480_v58, %v7145_v44  ;;  %v1632_v61 = vadd.f32 %v5560_v59, %v7145_v44  ;;  %v1014_v62 = vpop.f32.mrb[25].mxu0  ;;  %v1623_v17 = vpop.f32.mrb[25].mxu1  ;;  %v1921_v55 = vpack.c.bf16 %v1869_v54, %v1868_v29  ;;  %3082 = vmatprep.subr.bf16.mxu0 %v8369_v0  ;;  %4212 = vmatprep.subr.bf16.mxu1 %v8369_v0 }
 0x148   :  { %v1015_v32 = vadd.f32 %v1014_v62, %v7141_v42  ;;  %v1624_v5 = vadd.f32 %v1623_v17, %v7141_v42  ;;  %v1920_v6 = vpack.c.bf16 %v1867_v23, %v1866_v33  ;;  %v5481_v48 = vpop.f32.mrb[26].mxu0  ;;  %v5561_v26 = vpop.f32.mrb[26].mxu1 }
 0x149   :  { %v1199_v13 = vmax.f32 %v1023_v37, 0.0  ;;  %v1808_v7 = vmax.f32 %v1632_v61, 0.0  ;;  %v1026_v9 = vadd.f32 %v5481_v48, %v7143_v43  ;;  %v1635_v20 = vadd.f32 %v5561_v26, %v7143_v43  ;;  %v1017_v3 = vpop.f32.mrb[27].mxu0  ;;  %v1626_v15 = vpop.f32.mrb[27].mxu1 }
 0x14a   :  { %v1197_v8 = vmax.f32 %v1015_v32, 0.0  ;;  %v1806_v44 = vmax.f32 %v1624_v5, 0.0  ;;  %v1018_v42 = vadd.f32 %v1017_v3, %v7139_v41  ;;  %v1627_v60 = vadd.f32 %v1626_v15, %v7139_v41  ;;  %3083 = vmatpush1.bf16.msra.mxu0 %v1920_v6  ;;  %4213 = vmatpush1.bf16.msra.mxu1 %v1920_v6  ;;  %v7261_v56 = vpop.permute.xlu1 %480  ;;  %v7263_v45 = vpop.permute.xlu0 %475 }
 0x14b   :  { %v1872_v16 = vmax.f32 %v1199_v13, %v1808_v7  ;;  %v1200_v14 = vmax.f32 %v1026_v9, 0.0  ;;  %v1809_v10 = vmax.f32 %v1635_v20, 0.0  ;;  %3084 = vmatprep.subr.bf16.mxu0 %v8369_v0  ;;  %4214 = vmatprep.subr.bf16.mxu1 %v8369_v0 }
 0x14c   :  { %v1870_v18 = vmax.f32 %v1197_v8, %v1806_v44  ;;  %v1198_v43 = vmax.f32 %v1018_v42, 0.0  ;;  %v1807_v38 = vmax.f32 %v1627_v60, 0.0 }
 0x14d   :  { %v1873_v22 = vmax.f32 %v1200_v14, %v1809_v10 }
 0x14e   :  { %v5484_v63 = vpop.f32.mrb[28].mxu0  ;;  %v5564_v40 = vpop.f32.mrb[28].mxu1  ;;  %v1871_v4 = vmax.f32 %v1198_v43, %v1807_v38  ;;  %3085 = vmatpush1.bf16.msra.mxu0 %v1921_v55  ;;  %4215 = vmatpush1.bf16.msra.mxu1 %v1921_v55 }
 0x14f   :  { %v1039_v41 = vadd.f32 %v5484_v63, %v7153_v50  ;;  %v1648_v29 = vadd.f32 %v5564_v40, %v7153_v50  ;;  %v1030_v35 = vpop.f32.mrb[29].mxu0  ;;  %v1639_v30 = vpop.f32.mrb[29].mxu1  ;;  %v1923_v33 = vpack.c.bf16 %v1873_v22, %v1872_v16  ;;  %3086 = vmatprep.subr.bf16.mxu0 %v8369_v0  ;;  %4216 = vmatprep.subr.bf16.mxu1 %v8369_v0 }
 0x150   :  { %v1031_v57 = vadd.f32 %v1030_v35, %v7149_v47  ;;  %v1640_v36 = vadd.f32 %v1639_v30, %v7149_v47  ;;  %v1922_v39 = vpack.c.bf16 %v1871_v4, %v1870_v18  ;;  %v5485_v58 = vpop.f32.mrb[30].mxu0  ;;  %v5565_v59 = vpop.f32.mrb[30].mxu1 }
 0x151   :  { %v1203_v51 = vmax.f32 %v1039_v41, 0.0  ;;  %v1812_v54 = vmax.f32 %v1648_v29, 0.0  ;;  %v1042_v37 = vadd.f32 %v5485_v58, %v7151_v49  ;;  %v1651_v61 = vadd.f32 %v5565_v59, %v7151_v49  ;;  %v1033_v62 = vpop.f32.mrb[31].mxu0  ;;  %v1642_v17 = vpop.f32.mrb[31].mxu1 }
 0x152   :  { %v1201_v23 = vmax.f32 %v1031_v57, 0.0  ;;  %v1810_v50 = vmax.f32 %v1640_v36, 0.0  ;;  %v1034_v47 = vadd.f32 %v1033_v62, %v7147_v46  ;;  %v1643_v32 = vadd.f32 %v1642_v17, %v7147_v46  ;;  %3087 = vmatpush1.bf16.msra.mxu0 %v1922_v39  ;;  %4217 = vmatpush1.bf16.msra.mxu1 %v1922_v39  ;;  %v7277_v7 = vpop.permute.xlu1 %490  ;;  %v7279_v48 = vpop.permute.xlu0 %485 }
 0x153   :  { %v1876_v55 = vmax.f32 %v1203_v51, %v1812_v54  ;;  %v1204_v6 = vmax.f32 %v1042_v37, 0.0  ;;  %v1813_v13 = vmax.f32 %v1651_v61, 0.0  ;;  %3088 = vmatprep.subr.bf16.mxu0 %v8369_v0  ;;  %4218 = vmatprep.subr.bf16.mxu1 %v8369_v0 }
 0x154   :  { %v1874_v5 = vmax.f32 %v1201_v23, %v1810_v50  ;;  %v1202_v49 = vmax.f32 %v1034_v47, 0.0  ;;  %v1811_v26 = vmax.f32 %v1643_v32, 0.0  ;;  %v6029_v50 = vld [vmem:[%s8366_s5] ss:$16 sps:$4 sm:$0xff]  }
 0x155   :  { %v1877_v8 = vmax.f32 %v1204_v6, %v1813_v13  ;;  %v6032_v6 = vld [vmem:[%s8365_s4 + $0x24] ss:$16 sps:$4 sm:$0xff]  }
 0x156   :  { %v5488_v44 = vpop.f32.mrb[32].mxu0  ;;  %v5568_v9 = vpop.f32.mrb[32].mxu1  ;;  %v1875_v20 = vmax.f32 %v1202_v49, %v1811_v26  ;;  %3089 = vmatpush1.bf16.msra.mxu0 %v1923_v33  ;;  %4219 = vmatpush1.bf16.msra.mxu1 %v1923_v33 }
 0x157   :  { %v1055_v46 = vadd.f32 %v5488_v44, %v7169_v28  ;;  %v1664_v3 = vadd.f32 %v5568_v9, %v7169_v28  ;;  %v1046_v15 = vpop.f32.mrb[33].mxu0  ;;  %v1655_v16 = vpop.f32.mrb[33].mxu1  ;;  %v1925_v42 = vpack.c.bf16 %v1877_v8, %v1876_v55  ;;  %3090 = vmatprep.subr.bf16.mxu0 %v8369_v0  ;;  %4220 = vmatprep.subr.bf16.mxu1 %v8369_v0  ;;  %v6034_v44 = vld [vmem:[%s8366_s5 + $0x24] ss:$16 sps:$4 sm:$0xff]  }
 0x158   :  { %v1047_v60 = vadd.f32 %v1046_v15, %v7157_v53  ;;  %v1656_v18 = vadd.f32 %v1655_v16, %v7157_v53  ;;  %v1924_v14 = vpack.c.bf16 %v1875_v20, %v1874_v5  ;;  %v5489_v38 = vpop.f32.mrb[34].mxu0  ;;  %v5569_v22 = vpop.f32.mrb[34].mxu1 }
 0x159   :  { %v1207_v10 = vmax.f32 %v1055_v46, 0.0  ;;  %v1816_v43 = vmax.f32 %v1664_v3, 0.0  ;;  %v1058_v40 = vadd.f32 %v5489_v38, %v7167_v27  ;;  %v1667_v4 = vadd.f32 %v5569_v22, %v7167_v27  ;;  %v1049_v41 = vpop.f32.mrb[35].mxu0  ;;  %v1658_v29 = vpop.f32.mrb[35].mxu1 }
 0x15a   :  { %v1205_v63 = vmax.f32 %v1047_v60, 0.0  ;;  %v1814_v28 = vmax.f32 %v1656_v18, 0.0  ;;  %v1050_v53 = vadd.f32 %v1049_v41, %v7155_v52  ;;  %v1659_v30 = vadd.f32 %v1658_v29, %v7155_v52  ;;  %3091 = vmatpush1.bf16.msra.mxu0 %v1924_v14  ;;  %4221 = vmatpush1.bf16.msra.mxu1 %v1924_v14  ;;  %v7293_v39 = vpop.permute.xlu1 %500  ;;  %v7295_v51 = vpop.permute.xlu0 %495  ;;  %v6026_v52 = vld [vmem:[%s8365_s4] ss:$16 sps:$4 sm:$0xff]  }
 0x15b   :  { %v1880_v35 = vmax.f32 %v1207_v10, %v1816_v43  ;;  %v1208_v57 = vmax.f32 %v1058_v40, 0.0  ;;  %v1817_v36 = vmax.f32 %v1667_v4, 0.0  ;;  %3092 = vmatprep.subr.bf16.mxu0 %v8369_v0  ;;  %4222 = vmatprep.subr.bf16.mxu1 %v8369_v0  ;;  %v6036_v40 = vld [vmem:[%s8365_s4 + $0x20] ss:$16 sps:$4 sm:$0xff]  }
 0x15c   :  { %v1878_v33 = vmax.f32 %v1205_v63, %v1814_v28  ;;  %v1206_v27 = vmax.f32 %v1050_v53, 0.0  ;;  %v1815_v54 = vmax.f32 %v1659_v30, 0.0  ;;  %v6037_v4 = vld [vmem:[%s8366_s5 + $0x20] ss:$16 sps:$4 sm:$0xff]  }
 0x15d   :  { %v1881_v58 = vmax.f32 %v1208_v57, %v1817_v36 }
 0x15e   :  { %v5492_v59 = vpop.f32.mrb[36].mxu0  ;;  %v5572_v23 = vpop.f32.mrb[36].mxu1  ;;  %v1879_v37 = vmax.f32 %v1206_v27, %v1815_v54  ;;  %3093 = vmatpush1.bf16.msra.mxu0 %v1925_v42  ;;  %4223 = vmatpush1.bf16.msra.mxu1 %v1925_v42  ;;  %v6038_v27 = vld [vmem:[%s8365_s4 + $0x44] ss:$16 sps:$4 sm:$0xff]  }
 0x15f   :  { %v1071_v61 = vadd.f32 %v5492_v59, %v7199_v21  ;;  %v1680_v62 = vadd.f32 %v5572_v23, %v7199_v21  ;;  %v1062_v17 = vpop.f32.mrb[37].mxu0  ;;  %v1671_v55 = vpop.f32.mrb[37].mxu1  ;;  %v1927_v47 = vpack.c.bf16 %v1881_v58, %v1880_v35  ;;  %3319 = vmatprep.subr.bf16.mxu0 %v8369_v0  ;;  %4449 = vmatprep.subr.bf16.mxu1 %v8369_v0 }
 0x160   :  { %v1063_v32 = vadd.f32 %v1062_v17, %v7183_v25  ;;  %v1672_v5 = vadd.f32 %v1671_v55, %v7183_v25  ;;  %v1926_v13 = vpack.c.bf16 %v1879_v37, %v1878_v33  ;;  %v5493_v26 = vpop.f32.mrb[38].mxu0  ;;  %v5573_v8 = vpop.f32.mrb[38].mxu1 }
 0x161   :  { %v1211_v49 = vmax.f32 %v1071_v61, 0.0  ;;  %v1820_v21 = vmax.f32 %v1680_v62, 0.0  ;;  %v1074_v25 = vadd.f32 %v5493_v26, %v7197_v19  ;;  %v1683_v46 = vadd.f32 %v5573_v8, %v7197_v19  ;;  %v1065_v3 = vpop.f32.mrb[39].mxu0  ;;  %v1674_v15 = vpop.f32.mrb[39].mxu1  ;;  %3095 = vmatmul.mubr.bf16.vlgmr.msra.gmra.mrb[64].mxu0 %v6026_v52  ;;  %4225 = vmatmul.mubr.bf16.vlgmr.msra.gmra.mrb[64].mxu1 %v6029_v50  ;;  %v6040_v52 = vld [vmem:[%s8366_s5 + $0x44] ss:$16 sps:$4 sm:$0xff]  }
 0x162   :  { %v1209_v9 = vmax.f32 %v1063_v32, 0.0  ;;  %v1818_v20 = vmax.f32 %v1672_v5, 0.0  ;;  %v1066_v42 = vadd.f32 %v1065_v3, %v7181_v24  ;;  %v1675_v60 = vadd.f32 %v1674_v15, %v7181_v24  ;;  %3320 = vmatpush1.bf16.msra.mxu0 %v1926_v13  ;;  %4450 = vmatpush1.bf16.msra.mxu1 %v1926_v13  ;;  %v7321_v43 = vpop.permute.xlu1 %510  ;;  %v7323_v19 = vpop.permute.xlu0 %505 }
 0x163   :  { %v1884_v16 = vmax.f32 %v1211_v49, %v1820_v21  ;;  %v1212_v14 = vmax.f32 %v1074_v25, 0.0  ;;  %v1821_v10 = vmax.f32 %v1683_v46, 0.0  ;;  %3321 = vmatprep.subr.bf16.mxu0 %v8369_v0  ;;  %4451 = vmatprep.subr.bf16.mxu1 %v8369_v0 }
 0x164   :  { %v1882_v18 = vmax.f32 %v1209_v9, %v1818_v20  ;;  %v1210_v38 = vmax.f32 %v1066_v42, 0.0  ;;  %v1819_v22 = vmax.f32 %v1675_v60, 0.0  ;;  %3102 = vmatprep.mubr.bf16.mxu0 %v6032_v6  ;;  %4232 = vmatprep.mubr.bf16.mxu1 %v6034_v44  ;;  %v6042_v9 = vld [vmem:[%s8365_s4 + $0x40] ss:$16 sps:$4 sm:$0xff]  }
 0x165   :  { %v1885_v63 = vmax.f32 %v1212_v14, %v1821_v10  ;;  %v6043_v20 = vld [vmem:[%s8366_s5 + $0x40] ss:$16 sps:$4 sm:$0xff]   ;;  %v6044_v10 = vld [vmem:[%s8365_s4 + $0x64] ss:$16 sps:$4 sm:$0xff]  }
 0x166   :  { %v5496_v28 = vpop.f32.mrb[40].mxu0  ;;  %v5576_v24 = vpop.f32.mrb[40].mxu1  ;;  %v1883_v41 = vmax.f32 %v1210_v38, %v1819_v22  ;;  %3322 = vmatpush1.bf16.msra.mxu0 %v1927_v47  ;;  %4452 = vmatpush1.bf16.msra.mxu1 %v1927_v47 }
 0x167   :  { %v1087_v29 = vadd.f32 %v5496_v28, %v7231_v2  ;;  %v1696_v35 = vadd.f32 %v5576_v24, %v7231_v2  ;;  %v1078_v53 = vpop.f32.mrb[41].mxu0  ;;  %v1687_v30 = vpop.f32.mrb[41].mxu1  ;;  %v1929_v33 = vpack.c.bf16 %v1885_v63, %v1884_v16  ;;  %3323 = vmatprep.subr.bf16.mxu0 %v8369_v0  ;;  %4453 = vmatprep.subr.bf16.mxu1 %v8369_v0  ;;  %v6046_v24 = vld [vmem:[%s8366_s5 + $0x64] ss:$16 sps:$4 sm:$0xff]  }
 0x168   :  { %v1079_v57 = vadd.f32 %v1078_v53, %v7215_v12  ;;  %v1688_v36 = vadd.f32 %v1687_v30, %v7215_v12  ;;  %v1928_v54 = vpack.c.bf16 %v1883_v41, %v1882_v18  ;;  %v5497_v59 = vpop.f32.mrb[42].mxu0  ;;  %v5577_v23 = vpop.f32.mrb[42].mxu1 }
 0x169   :  { %v1215_v58 = vmax.f32 %v1087_v29, 0.0  ;;  %v1824_v2 = vmax.f32 %v1696_v35, 0.0  ;;  %v1090_v12 = vadd.f32 %v5497_v59, %v7229_v1  ;;  %v1699_v61 = vadd.f32 %v5577_v23, %v7229_v1  ;;  %v1081_v62 = vpop.f32.mrb[43].mxu0  ;;  %v1690_v17 = vpop.f32.mrb[43].mxu1  ;;  %3103 = vmatmul.mubr.bf16.gmra.mrb[68].mxu0 %v6036_v40  ;;  %4233 = vmatmul.mubr.bf16.gmra.mrb[68].mxu1 %v6037_v4  ;;  %v6048_v23 = vld [vmem:[%s8365_s4 + $0x60] ss:$16 sps:$4 sm:$0xff]  }
 0x16a   :  { %v1213_v50 = vmax.f32 %v1079_v57, 0.0  ;;  %v1822_v37 = vmax.f32 %v1688_v36, 0.0  ;;  %v1082_v47 = vadd.f32 %v1081_v62, %v7213_v11  ;;  %v1691_v32 = vadd.f32 %v1690_v17, %v7213_v11  ;;  %3324 = vmatpush1.bf16.msra.mxu0 %v1928_v54  ;;  %4454 = vmatpush1.bf16.msra.mxu1 %v1928_v54  ;;  %v7349_v49 = vpop.permute.xlu1 %520  ;;  %v7351_v1 = vpop.permute.xlu0 %515 }
 0x16b   :  { %v1888_v55 = vmax.f32 %v1215_v58, %v1824_v2  ;;  %v1216_v6 = vmax.f32 %v1090_v12, 0.0  ;;  %v1825_v13 = vmax.f32 %v1699_v61, 0.0  ;;  %3325 = vmatprep.subr.bf16.mxu0 %v8369_v0  ;;  %4455 = vmatprep.subr.bf16.mxu1 %v8369_v0 }
 0x16c   :  { %v1886_v5 = vmax.f32 %v1213_v50, %v1822_v37  ;;  %v1214_v21 = vmax.f32 %v1082_v47, 0.0  ;;  %v1823_v26 = vmax.f32 %v1691_v32, 0.0  ;;  %3110 = vmatprep.mubr.bf16.mxu0 %v6038_v27  ;;  %4240 = vmatprep.mubr.bf16.mxu1 %v6040_v52  ;;  %v6049_v52 = vld [vmem:[%s8366_s5 + $0x60] ss:$16 sps:$4 sm:$0xff]  }
 0x16d   :  { %v1889_v8 = vmax.f32 %v1216_v6, %v1825_v13  ;;  %v6050_v6 = vld [vmem:[%s8365_s4 + $0x84] ss:$16 sps:$4 sm:$0xff]  }
 0x16e   :  { %v5500_v44 = vpop.f32.mrb[44].mxu0  ;;  %v5580_v11 = vpop.f32.mrb[44].mxu1  ;;  %v1887_v25 = vmax.f32 %v1214_v21, %v1823_v26  ;;  %3326 = vmatpush1.bf16.msra.mxu0 %v1929_v33  ;;  %4456 = vmatpush1.bf16.msra.mxu1 %v1929_v33 }
 0x16f   :  { %v1103_v46 = vadd.f32 %v5500_v44, %v7263_v45  ;;  %v1712_v3 = vadd.f32 %v5580_v11, %v7263_v45  ;;  %v1094_v15 = vpop.f32.mrb[45].mxu0  ;;  %v1703_v16 = vpop.f32.mrb[45].mxu1  ;;  %v1931_v42 = vpack.c.bf16 %v1889_v8, %v1888_v55  ;;  %3327 = vmatprep.subr.bf16.mxu0 %v8369_v0  ;;  %4457 = vmatprep.subr.bf16.mxu1 %v8369_v0 }
 0x170   :  { %v1095_v60 = vadd.f32 %v1094_v15, %v7247_v34  ;;  %v1704_v18 = vadd.f32 %v1703_v16, %v7247_v34  ;;  %v5501_v14 = vpop.f32.mrb[46].mxu0  ;;  %v1930_v38 = vpack.c.bf16 %v1887_v25, %v1886_v5  ;;  %v5581_v63 = vpop.f32.mrb[46].mxu1 }
 0x171   :  { %v1219_v45 = vmax.f32 %v1103_v46, 0.0  ;;  %v1828_v22 = vmax.f32 %v1712_v3, 0.0  ;;  %v1097_v28 = vpop.f32.mrb[47].mxu0  ;;  %v1106_v4 = vadd.f32 %v5501_v14, %v7261_v56  ;;  %v1715_v41 = vadd.f32 %v5581_v63, %v7261_v56  ;;  %v1706_v29 = vpop.f32.mrb[47].mxu1  ;;  %3111 = vmatmul.mubr.bf16.gmra.mrb[72].mxu0 %v6042_v9  ;;  %4241 = vmatmul.mubr.bf16.gmra.mrb[72].mxu1 %v6043_v20 }
 0x172   :  { %v1217_v40 = vmax.f32 %v1095_v60, 0.0  ;;  %v1826_v34 = vmax.f32 %v1704_v18, 0.0  ;;  %v1098_v53 = vadd.f32 %v1097_v28, %v7245_v31  ;;  %v1707_v30 = vadd.f32 %v1706_v29, %v7245_v31  ;;  %3328 = vmatpush1.bf16.msra.mxu0 %v1930_v38  ;;  %4458 = vmatpush1.bf16.msra.mxu1 %v1930_v38  ;;  %v7377_v27 = vpop.permute.xlu1 %530  ;;  %v7379_v56 = vpop.permute.xlu0 %525 }
 0x173   :  { %v1892_v35 = vmax.f32 %v1219_v45, %v1828_v22  ;;  %v1220_v57 = vmax.f32 %v1106_v4, 0.0  ;;  %v1829_v36 = vmax.f32 %v1715_v41, 0.0  ;;  %3329 = vmatprep.subr.bf16.mxu0 %v8369_v0  ;;  %4459 = vmatprep.subr.bf16.mxu1 %v8369_v0  ;;  %v6055_v22 = vld [vmem:[%s8366_s5 + $0x80] ss:$16 sps:$4 sm:$0xff]  }
 0x174   :  { %v1890_v33 = vmax.f32 %v1217_v40, %v1826_v34  ;;  %v1218_v54 = vmax.f32 %v1098_v53, 0.0  ;;  %v1827_v58 = vmax.f32 %v1707_v30, 0.0  ;;  %3118 = vmatprep.mubr.bf16.mxu0 %v6044_v10  ;;  %4248 = vmatprep.mubr.bf16.mxu1 %v6046_v24  ;;  %v6056_v30 = vld [vmem:[%s8365_s4 + $0xa4] ss:$16 sps:$4 sm:$0xff]  }
 0x175   :  { %v1893_v2 = vmax.f32 %v1220_v57, %v1829_v36 }
 0x176   :  { %v5504_v59 = vpop.f32.mrb[48].mxu0  ;;  %v5584_v31 = vpop.f32.mrb[48].mxu1  ;;  %v1891_v50 = vmax.f32 %v1218_v54, %v1827_v58  ;;  %3330 = vmatpush1.bf16.msra.mxu0 %v1931_v42  ;;  %4460 = vmatpush1.bf16.msra.mxu1 %v1931_v42 }
 0x177   :  { %v1119_v37 = vadd.f32 %v5504_v59, %v7295_v51  ;;  %v1728_v12 = vadd.f32 %v5584_v31, %v7295_v51  ;;  %v1110_v61 = vpop.f32.mrb[49].mxu0  ;;  %v1719_v62 = vpop.f32.mrb[49].mxu1  ;;  %v1933_v17 = vpack.c.bf16 %v1893_v2, %v1892_v35  ;;  %3331 = vmatprep.subr.bf16.mxu0 %v8369_v0  ;;  %4461 = vmatprep.subr.bf16.mxu1 %v8369_v0 }
 0x178   :  { %v1111_v55 = vadd.f32 %v1110_v61, %v7279_v48  ;;  %v1720_v47 = vadd.f32 %v1719_v62, %v7279_v48  ;;  %v5505_v32 = vpop.f32.mrb[50].mxu0  ;;  %v5585_v5 = vpop.f32.mrb[50].mxu1  ;;  %v1932_v51 = vpack.c.bf16 %v1891_v50, %v1890_v33  ;;  %v6052_v48 = vld [vmem:[%s8366_s5 + $0x84] ss:$16 sps:$4 sm:$0xff]  }
 0x179   :  { %v1223_v13 = vmax.f32 %v1119_v37, 0.0  ;;  %v1832_v21 = vmax.f32 %v1728_v12, 0.0  ;;  %v1122_v26 = vadd.f32 %v5505_v32, %v7293_v39  ;;  %v1113_v8 = vpop.f32.mrb[51].mxu0  ;;  %v1722_v44 = vpop.f32.mrb[51].mxu1  ;;  %v1731_v20 = vadd.f32 %v5585_v5, %v7293_v39  ;;  %3119 = vmatmul.mubr.bf16.gmra.mrb[76].mxu0 %v6048_v23  ;;  %4249 = vmatmul.mubr.bf16.gmra.mrb[76].mxu1 %v6049_v52 }
 0x17a   :  { %v1221_v11 = vmax.f32 %v1111_v55, 0.0  ;;  %v1830_v9 = vmax.f32 %v1720_v47, 0.0  ;;  %v1114_v25 = vadd.f32 %v1113_v8, %v7277_v7  ;;  %v1723_v15 = vadd.f32 %v1722_v44, %v7277_v7  ;;  %3332 = vmatpush1.bf16.msra.mxu0 %v1932_v51  ;;  %4462 = vmatpush1.bf16.msra.mxu1 %v1932_v51  ;;  %v7405_v18 = vpop.permute.xlu1 %540  ;;  %v536_v39 = vpop.permute.xlu0 %535  ;;  %v6054_v7 = vld [vmem:[%s8365_s4 + $0x80] ss:$16 sps:$4 sm:$0xff]  }
 0x17b   :  { %v1896_v46 = vmax.f32 %v1223_v13, %v1832_v21  ;;  %v1224_v3 = vmax.f32 %v1122_v26, 0.0  ;;  %v1833_v42 = vmax.f32 %v1731_v20, 0.0  ;;  %3333 = vmatprep.subr.bf16.mxu0 %v8369_v0  ;;  %4463 = vmatprep.subr.bf16.mxu1 %v8369_v0 }
 0x17c   :  { %v1894_v16 = vmax.f32 %v1221_v11, %v1830_v9  ;;  %v1222_v60 = vmax.f32 %v1114_v25, 0.0  ;;  %v1831_v14 = vmax.f32 %v1723_v15, 0.0  ;;  %3126 = vmatprep.mubr.bf16.mxu0 %v6050_v6  ;;  %4256 = vmatprep.mubr.bf16.mxu1 %v6052_v48  ;;  %v6061_v6 = vld [vmem:[%s8366_s5 + $0xa0] ss:$16 sps:$4 sm:$0xff]   ;;  %v6062_v25 = vld [vmem:[%s8365_s4 + $0xc4] ss:$16 sps:$4 sm:$0xff]  }
 0x17d   :  { %v1897_v10 = vmax.f32 %v1224_v3, %v1833_v42 }
 0x17e   :  { %v5508_v38 = vpop.f32.mrb[52].mxu0  ;;  %v5588_v45 = vpop.f32.mrb[52].mxu1  ;;  %v1895_v63 = vmax.f32 %v1222_v60, %v1831_v14  ;;  %3334 = vmatpush1.bf16.msra.mxu0 %v1933_v17  ;;  %4464 = vmatpush1.bf16.msra.mxu1 %v1933_v17 }
 0x17f   :  { %v1135_v28 = vadd.f32 %v5508_v38, %v7351_v1  ;;  %v1744_v24 = vadd.f32 %v5588_v45, %v7351_v1  ;;  %v1126_v40 = vpop.f32.mrb[53].mxu0  ;;  %v1735_v34 = vpop.f32.mrb[53].mxu1  ;;  %v1935_v4 = vpack.c.bf16 %v1897_v10, %v1896_v46  ;;  %3335 = vmatprep.subr.bf16.mxu0 %v8369_v0  ;;  %4465 = vmatprep.subr.bf16.mxu1 %v8369_v0 }
 0x180   :  { %v1127_v41 = vadd.f32 %v1126_v40, %v7323_v19  ;;  %v1736_v29 = vadd.f32 %v1735_v34, %v7323_v19  ;;  %v5509_v35 = vpop.f32.mrb[54].mxu0  ;;  %v5589_v53 = vpop.f32.mrb[54].mxu1  ;;  %v1934_v1 = vpack.c.bf16 %v1895_v63, %v1894_v16  ;;  %v6058_v19 = vld [vmem:[%s8366_s5 + $0xa4] ss:$16 sps:$4 sm:$0xff]  }
 0x181   :  { %v1227_v33 = vmax.f32 %v1135_v28, 0.0  ;;  %v1836_v57 = vmax.f32 %v1744_v24, 0.0  ;;  %v1138_v36 = vadd.f32 %v5509_v35, %v7349_v49  ;;  %v1129_v54 = vpop.f32.mrb[55].mxu0  ;;  %v1738_v58 = vpop.f32.mrb[55].mxu1  ;;  %v1747_v31 = vadd.f32 %v5589_v53, %v7349_v49  ;;  %3127 = vmatmul.mubr.bf16.gmra.mrb[80].mxu0 %v6054_v7  ;;  %4257 = vmatmul.mubr.bf16.gmra.mrb[80].mxu1 %v6055_v22  ;;  %v6067_v35 = vld [vmem:[%s8366_s5 + $0xc0] ss:$16 sps:$4 sm:$0xff]  }
 0x182   :  { %v1225_v2 = vmax.f32 %v1127_v41, 0.0  ;;  %v1834_v59 = vmax.f32 %v1736_v29, 0.0  ;;  %v1130_v23 = vadd.f32 %v1129_v54, %v7321_v43  ;;  %v1739_v37 = vadd.f32 %v1738_v58, %v7321_v43  ;;  %3336 = vmatpush1.bf16.msra.mxu0 %v1934_v1  ;;  %4466 = vmatpush1.bf16.msra.mxu1 %v1934_v1  ;;  %v7431_v17 = vpop.permute.xlu1 %550  ;;  %v7433_v49 = vpop.permute.xlu0 %545  ;;  %v6060_v43 = vld [vmem:[%s8365_s4 + $0xa0] ss:$16 sps:$4 sm:$0xff]  }
 0x183   :  { %v1900_v52 = vmax.f32 %v1227_v33, %v1836_v57  ;;  %v1228_v50 = vmax.f32 %v1138_v36, 0.0  ;;  %v1837_v61 = vmax.f32 %v1747_v31, 0.0  ;;  %3337 = vmatprep.subr.bf16.mxu0 %v8369_v0  ;;  %4467 = vmatprep.subr.bf16.mxu1 %v8369_v0 }
 0x184   :  { %v1898_v12 = vmax.f32 %v1225_v2, %v1834_v59  ;;  %v1226_v62 = vmax.f32 %v1130_v23, 0.0  ;;  %v1835_v55 = vmax.f32 %v1739_v37, 0.0  ;;  %3134 = vmatprep.mubr.bf16.mxu0 %v6056_v30  ;;  %4264 = vmatprep.mubr.bf16.mxu1 %v6058_v19  ;;  %v6068_v59 = vld [vmem:[%s8365_s4 + $0xe4] ss:$16 sps:$4 sm:$0xff]  }
 0x185   :  { %v1901_v47 = vmax.f32 %v1228_v50, %v1837_v61  ;;  %v6070_v61 = vld [vmem:[%s8366_s5 + $0xe4] ss:$16 sps:$4 sm:$0xff]  }
 0x186   :  { %v5512_v32 = vpop.f32.mrb[56].mxu0  ;;  %v5592_v5 = vpop.f32.mrb[56].mxu1  ;;  %v1899_v51 = vmax.f32 %v1226_v62, %v1835_v55  ;;  %3338 = vmatpush1.bf16.msra.mxu0 %v1935_v4  ;;  %4468 = vmatpush1.bf16.msra.mxu1 %v1935_v4 }
 0x187   :  { %v1151_v13 = vadd.f32 %v5512_v32, %v536_v39  ;;  %v1760_v21 = vadd.f32 %v5592_v5, %v536_v39  ;;  %v1142_v26 = vpop.f32.mrb[57].mxu0  ;;  %v1751_v8 = vpop.f32.mrb[57].mxu1  ;;  %v1937_v44 = vpack.c.bf16 %v1901_v47, %v1900_v52  ;;  %3339 = vmatprep.subr.bf16.mxu0 %v8369_v0  ;;  %4469 = vmatprep.subr.bf16.mxu1 %v8369_v0 }
 0x188   :  { %v1143_v48 = vadd.f32 %v1142_v26, %v7379_v56  ;;  %v1752_v11 = vadd.f32 %v1751_v8, %v7379_v56  ;;  %v5513_v9 = vpop.f32.mrb[58].mxu0  ;;  %v5593_v20 = vpop.f32.mrb[58].mxu1  ;;  %v1936_v46 = vpack.c.bf16 %v1899_v51, %v1898_v12  ;;  %v6064_v56 = vld [vmem:[%s8366_s5 + $0xc4] ss:$16 sps:$4 sm:$0xff]   ;;  %v6072_v8 = vld [vmem:[%s8365_s4 + $0xe0] ss:$16 sps:$4 sm:$0xff]  }
 0x189   :  { %v1231_v3 = vmax.f32 %v1151_v13, 0.0  ;;  %v1840_v15 = vmax.f32 %v1760_v21, 0.0  ;;  %v1154_v16 = vadd.f32 %v5513_v9, %v7405_v18  ;;  %v1145_v42 = vpop.f32.mrb[59].mxu0  ;;  %v1754_v60 = vpop.f32.mrb[59].mxu1  ;;  %v1763_v10 = vadd.f32 %v5593_v20, %v7405_v18  ;;  %3135 = vmatmul.mubr.bf16.gmra.mrb[84].mxu0 %v6060_v43  ;;  %4265 = vmatmul.mubr.bf16.gmra.mrb[84].mxu1 %v6061_v6  ;;  %v6074_v9 = vld [vmem:[%s8365_s4 + $0x104] ss:$16 sps:$4 sm:$0xff]  }
 0x18a   :  { %v1229_v39 = vmax.f32 %v1143_v48, 0.0  ;;  %v1838_v14 = vmax.f32 %v1752_v11, 0.0  ;;  %v1146_v38 = vadd.f32 %v1145_v42, %v7377_v27  ;;  %v1755_v22 = vadd.f32 %v1754_v60, %v7377_v27  ;;  %3340 = vmatpush1.bf16.msra.mxu0 %v1936_v46  ;;  %4470 = vmatpush1.bf16.msra.mxu1 %v1936_v46  ;;  %v561_v40 = vpop.permute.xlu1 %560  ;;  %v556_v34 = vpop.permute.xlu0 %555  ;;  %v6066_v27 = vld [vmem:[%s8365_s4 + $0xc0] ss:$16 sps:$4 sm:$0xff]   ;;  %v6076_v20 = vld [vmem:[%s8366_s5 + $0x104] ss:$16 sps:$4 sm:$0xff]  }
 0x18b   :  { %v1904_v45 = vmax.f32 %v1231_v3, %v1840_v15  ;;  %v1232_v7 = vmax.f32 %v1154_v16, 0.0  ;;  %v1841_v28 = vmax.f32 %v1763_v10, 0.0  ;;  %3341 = vmatprep.subr.bf16.mxu0 %v8369_v0  ;;  %4471 = vmatprep.subr.bf16.mxu1 %v8369_v0  ;;  %v6079_v46 = vld [vmem:[%s8366_s5 + $0x100] ss:$16 sps:$4 sm:$0xff]   ;;  %v6080_v3 = vld [vmem:[%s8365_s4 + $0x124] ss:$16 sps:$4 sm:$0xff]  }
 0x18c   :  { %v1902_v63 = vmax.f32 %v1229_v39, %v1838_v14  ;;  %v1230_v24 = vmax.f32 %v1146_v38, 0.0  ;;  %v1839_v18 = vmax.f32 %v1755_v22, 0.0  ;;  %3142 = vmatprep.mubr.bf16.mxu0 %v6062_v25  ;;  %4272 = vmatprep.mubr.bf16.mxu1 %v6064_v56  ;;  %v6078_v25 = vld [vmem:[%s8365_s4 + $0x100] ss:$16 sps:$4 sm:$0xff]   ;;  %v6082_v15 = vld [vmem:[%s8366_s5 + $0x124] ss:$16 sps:$4 sm:$0xff]  }
 0x18d   :  { %v1905_v4 = vmax.f32 %v1232_v7, %v1841_v28  ;;  %v6084_v16 = vld [vmem:[%s8365_s4 + $0x120] ss:$16 sps:$4 sm:$0xff]   ;;  %v6086_v60 = vld [vmem:[%s8365_s4 + $0x144] ss:$16 sps:$4 sm:$0xff]  }
 0x18e   :  { %v5516_v41 = vpop.f32.mrb[60].mxu0  ;;  %v5596_v29 = vpop.f32.mrb[60].mxu1  ;;  %v1903_v53 = vmax.f32 %v1230_v24, %v1839_v18  ;;  %3342 = vmatpush1.bf16.msra.mxu0 %v1937_v44  ;;  %4472 = vmatpush1.bf16.msra.mxu1 %v1937_v44  ;;  %v6085_v42 = vld [vmem:[%s8366_s5 + $0x120] ss:$16 sps:$4 sm:$0xff]   ;;  %v6088_v56 = vld [vmem:[%s8366_s5 + $0x144] ss:$16 sps:$4 sm:$0xff]  }
 0x18f   :  { %v1167_v30 = vadd.f32 %v5516_v41, %v556_v34  ;;  %v1776_v1 = vadd.f32 %v5596_v29, %v556_v34  ;;  %v1158_v33 = vpop.f32.mrb[61].mxu0  ;;  %v1767_v57 = vpop.f32.mrb[61].mxu1  ;;  %v1939_v36 = vpack.c.bf16 %v1905_v4, %v1904_v45  ;;  %3343 = vmatprep.subr.bf16.mxu0 %v8369_v0  ;;  %4473 = vmatprep.subr.bf16.mxu1 %v8369_v0  ;;  %v6090_v39 = vld [vmem:[%s8365_s4 + $0x140] ss:$16 sps:$4 sm:$0xff]   ;;  %v6092_v10 = vld [vmem:[%s8365_s4 + $0x164] ss:$16 sps:$4 sm:$0xff]  }
 0x190   :  { %v1159_v54 = vadd.f32 %v1158_v33, %v7433_v49  ;;  %v1768_v58 = vadd.f32 %v1767_v57, %v7433_v49  ;;  %v5517_v19 = vpop.f32.mrb[62].mxu0  ;;  %v5597_v2 = vpop.f32.mrb[62].mxu1  ;;  %v1938_v31 = vpack.c.bf16 %v1903_v53, %v1902_v63  ;;  %v6091_v14 = vld [vmem:[%s8366_s5 + $0x140] ss:$16 sps:$4 sm:$0xff]   ;;  %v6094_v38 = vld [vmem:[%s8366_s5 + $0x164] ss:$16 sps:$4 sm:$0xff]  }
 0x191   :  { %v1235_v23 = vmax.f32 %v1167_v30, 0.0  ;;  %v1844_v52 = vmax.f32 %v1776_v1, 0.0  ;;  %v1170_v50 = vadd.f32 %v5517_v19, %v561_v40  ;;  %v1161_v37 = vpop.f32.mrb[63].mxu0  ;;  %v1770_v12 = vpop.f32.mrb[63].mxu1  ;;  %v1779_v55 = vadd.f32 %v5597_v2, %v561_v40  ;;  %3143 = vmatmul.mubr.bf16.gmra.mrb[88].mxu0 %v6066_v27  ;;  %4273 = vmatmul.mubr.bf16.gmra.mrb[88].mxu1 %v6067_v35  ;;  %v6096_v45 = vld [vmem:[%s8365_s4 + $0x160] ss:$16 sps:$4 sm:$0xff]  }
 0x192   :  { %v1233_v62 = vmax.f32 %v1159_v54, 0.0  ;;  %v1842_v49 = vmax.f32 %v1768_v58, 0.0  ;;  %v1162_v47 = vadd.f32 %v1161_v37, %v7431_v17  ;;  %v1771_v43 = vadd.f32 %v1770_v12, %v7431_v17  ;;  %3344 = vmatpush1.bf16.msra.mxu0 %v1938_v31  ;;  %4474 = vmatpush1.bf16.msra.mxu1 %v1938_v31  ;;  %v6073_v17 = vld [vmem:[%s8366_s5 + $0xe0] ss:$16 sps:$4 sm:$0xff]   ;;  %v6098_v22 = vld [vmem:[%s8365_s4 + $0x184] ss:$16 sps:$4 sm:$0xff]  }
 0x193   :  { %v1908_v32 = vmax.f32 %v1235_v23, %v1844_v52  ;;  %v1236_v5 = vmax.f32 %v1170_v50, 0.0  ;;  %v1845_v51 = vmax.f32 %v1779_v55, 0.0  ;;  %3345 = vmatprep.subr.bf16.mxu0 %v8369_v0  ;;  %4475 = vmatprep.subr.bf16.mxu1 %v8369_v0  ;;  %v6097_v7 = vld [vmem:[%s8366_s5 + $0x160] ss:$16 sps:$4 sm:$0xff]   ;;  %v6100_v63 = vld [vmem:[%s8366_s5 + $0x184] ss:$16 sps:$4 sm:$0xff]  }
 0x194   :  { %v1906_v6 = vmax.f32 %v1233_v62, %v1842_v49  ;;  %v1234_v13 = vmax.f32 %v1162_v47, 0.0  ;;  %v1843_v21 = vmax.f32 %v1771_v43, 0.0  ;;  %3150 = vmatprep.mubr.bf16.mxu0 %v6068_v59  ;;  %4280 = vmatprep.mubr.bf16.mxu1 %v6070_v61  ;;  %v6102_v28 = vld [vmem:[%s8365_s4 + $0x180] ss:$16 sps:$4 sm:$0xff]   ;;  %v6104_v40 = vld [vmem:[%s8365_s4 + $0x1a4] ss:$16 sps:$4 sm:$0xff]  }
 0x195   :  { %v1909_v26 = vmax.f32 %v1236_v5, %v1845_v51  ;;  %v6103_v24 = vld [vmem:[%s8366_s5 + $0x180] ss:$16 sps:$4 sm:$0xff]   ;;  %v6106_v34 = vld [vmem:[%s8366_s5 + $0x1a4] ss:$16 sps:$4 sm:$0xff]  }
 0x196   :  { %v1907_v44 = vmax.f32 %v1234_v13, %v1843_v21  ;;  %3346 = vmatpush1.bf16.msra.mxu0 %v1939_v36  ;;  %4476 = vmatpush1.bf16.msra.mxu1 %v1939_v36  ;;  %v6108_v18 = vld [vmem:[%s8365_s4 + $0x1a0] ss:$16 sps:$4 sm:$0xff]   ;;  %v6110_v41 = vld [vmem:[%s8365_s4 + $0x1c4] ss:$16 sps:$4 sm:$0xff]  }
 0x197   :  { %v1941_v48 = vpack.c.bf16 %v1909_v26, %v1908_v32  ;;  %3347 = vmatprep.subr.bf16.mxu0 %v8369_v0  ;;  %4477 = vmatprep.subr.bf16.mxu1 %v8369_v0  ;;  %v6109_v4 = vld [vmem:[%s8366_s5 + $0x1a0] ss:$16 sps:$4 sm:$0xff]   ;;  %v6112_v29 = vld [vmem:[%s8366_s5 + $0x1c4] ss:$16 sps:$4 sm:$0xff]  }
 0x198   :  { %v1940_v11 = vpack.c.bf16 %v1907_v44, %v1906_v6  ;;  %v6114_v27 = vld [vmem:[%s8365_s4 + $0x1c0] ss:$16 sps:$4 sm:$0xff]   ;;  %v6116_v53 = vld [vmem:[%s8365_s4 + $0x1e4] ss:$16 sps:$4 sm:$0xff]  }
 0x199   :  { %3151 = vmatmul.mubr.bf16.gmra.mrb[92].mxu0 %v6072_v8  ;;  %4281 = vmatmul.mubr.bf16.gmra.mrb[92].mxu1 %v6073_v17  ;;  %v6115_v35 = vld [vmem:[%s8366_s5 + $0x1c0] ss:$16 sps:$4 sm:$0xff]   ;;  %v6118_v30 = vld [vmem:[%s8366_s5 + $0x1e4] ss:$16 sps:$4 sm:$0xff]  }
 0x19a   :  { %3348 = vmatpush1.bf16.msra.mxu0 %v1940_v11  ;;  %4478 = vmatpush1.bf16.msra.mxu1 %v1940_v11  ;;  %v6120_v1 = vld [vmem:[%s8365_s4 + $0x1e0] ss:$16 sps:$4 sm:$0xff]   ;;  %v6122_v57 = vld [vmem:[%s8365_s4 + $0x204] ss:$16 sps:$4 sm:$0xff]  }
 0x19b   :  { %3349 = vmatprep.subr.bf16.mxu0 %v8369_v0  ;;  %4479 = vmatprep.subr.bf16.mxu1 %v8369_v0  ;;  %v6121_v33 = vld [vmem:[%s8366_s5 + $0x1e0] ss:$16 sps:$4 sm:$0xff]   ;;  %v6124_v36 = vld [vmem:[%s8366_s5 + $0x204] ss:$16 sps:$4 sm:$0xff]  }
 0x19c   :  { %3158 = vmatprep.mubr.bf16.mxu0 %v6074_v9  ;;  %4288 = vmatprep.mubr.bf16.mxu1 %v6076_v20  ;;  %v6126_v54 = vld [vmem:[%s8365_s4 + $0x200] ss:$16 sps:$4 sm:$0xff]   ;;  %v6128_v19 = vld [vmem:[%s8365_s4 + $0x224] ss:$16 sps:$4 sm:$0xff]  }
 0x19d   :  { %v6127_v58 = vld [vmem:[%s8366_s5 + $0x200] ss:$16 sps:$4 sm:$0xff]   ;;  %v6130_v2 = vld [vmem:[%s8366_s5 + $0x224] ss:$16 sps:$4 sm:$0xff]  }
 0x19e   :  { %3350 = vmatpush1.bf16.msra.mxu0 %v1941_v48  ;;  %4480 = vmatpush1.bf16.msra.mxu1 %v1941_v48  ;;  %v6132_v59 = vld [vmem:[%s8365_s4 + $0x220] ss:$16 sps:$4 sm:$0xff]   ;;  %v6134_v23 = vld [vmem:[%s8365_s4 + $0x244] ss:$16 sps:$4 sm:$0xff]  }
 0x19f   :  { %4929 = vmatprep.subr.bf16.mxu1 %v8369_v0  ;;  %v6133_v31 = vld [vmem:[%s8366_s5 + $0x220] ss:$16 sps:$4 sm:$0xff]   ;;  %v6136_v52 = vld [vmem:[%s8366_s5 + $0x244] ss:$16 sps:$4 sm:$0xff]  }
 0x1a0   :  { %v6138_v50 = vld [vmem:[%s8365_s4 + $0x240] ss:$16 sps:$4 sm:$0xff]   ;;  %v6140_v12 = vld [vmem:[%s8365_s4 + $0x264] ss:$16 sps:$4 sm:$0xff]  }
 0x1a1   :  { %3159 = vmatmul.mubr.bf16.gmra.mrb[96].mxu0 %v6078_v25  ;;  %4289 = vmatmul.mubr.bf16.gmra.mrb[96].mxu1 %v6079_v46  ;;  %v6139_v37 = vld [vmem:[%s8366_s5 + $0x240] ss:$16 sps:$4 sm:$0xff]   ;;  %v6142_v61 = vld [vmem:[%s8366_s5 + $0x264] ss:$16 sps:$4 sm:$0xff]  }
 0x1a2   :  { %3166 = vmatprep.mubr.bf16.mxu0 %v6080_v3  ;;  %4296 = vmatprep.mubr.bf16.mxu1 %v6082_v15  ;;  %v6144_v62 = vld [vmem:[%s8365_s4 + $0x260] ss:$16 sps:$4 sm:$0xff]   ;;  %v6146_v55 = vld [vmem:[%s8365_s4 + $0x284] ss:$16 sps:$4 sm:$0xff]  }
 0x1a3   :  { %v6145_v49 = vld [vmem:[%s8366_s5 + $0x260] ss:$16 sps:$4 sm:$0xff]   ;;  %v6148_v47 = vld [vmem:[%s8366_s5 + $0x284] ss:$16 sps:$4 sm:$0xff]  }
 0x1a4   :  { %v6150_v32 = vld [vmem:[%s8365_s4 + $0x280] ss:$16 sps:$4 sm:$0xff]   ;;  %v6152_v43 = vld [vmem:[%s8365_s4 + $0x2a4] ss:$16 sps:$4 sm:$0xff]  }
 0x1a5   :  { %v6151_v5 = vld [vmem:[%s8366_s5 + $0x280] ss:$16 sps:$4 sm:$0xff]   ;;  %v6154_v6 = vld [vmem:[%s8366_s5 + $0x2a4] ss:$16 sps:$4 sm:$0xff]  }
 0x1a6   :  { %v6156_v51 = vld [vmem:[%s8365_s4 + $0x2a0] ss:$16 sps:$4 sm:$0xff]   ;;  %v6158_v21 = vld [vmem:[%s8365_s4 + $0x2c4] ss:$16 sps:$4 sm:$0xff]  }
 0x1a7   :  { %v6157_v13 = vld [vmem:[%s8366_s5 + $0x2a0] ss:$16 sps:$4 sm:$0xff]   ;;  %v6160_v26 = vld [vmem:[%s8366_s5 + $0x2c4] ss:$16 sps:$4 sm:$0xff]  }
 0x1a8   :  { %v6162_v8 = vld [vmem:[%s8365_s4 + $0x2c0] ss:$16 sps:$4 sm:$0xff]   ;;  %v6164_v44 = vld [vmem:[%s8365_s4 + $0x2e4] ss:$16 sps:$4 sm:$0xff]  }
 0x1a9   :  { %3167 = vmatmul.mubr.bf16.gmra.mrb[100].mxu0 %v6084_v16  ;;  %4297 = vmatmul.mubr.bf16.gmra.mrb[100].mxu1 %v6085_v42  ;;  %v6163_v17 = vld [vmem:[%s8366_s5 + $0x2c0] ss:$16 sps:$4 sm:$0xff]   ;;  %v6166_v48 = vld [vmem:[%s8366_s5 + $0x2e4] ss:$16 sps:$4 sm:$0xff]  }
 0x1aa   :  { %3174 = vmatprep.mubr.bf16.mxu0 %v6086_v60  ;;  %4304 = vmatprep.mubr.bf16.mxu1 %v6088_v56  ;;  %v6168_v11 = vld [vmem:[%s8365_s4 + $0x2e0] ss:$16 sps:$4 sm:$0xff]   ;;  %v6170_v20 = vld [vmem:[%s8365_s4 + $0x304] ss:$16 sps:$4 sm:$0xff]  }
 0x1ab   :  { %v6169_v9 = vld [vmem:[%s8366_s5 + $0x2e0] ss:$16 sps:$4 sm:$0xff]   ;;  %v6172_v25 = vld [vmem:[%s8366_s5 + $0x304] ss:$16 sps:$4 sm:$0xff]  }
 0x1ac   :  { %v6174_v46 = vld [vmem:[%s8365_s4 + $0x300] ss:$16 sps:$4 sm:$0xff]   ;;  %v6176_v15 = vld [vmem:[%s8365_s4 + $0x324] ss:$16 sps:$4 sm:$0xff]  }
 0x1ad   :  { %v6175_v3 = vld [vmem:[%s8366_s5 + $0x300] ss:$16 sps:$4 sm:$0xff]   ;;  %v6178_v16 = vld [vmem:[%s8366_s5 + $0x324] ss:$16 sps:$4 sm:$0xff]  }
 0x1ae   :  { %v6180_v42 = vld [vmem:[%s8365_s4 + $0x320] ss:$16 sps:$4 sm:$0xff]   ;;  %v6182_v56 = vld [vmem:[%s8365_s4 + $0x344] ss:$16 sps:$4 sm:$0xff]  }
 0x1af   :  { %v6181_v60 = vld [vmem:[%s8366_s5 + $0x320] ss:$16 sps:$4 sm:$0xff]  }
 0x1b1   :  { %3175 = vmatmul.mubr.bf16.gmra.mrb[104].mxu0 %v6090_v39  ;;  %4305 = vmatmul.mubr.bf16.gmra.mrb[104].mxu1 %v6091_v14  ;;  %v6184_v39 = vld [vmem:[%s8366_s5 + $0x344] ss:$16 sps:$4 sm:$0xff]   ;;  %v6186_v14 = vld [vmem:[%s8365_s4 + $0x340] ss:$16 sps:$4 sm:$0xff]  }
 0x1b2   :  { %3182 = vmatprep.mubr.bf16.mxu0 %v6092_v10  ;;  %4312 = vmatprep.mubr.bf16.mxu1 %v6094_v38  ;;  %v6187_v10 = vld [vmem:[%s8366_s5 + $0x340] ss:$16 sps:$4 sm:$0xff]   ;;  %v6188_v38 = vld [vmem:[%s8365_s4 + $0x364] ss:$16 sps:$4 sm:$0xff]  }
 0x1b9   :  { %3183 = vmatmul.mubr.bf16.gmra.mrb[108].mxu0 %v6096_v45  ;;  %4313 = vmatmul.mubr.bf16.gmra.mrb[108].mxu1 %v6097_v7  ;;  %v6190_v45 = vld [vmem:[%s8366_s5 + $0x364] ss:$16 sps:$4 sm:$0xff]   ;;  %v6192_v7 = vld [vmem:[%s8365_s4 + $0x360] ss:$16 sps:$4 sm:$0xff]  }
 0x1ba   :  { %3190 = vmatprep.mubr.bf16.mxu0 %v6098_v22  ;;  %4320 = vmatprep.mubr.bf16.mxu1 %v6100_v63  ;;  %v6193_v22 = vld [vmem:[%s8366_s5 + $0x360] ss:$16 sps:$4 sm:$0xff]   ;;  %v6196_v63 = vld [vmem:[%s8365_s4 + $0xc] ss:$16 sps:$4 sm:$0xff]  }
 0x1c1   :  { %3191 = vmatmul.mubr.bf16.gmra.mrb[112].mxu0 %v6102_v28  ;;  %4321 = vmatmul.mubr.bf16.gmra.mrb[112].mxu1 %v6103_v24  ;;  %v6199_v28 = vld [vmem:[%s8366_s5 + $0xc] ss:$16 sps:$4 sm:$0xff]   ;;  %v6194_v24 = vld [vmem:[%s8365_s4 + $0x8] ss:$16 sps:$4 sm:$0xff]  }
 0x1c2   :  { %3198 = vmatprep.mubr.bf16.mxu0 %v6104_v40  ;;  %4328 = vmatprep.mubr.bf16.mxu1 %v6106_v34  ;;  %v6197_v40 = vld [vmem:[%s8366_s5 + $0x8] ss:$16 sps:$4 sm:$0xff]   ;;  %v6200_v34 = vld [vmem:[%s8365_s4 + $0x2c] ss:$16 sps:$4 sm:$0xff]  }
 0x1c9   :  { %3199 = vmatmul.mubr.bf16.gmra.mrb[116].mxu0 %v6108_v18  ;;  %4329 = vmatmul.mubr.bf16.gmra.mrb[116].mxu1 %v6109_v4  ;;  %v6202_v18 = vld [vmem:[%s8366_s5 + $0x2c] ss:$16 sps:$4 sm:$0xff]   ;;  %v6204_v4 = vld [vmem:[%s8365_s4 + $0x28] ss:$16 sps:$4 sm:$0xff]  }
 0x1ca   :  { %3206 = vmatprep.mubr.bf16.mxu0 %v6110_v41  ;;  %4336 = vmatprep.mubr.bf16.mxu1 %v6112_v29  ;;  %v6205_v41 = vld [vmem:[%s8366_s5 + $0x28] ss:$16 sps:$4 sm:$0xff]   ;;  %v6206_v29 = vld [vmem:[%s8365_s4 + $0x4c] ss:$16 sps:$4 sm:$0xff]  }
 0x1d1   :  { %3207 = vmatmul.mubr.bf16.gmra.mrb[120].mxu0 %v6114_v27  ;;  %4337 = vmatmul.mubr.bf16.gmra.mrb[120].mxu1 %v6115_v35  ;;  %v6208_v27 = vld [vmem:[%s8366_s5 + $0x4c] ss:$16 sps:$4 sm:$0xff]   ;;  %v6210_v35 = vld [vmem:[%s8365_s4 + $0x48] ss:$16 sps:$4 sm:$0xff]  }
 0x1d2   :  { %3214 = vmatprep.mubr.bf16.mxu0 %v6116_v53  ;;  %4344 = vmatprep.mubr.bf16.mxu1 %v6118_v30  ;;  %v6211_v53 = vld [vmem:[%s8366_s5 + $0x48] ss:$16 sps:$4 sm:$0xff]   ;;  %v6212_v30 = vld [vmem:[%s8365_s4 + $0x6c] ss:$16 sps:$4 sm:$0xff]  }
 0x1d9   :  { %3215 = vmatmul.mubr.bf16.gmra.mrb[124].mxu0 %v6120_v1  ;;  %4345 = vmatmul.mubr.bf16.gmra.mrb[124].mxu1 %v6121_v33  ;;  %v6214_v1 = vld [vmem:[%s8366_s5 + $0x6c] ss:$16 sps:$4 sm:$0xff]   ;;  %v6216_v33 = vld [vmem:[%s8365_s4 + $0x68] ss:$16 sps:$4 sm:$0xff]  }
 0x1da   :  { %3222 = vmatprep.mubr.bf16.mxu0 %v6122_v57  ;;  %4352 = vmatprep.mubr.bf16.mxu1 %v6124_v36  ;;  %v6217_v57 = vld [vmem:[%s8366_s5 + $0x68] ss:$16 sps:$4 sm:$0xff]   ;;  %v6218_v36 = vld [vmem:[%s8365_s4 + $0x8c] ss:$16 sps:$4 sm:$0xff]  }
 0x1e1   :  { %3223 = vmatmul.mubr.bf16.gmra.mrb[128].mxu0 %v6126_v54  ;;  %4353 = vmatmul.mubr.bf16.gmra.mrb[128].mxu1 %v6127_v58  ;;  %v6220_v54 = vld [vmem:[%s8366_s5 + $0x8c] ss:$16 sps:$4 sm:$0xff]   ;;  %v6222_v58 = vld [vmem:[%s8365_s4 + $0x88] ss:$16 sps:$4 sm:$0xff]  }
 0x1e2   :  { %3230 = vmatprep.mubr.bf16.mxu0 %v6128_v19  ;;  %4360 = vmatprep.mubr.bf16.mxu1 %v6130_v2  ;;  %v6223_v19 = vld [vmem:[%s8366_s5 + $0x88] ss:$16 sps:$4 sm:$0xff]   ;;  %v6224_v2 = vld [vmem:[%s8365_s4 + $0xac] ss:$16 sps:$4 sm:$0xff]  }
 0x1e9   :  { %3231 = vmatmul.mubr.bf16.gmra.mrb[132].mxu0 %v6132_v59  ;;  %4361 = vmatmul.mubr.bf16.gmra.mrb[132].mxu1 %v6133_v31  ;;  %v6226_v59 = vld [vmem:[%s8366_s5 + $0xac] ss:$16 sps:$4 sm:$0xff]   ;;  %v6228_v31 = vld [vmem:[%s8365_s4 + $0xa8] ss:$16 sps:$4 sm:$0xff]  }
 0x1ea   :  { %3238 = vmatprep.mubr.bf16.mxu0 %v6134_v23  ;;  %4368 = vmatprep.mubr.bf16.mxu1 %v6136_v52  ;;  %v6229_v23 = vld [vmem:[%s8366_s5 + $0xa8] ss:$16 sps:$4 sm:$0xff]   ;;  %v6230_v52 = vld [vmem:[%s8365_s4 + $0xcc] ss:$16 sps:$4 sm:$0xff]  }
 0x1f1   :  { %3239 = vmatmul.mubr.bf16.gmra.mrb[136].mxu0 %v6138_v50  ;;  %4369 = vmatmul.mubr.bf16.gmra.mrb[136].mxu1 %v6139_v37  ;;  %v6232_v50 = vld [vmem:[%s8366_s5 + $0xcc] ss:$16 sps:$4 sm:$0xff]   ;;  %v6234_v37 = vld [vmem:[%s8365_s4 + $0xc8] ss:$16 sps:$4 sm:$0xff]  }
 0x1f2   :  { %3246 = vmatprep.mubr.bf16.mxu0 %v6140_v12  ;;  %4376 = vmatprep.mubr.bf16.mxu1 %v6142_v61  ;;  %v6235_v12 = vld [vmem:[%s8366_s5 + $0xc8] ss:$16 sps:$4 sm:$0xff]   ;;  %v6236_v61 = vld [vmem:[%s8365_s4 + $0xec] ss:$16 sps:$4 sm:$0xff]  }
 0x1f9   :  { %3247 = vmatmul.mubr.bf16.gmra.mrb[140].mxu0 %v6144_v62  ;;  %4377 = vmatmul.mubr.bf16.gmra.mrb[140].mxu1 %v6145_v49  ;;  %v6238_v62 = vld [vmem:[%s8366_s5 + $0xec] ss:$16 sps:$4 sm:$0xff]   ;;  %v6240_v49 = vld [vmem:[%s8365_s4 + $0xe8] ss:$16 sps:$4 sm:$0xff]  }
 0x1fa   :  { %3254 = vmatprep.mubr.bf16.mxu0 %v6146_v55  ;;  %4384 = vmatprep.mubr.bf16.mxu1 %v6148_v47  ;;  %v6241_v55 = vld [vmem:[%s8366_s5 + $0xe8] ss:$16 sps:$4 sm:$0xff]   ;;  %v6242_v47 = vld [vmem:[%s8365_s4 + $0x10c] ss:$16 sps:$4 sm:$0xff]  }
 0x201   :  { %3255 = vmatmul.mubr.bf16.gmra.mrb[144].mxu0 %v6150_v32  ;;  %4385 = vmatmul.mubr.bf16.gmra.mrb[144].mxu1 %v6151_v5  ;;  %v6244_v32 = vld [vmem:[%s8366_s5 + $0x10c] ss:$16 sps:$4 sm:$0xff]   ;;  %v6246_v5 = vld [vmem:[%s8365_s4 + $0x108] ss:$16 sps:$4 sm:$0xff]  }
 0x202   :  { %3262 = vmatprep.mubr.bf16.mxu0 %v6152_v43  ;;  %4392 = vmatprep.mubr.bf16.mxu1 %v6154_v6  ;;  %v6247_v43 = vld [vmem:[%s8366_s5 + $0x108] ss:$16 sps:$4 sm:$0xff]   ;;  %v6248_v6 = vld [vmem:[%s8365_s4 + $0x12c] ss:$16 sps:$4 sm:$0xff]  }
 0x209   :  { %3263 = vmatmul.mubr.bf16.gmra.mrb[148].mxu0 %v6156_v51  ;;  %4393 = vmatmul.mubr.bf16.gmra.mrb[148].mxu1 %v6157_v13  ;;  %v6250_v51 = vld [vmem:[%s8366_s5 + $0x12c] ss:$16 sps:$4 sm:$0xff]   ;;  %v6252_v13 = vld [vmem:[%s8365_s4 + $0x128] ss:$16 sps:$4 sm:$0xff]  }
 0x20a   :  { %3270 = vmatprep.mubr.bf16.mxu0 %v6158_v21  ;;  %4400 = vmatprep.mubr.bf16.mxu1 %v6160_v26  ;;  %v6253_v21 = vld [vmem:[%s8366_s5 + $0x128] ss:$16 sps:$4 sm:$0xff]   ;;  %v6254_v26 = vld [vmem:[%s8365_s4 + $0x14c] ss:$16 sps:$4 sm:$0xff]  }
 0x211   :  { %3271 = vmatmul.mubr.bf16.gmra.mrb[152].mxu0 %v6162_v8  ;;  %4401 = vmatmul.mubr.bf16.gmra.mrb[152].mxu1 %v6163_v17  ;;  %v6256_v8 = vld [vmem:[%s8366_s5 + $0x14c] ss:$16 sps:$4 sm:$0xff]   ;;  %v6258_v17 = vld [vmem:[%s8365_s4 + $0x148] ss:$16 sps:$4 sm:$0xff]  }
 0x212   :  { %3278 = vmatprep.mubr.bf16.mxu0 %v6164_v44  ;;  %4408 = vmatprep.mubr.bf16.mxu1 %v6166_v48  ;;  %v6259_v44 = vld [vmem:[%s8366_s5 + $0x148] ss:$16 sps:$4 sm:$0xff]   ;;  %v6260_v48 = vld [vmem:[%s8365_s4 + $0x16c] ss:$16 sps:$4 sm:$0xff]  }
 0x219   :  { %3279 = vmatmul.mubr.bf16.gmra.mrb[156].mxu0 %v6168_v11  ;;  %4409 = vmatmul.mubr.bf16.gmra.mrb[156].mxu1 %v6169_v9  ;;  %v6262_v11 = vld [vmem:[%s8366_s5 + $0x16c] ss:$16 sps:$4 sm:$0xff]   ;;  %v6264_v9 = vld [vmem:[%s8365_s4 + $0x168] ss:$16 sps:$4 sm:$0xff]  }
 0x21a   :  { %3286 = vmatprep.mubr.bf16.mxu0 %v6170_v20  ;;  %4416 = vmatprep.mubr.bf16.mxu1 %v6172_v25  ;;  %v6265_v20 = vld [vmem:[%s8366_s5 + $0x168] ss:$16 sps:$4 sm:$0xff]   ;;  %v6266_v25 = vld [vmem:[%s8365_s4 + $0x18c] ss:$16 sps:$4 sm:$0xff]  }
 0x221   :  { %3287 = vmatmul.mubr.bf16.gmra.mrb[160].mxu0 %v6174_v46  ;;  %4417 = vmatmul.mubr.bf16.gmra.mrb[160].mxu1 %v6175_v3  ;;  %v6268_v46 = vld [vmem:[%s8366_s5 + $0x18c] ss:$16 sps:$4 sm:$0xff]   ;;  %v6270_v3 = vld [vmem:[%s8365_s4 + $0x188] ss:$16 sps:$4 sm:$0xff]  }
 0x222   :  { %3294 = vmatprep.mubr.bf16.mxu0 %v6176_v15  ;;  %4424 = vmatprep.mubr.bf16.mxu1 %v6178_v16  ;;  %v6271_v15 = vld [vmem:[%s8366_s5 + $0x188] ss:$16 sps:$4 sm:$0xff]   ;;  %v6272_v16 = vld [vmem:[%s8365_s4 + $0x1ac] ss:$16 sps:$4 sm:$0xff]  }
 0x229   :  { %3295 = vmatmul.mubr.bf16.gmra.mrb[164].mxu0 %v6180_v42  ;;  %4425 = vmatmul.mubr.bf16.gmra.mrb[164].mxu1 %v6181_v60  ;;  %v6274_v42 = vld [vmem:[%s8366_s5 + $0x1ac] ss:$16 sps:$4 sm:$0xff]   ;;  %v6276_v60 = vld [vmem:[%s8365_s4 + $0x1a8] ss:$16 sps:$4 sm:$0xff]  }
 0x22a   :  { %3302 = vmatprep.mubr.bf16.mxu0 %v6182_v56  ;;  %4432 = vmatprep.mubr.bf16.mxu1 %v6184_v39  ;;  %v6277_v56 = vld [vmem:[%s8366_s5 + $0x1a8] ss:$16 sps:$4 sm:$0xff]   ;;  %v6278_v39 = vld [vmem:[%s8365_s4 + $0x1cc] ss:$16 sps:$4 sm:$0xff]  }
 0x231   :  { %3303 = vmatmul.mubr.bf16.gmra.mrb[168].mxu0 %v6186_v14  ;;  %4433 = vmatmul.mubr.bf16.gmra.mrb[168].mxu1 %v6187_v10  ;;  %v6280_v14 = vld [vmem:[%s8366_s5 + $0x1cc] ss:$16 sps:$4 sm:$0xff]   ;;  %v7902_v10 = vpop.permute.xlu1 %2389 }
 0x232   :  { %3310 = vmatprep.mubr.bf16.mxu0 %v6188_v38  ;;  %4440 = vmatprep.mubr.bf16.mxu1 %v6190_v45  ;;  %v7904_v38 = vpop.permute.xlu0 %2384 }
 0x235   :  { %v7906_v45 = vpop.permute.xlu1 %2399 }
 0x239   :  { %3311 = vmatmul.mubr.bf16.gmra.mrb[172].mxu0 %v6192_v7  ;;  %4441 = vmatmul.mubr.bf16.gmra.mrb[172].mxu1 %v6193_v22  ;;  %v7908_v7 = vpop.permute.xlu0 %2394  ;;  %v6282_v22 = vld [vmem:[%s8365_s4 + $0x1c8] ss:$16 sps:$4 sm:$0xff]  }
 0x23a   :  { %3351 = vmatprep.mubr.bf16.mxu0 %v6196_v63  ;;  %4481 = vmatprep.mubr.bf16.mxu1 %v6199_v28  ;;  %v6283_v63 = vld [vmem:[%s8366_s5 + $0x1c8] ss:$16 sps:$4 sm:$0xff]   ;;  %v6284_v28 = vld [vmem:[%s8365_s4 + $0x1ec] ss:$16 sps:$4 sm:$0xff]  }
 0x241   :  { %3352 = vmatmul.mubr.bf16.vlgmr.msra.gmra.mrb[64].mxu0 %v6194_v24  ;;  %4482 = vmatmul.mubr.bf16.vlgmr.msra.gmra.mrb[64].mxu1 %v6197_v40  ;;  %v6286_v24 = vld [vmem:[%s8366_s5 + $0x1ec] ss:$16 sps:$4 sm:$0xff]   ;;  %v7922_v40 = vpop.permute.xlu1 %2409 }
 0x242   :  { %3359 = vmatprep.mubr.bf16.mxu0 %v6200_v34  ;;  %4489 = vmatprep.mubr.bf16.mxu1 %v6202_v18  ;;  %v7924_v34 = vpop.permute.xlu0 %2404  ;;  %v6288_v18 = vld [vmem:[%s8365_s4 + $0x1e8] ss:$16 sps:$4 sm:$0xff]  }
 0x249   :  { %3360 = vmatmul.mubr.bf16.gmra.mrb[68].mxu0 %v6204_v4  ;;  %4490 = vmatmul.mubr.bf16.gmra.mrb[68].mxu1 %v6205_v41  ;;  %v6289_v4 = vld [vmem:[%s8366_s5 + $0x1e8] ss:$16 sps:$4 sm:$0xff]   ;;  %v6290_v41 = vld [vmem:[%s8365_s4 + $0x20c] ss:$16 sps:$4 sm:$0xff]  }
 0x24a   :  { %3367 = vmatprep.mubr.bf16.mxu0 %v6206_v29  ;;  %4497 = vmatprep.mubr.bf16.mxu1 %v6208_v27  ;;  %v6292_v29 = vld [vmem:[%s8366_s5 + $0x20c] ss:$16 sps:$4 sm:$0xff]   ;;  %v7938_v27 = vpop.permute.xlu1 %2309 }
 0x251   :  { %3368 = vmatmul.mubr.bf16.gmra.mrb[72].mxu0 %v6210_v35  ;;  %4498 = vmatmul.mubr.bf16.gmra.mrb[72].mxu1 %v6211_v53  ;;  %v7940_v35 = vpop.permute.xlu0 %2304  ;;  %v6294_v53 = vld [vmem:[%s8365_s4 + $0x208] ss:$16 sps:$4 sm:$0xff]  }
 0x252   :  { %3375 = vmatprep.mubr.bf16.mxu0 %v6212_v30  ;;  %4505 = vmatprep.mubr.bf16.mxu1 %v6214_v1  ;;  %v6295_v30 = vld [vmem:[%s8366_s5 + $0x208] ss:$16 sps:$4 sm:$0xff]   ;;  %v6296_v1 = vld [vmem:[%s8365_s4 + $0x22c] ss:$16 sps:$4 sm:$0xff]  }
 0x259   :  { %3376 = vmatmul.mubr.bf16.gmra.mrb[76].mxu0 %v6216_v33  ;;  %4506 = vmatmul.mubr.bf16.gmra.mrb[76].mxu1 %v6217_v57  ;;  %v6298_v33 = vld [vmem:[%s8366_s5 + $0x22c] ss:$16 sps:$4 sm:$0xff]   ;;  %v7954_v57 = vpop.permute.xlu1 %2229 }
 0x25a   :  { %3383 = vmatprep.mubr.bf16.mxu0 %v6218_v36  ;;  %4513 = vmatprep.mubr.bf16.mxu1 %v6220_v54  ;;  %v7956_v36 = vpop.permute.xlu0 %2224 }
 0x25d   :  { %v7958_v54 = vpop.permute.xlu1 %2419 }
 0x261   :  { %3384 = vmatmul.mubr.bf16.gmra.mrb[80].mxu0 %v6222_v58  ;;  %4514 = vmatmul.mubr.bf16.gmra.mrb[80].mxu1 %v6223_v19  ;;  %v7960_v58 = vpop.permute.xlu0 %2414  ;;  %v6300_v19 = vld [vmem:[%s8365_s4 + $0x228] ss:$16 sps:$4 sm:$0xff]  }
 0x262   :  { %3391 = vmatprep.mubr.bf16.mxu0 %v6224_v2  ;;  %4521 = vmatprep.mubr.bf16.mxu1 %v6226_v59  ;;  %v6301_v2 = vld [vmem:[%s8366_s5 + $0x228] ss:$16 sps:$4 sm:$0xff]   ;;  %v6302_v59 = vld [vmem:[%s8365_s4 + $0x24c] ss:$16 sps:$4 sm:$0xff]  }
 0x269   :  { %3392 = vmatmul.mubr.bf16.gmra.mrb[84].mxu0 %v6228_v31  ;;  %4522 = vmatmul.mubr.bf16.gmra.mrb[84].mxu1 %v6229_v23  ;;  %v6304_v31 = vld [vmem:[%s8366_s5 + $0x24c] ss:$16 sps:$4 sm:$0xff]   ;;  %v7974_v23 = vpop.permute.xlu1 %2319 }
 0x26a   :  { %3399 = vmatprep.mubr.bf16.mxu0 %v6230_v52  ;;  %4529 = vmatprep.mubr.bf16.mxu1 %v6232_v50  ;;  %v7976_v52 = vpop.permute.xlu0 %2314  ;;  %v6306_v50 = vld [vmem:[%s8365_s4 + $0x248] ss:$16 sps:$4 sm:$0xff]  }
 0x271   :  { %3400 = vmatmul.mubr.bf16.gmra.mrb[88].mxu0 %v6234_v37  ;;  %4530 = vmatmul.mubr.bf16.gmra.mrb[88].mxu1 %v6235_v12  ;;  %v6307_v37 = vld [vmem:[%s8366_s5 + $0x248] ss:$16 sps:$4 sm:$0xff]   ;;  %v6308_v12 = vld [vmem:[%s8365_s4 + $0x26c] ss:$16 sps:$4 sm:$0xff]  }
 0x272   :  { %3407 = vmatprep.mubr.bf16.mxu0 %v6236_v61  ;;  %4537 = vmatprep.mubr.bf16.mxu1 %v6238_v62  ;;  %v6310_v61 = vld [vmem:[%s8366_s5 + $0x26c] ss:$16 sps:$4 sm:$0xff]   ;;  %v7990_v62 = vpop.permute.xlu1 %2239 }
 0x279   :  { %3408 = vmatmul.mubr.bf16.gmra.mrb[92].mxu0 %v6240_v49  ;;  %4538 = vmatmul.mubr.bf16.gmra.mrb[92].mxu1 %v6241_v55  ;;  %v7992_v49 = vpop.permute.xlu0 %2234  ;;  %v6312_v55 = vld [vmem:[%s8365_s4 + $0x268] ss:$16 sps:$4 sm:$0xff]  }
 0x27a   :  { %3415 = vmatprep.mubr.bf16.mxu0 %v6242_v47  ;;  %4545 = vmatprep.mubr.bf16.mxu1 %v6244_v32  ;;  %v6313_v47 = vld [vmem:[%s8366_s5 + $0x268] ss:$16 sps:$4 sm:$0xff]   ;;  %v6314_v32 = vld [vmem:[%s8365_s4 + $0x28c] ss:$16 sps:$4 sm:$0xff]  }
 0x281   :  { %3416 = vmatmul.mubr.bf16.gmra.mrb[96].mxu0 %v6246_v5  ;;  %4546 = vmatmul.mubr.bf16.gmra.mrb[96].mxu1 %v6247_v43  ;;  %v6316_v5 = vld [vmem:[%s8366_s5 + $0x28c] ss:$16 sps:$4 sm:$0xff]   ;;  %v8006_v43 = vpop.permute.xlu1 %2429 }
 0x282   :  { %3423 = vmatprep.mubr.bf16.mxu0 %v6248_v6  ;;  %4553 = vmatprep.mubr.bf16.mxu1 %v6250_v51  ;;  %8383 = vst [vmem:[#allocation3_spill] sm:$0xff] %v8006_v43  ;;  %v8008_v6 = vpop.permute.xlu0 %2424 }
 0x285   :  { %v8010_v51 = vpop.permute.xlu1 %2329 }
 0x289   :  { %3424 = vmatmul.mubr.bf16.gmra.mrb[100].mxu0 %v6252_v13  ;;  %4554 = vmatmul.mubr.bf16.gmra.mrb[100].mxu1 %v6253_v21  ;;  %v8012_v13 = vpop.permute.xlu0 %2324  ;;  %v6318_v21 = vld [vmem:[%s8365_s4 + $0x288] ss:$16 sps:$4 sm:$0xff]  }
 0x28a   :  { %3431 = vmatprep.mubr.bf16.mxu0 %v6254_v26  ;;  %4561 = vmatprep.mubr.bf16.mxu1 %v6256_v8  ;;  %v6319_v26 = vld [vmem:[%s8366_s5 + $0x288] ss:$16 sps:$4 sm:$0xff]   ;;  %v6320_v8 = vld [vmem:[%s8365_s4 + $0x2ac] ss:$16 sps:$4 sm:$0xff]  }
 0x291   :  { %3432 = vmatmul.mubr.bf16.gmra.mrb[104].mxu0 %v6258_v17  ;;  %4562 = vmatmul.mubr.bf16.gmra.mrb[104].mxu1 %v6259_v44  ;;  %v6322_v17 = vld [vmem:[%s8366_s5 + $0x2ac] ss:$16 sps:$4 sm:$0xff]   ;;  %v8026_v44 = vpop.permute.xlu1 %2249 }
 0x292   :  { %3439 = vmatprep.mubr.bf16.mxu0 %v6260_v48  ;;  %4569 = vmatprep.mubr.bf16.mxu1 %v6262_v11  ;;  %v8028_v48 = vpop.permute.xlu0 %2244  ;;  %v6324_v11 = vld [vmem:[%s8365_s4 + $0x2a8] ss:$16 sps:$4 sm:$0xff]  }
 0x299   :  { %3440 = vmatmul.mubr.bf16.gmra.mrb[108].mxu0 %v6264_v9  ;;  %4570 = vmatmul.mubr.bf16.gmra.mrb[108].mxu1 %v6265_v20  ;;  %v6325_v9 = vld [vmem:[%s8366_s5 + $0x2a8] ss:$16 sps:$4 sm:$0xff]   ;;  %v6326_v20 = vld [vmem:[%s8365_s4 + $0x2cc] ss:$16 sps:$4 sm:$0xff]  }
 0x29a   :  { %3447 = vmatprep.mubr.bf16.mxu0 %v6266_v25  ;;  %4577 = vmatprep.mubr.bf16.mxu1 %v6268_v46  ;;  %v6328_v25 = vld [vmem:[%s8366_s5 + $0x2cc] ss:$16 sps:$4 sm:$0xff]   ;;  %v8042_v46 = vpop.permute.xlu1 %2439 }
 0x29b   :  { %8384 = vst [vmem:[#allocation4_spill] sm:$0xff] %v8042_v46 }
 0x2a1   :  { %3448 = vmatmul.mubr.bf16.gmra.mrb[112].mxu0 %v6270_v3  ;;  %4578 = vmatmul.mubr.bf16.gmra.mrb[112].mxu1 %v6271_v15  ;;  %v8044_v3 = vpop.permute.xlu0 %2434  ;;  %v6330_v15 = vld [vmem:[%s8365_s4 + $0x2c8] ss:$16 sps:$4 sm:$0xff]  }
 0x2a2   :  { %3455 = vmatprep.mubr.bf16.mxu0 %v6272_v16  ;;  %4585 = vmatprep.mubr.bf16.mxu1 %v6274_v42  ;;  %8385 = vst [vmem:[#allocation5_spill] sm:$0xff] %v8044_v3  ;;  %v6331_v16 = vld [vmem:[%s8366_s5 + $0x2c8] ss:$16 sps:$4 sm:$0xff]   ;;  %v6332_v42 = vld [vmem:[%s8365_s4 + $0x2ec] ss:$16 sps:$4 sm:$0xff]  }
 0x2a9   :  { %3456 = vmatmul.mubr.bf16.gmra.mrb[116].mxu0 %v6276_v60  ;;  %4586 = vmatmul.mubr.bf16.gmra.mrb[116].mxu1 %v6277_v56  ;;  %v6334_v60 = vld [vmem:[%s8366_s5 + $0x2ec] ss:$16 sps:$4 sm:$0xff]   ;;  %v8058_v56 = vpop.permute.xlu1 %2339 }
 0x2aa   :  { %3463 = vmatprep.mubr.bf16.mxu0 %v6278_v39  ;;  %4593 = vmatprep.mubr.bf16.mxu1 %v6280_v14  ;;  %v8060_v39 = vpop.permute.xlu0 %2334 }
 0x2ad   :  { %v8062_v14 = vpop.permute.xlu1 %2259 }
 0x2b1   :  { %3464 = vmatmul.mubr.bf16.gmra.mrb[120].mxu0 %v6282_v22  ;;  %4594 = vmatmul.mubr.bf16.gmra.mrb[120].mxu1 %v6283_v63  ;;  %v8064_v22 = vpop.permute.xlu0 %2254  ;;  %v6336_v63 = vld [vmem:[%s8365_s4 + $0x2e8] ss:$16 sps:$4 sm:$0xff]  }
 0x2b2   :  { %3471 = vmatprep.mubr.bf16.mxu0 %v6284_v28  ;;  %4601 = vmatprep.mubr.bf16.mxu1 %v6286_v24  ;;  %v6337_v28 = vld [vmem:[%s8366_s5 + $0x2e8] ss:$16 sps:$4 sm:$0xff]   ;;  %v6338_v24 = vld [vmem:[%s8365_s4 + $0x30c] ss:$16 sps:$4 sm:$0xff]  }
 0x2b9   :  { %3472 = vmatmul.mubr.bf16.gmra.mrb[124].mxu0 %v6288_v18  ;;  %4602 = vmatmul.mubr.bf16.gmra.mrb[124].mxu1 %v6289_v4  ;;  %v6340_v18 = vld [vmem:[%s8366_s5 + $0x30c] ss:$16 sps:$4 sm:$0xff]   ;;  %v8078_v4 = vpop.permute.xlu1 %2449 }
 0x2ba   :  { %3479 = vmatprep.mubr.bf16.mxu0 %v6290_v41  ;;  %4609 = vmatprep.mubr.bf16.mxu1 %v6292_v29  ;;  %8386 = vst [vmem:[#allocation6_spill] sm:$0xff] %v8078_v4  ;;  %v8080_v41 = vpop.permute.xlu0 %2444  ;;  %v6342_v29 = vld [vmem:[%s8365_s4 + $0x308] ss:$16 sps:$4 sm:$0xff]  }
 0x2bb   :  { %8387 = vst [vmem:[#allocation7_spill] sm:$0xff] %v8080_v41 }
 0x2c1   :  { %3480 = vmatmul.mubr.bf16.gmra.mrb[128].mxu0 %v6294_v53  ;;  %4610 = vmatmul.mubr.bf16.gmra.mrb[128].mxu1 %v6295_v30  ;;  %v6343_v53 = vld [vmem:[%s8366_s5 + $0x308] ss:$16 sps:$4 sm:$0xff]   ;;  %v6344_v30 = vld [vmem:[%s8365_s4 + $0x32c] ss:$16 sps:$4 sm:$0xff]  }
 0x2c2   :  { %3487 = vmatprep.mubr.bf16.mxu0 %v6296_v1  ;;  %4617 = vmatprep.mubr.bf16.mxu1 %v6298_v33  ;;  %v6346_v1 = vld [vmem:[%s8366_s5 + $0x32c] ss:$16 sps:$4 sm:$0xff]   ;;  %v8094_v33 = vpop.permute.xlu1 %2349 }
 0x2c9   :  { %3488 = vmatmul.mubr.bf16.gmra.mrb[132].mxu0 %v6300_v19  ;;  %4618 = vmatmul.mubr.bf16.gmra.mrb[132].mxu1 %v6301_v2  ;;  %v8096_v19 = vpop.permute.xlu0 %2344  ;;  %v6348_v2 = vld [vmem:[%s8365_s4 + $0x328] ss:$16 sps:$4 sm:$0xff]  }
 0x2ca   :  { %3495 = vmatprep.mubr.bf16.mxu0 %v6302_v59  ;;  %4625 = vmatprep.mubr.bf16.mxu1 %v6304_v31  ;;  %v6349_v59 = vld [vmem:[%s8366_s5 + $0x328] ss:$16 sps:$4 sm:$0xff]   ;;  %v6350_v31 = vld [vmem:[%s8365_s4 + $0x34c] ss:$16 sps:$4 sm:$0xff]  }
 0x2d1   :  { %3496 = vmatmul.mubr.bf16.gmra.mrb[136].mxu0 %v6306_v50  ;;  %4626 = vmatmul.mubr.bf16.gmra.mrb[136].mxu1 %v6307_v37  ;;  %v6352_v50 = vld [vmem:[%s8366_s5 + $0x34c] ss:$16 sps:$4 sm:$0xff]   ;;  %v8110_v37 = vpop.permute.xlu1 %2269 }
 0x2d2   :  { %3503 = vmatprep.mubr.bf16.mxu0 %v6308_v12  ;;  %4633 = vmatprep.mubr.bf16.mxu1 %v6310_v61  ;;  %v8112_v12 = vpop.permute.xlu0 %2264 }
 0x2d5   :  { %v8114_v61 = vpop.permute.xlu1 %2459 }
 0x2d6   :  { %8388 = vst [vmem:[#allocation8_spill] sm:$0xff] %v8114_v61 }
 0x2d9   :  { %3504 = vmatmul.mubr.bf16.gmra.mrb[140].mxu0 %v6312_v55  ;;  %4634 = vmatmul.mubr.bf16.gmra.mrb[140].mxu1 %v6313_v47  ;;  %v8116_v55 = vpop.permute.xlu0 %2454  ;;  %v6354_v47 = vld [vmem:[%s8365_s4 + $0x348] ss:$16 sps:$4 sm:$0xff]  }
 0x2da   :  { %3511 = vmatprep.mubr.bf16.mxu0 %v6314_v32  ;;  %4641 = vmatprep.mubr.bf16.mxu1 %v6316_v5  ;;  %8389 = vst [vmem:[#allocation9_spill] sm:$0xff] %v8116_v55  ;;  %v6355_v32 = vld [vmem:[%s8366_s5 + $0x348] ss:$16 sps:$4 sm:$0xff]   ;;  %v6356_v5 = vld [vmem:[%s8365_s4 + $0x36c] ss:$16 sps:$4 sm:$0xff]  }
 0x2e1   :  { %3512 = vmatmul.mubr.bf16.gmra.mrb[144].mxu0 %v6318_v21  ;;  %4642 = vmatmul.mubr.bf16.gmra.mrb[144].mxu1 %v6319_v26  ;;  %v6358_v21 = vld [vmem:[%s8366_s5 + $0x36c] ss:$16 sps:$4 sm:$0xff]   ;;  %v4853_v26 = vlaneseq }
 0x2e2   :  { %3519 = vmatprep.mubr.bf16.mxu0 %v6320_v8  ;;  %4649 = vmatprep.mubr.bf16.mxu1 %v6322_v17  ;;  %v6363_v8 = vmov 1966171168  }
 0x2e3   :  { %v4867_v17 = vunpack.c.l.s4 %v6363_v8 }
 0x2e9   :  { %3520 = vmatmul.mubr.bf16.gmra.mrb[148].mxu0 %v6324_v11  ;;  %4650 = vmatmul.mubr.bf16.gmra.mrb[148].mxu1 %v6325_v9  ;;  %v8130_v11 = vpop.permute.xlu1 %2359  ;;  %v8132_v9 = vpop.permute.xlu0 %2354 }
 0x2ea   :  { %3527 = vmatprep.mubr.bf16.mxu0 %v6326_v20  ;;  %4657 = vmatprep.mubr.bf16.mxu1 %v6328_v25  ;;  %v8134_v20 = vshrl.u32 %v4853_v26, 7 }
 0x2ec   :  { %8390 = vst [vmem:[#allocation10_spill] sm:$0xff] %v8134_v20 }
 0x2f1   :  { %3528 = vmatmul.mubr.bf16.gmra.mrb[152].mxu0 %v6330_v15  ;;  %4658 = vmatmul.mubr.bf16.gmra.mrb[152].mxu1 %v6331_v16  ;;  %v6360_v16 = vld [vmem:[%s8365_s4 + $0x368] ss:$16 sps:$4 sm:$0xff]  }
 0x2f2   :  { %3535 = vmatprep.mubr.bf16.mxu0 %v6332_v42  ;;  %4665 = vmatprep.mubr.bf16.mxu1 %v6334_v60  ;;  %v6361_v42 = vld [vmem:[%s8366_s5 + $0x368] ss:$16 sps:$4 sm:$0xff]   ;;  %v4868_v60 = vunpack.c.0.s8 %v4867_v17 }
 0x2f9   :  { %3536 = vmatmul.mubr.bf16.gmra.mrb[156].mxu0 %v6336_v63  ;;  %4666 = vmatmul.mubr.bf16.gmra.mrb[156].mxu1 %v6337_v28 }
 0x2fa   :  { %3543 = vmatprep.mubr.bf16.mxu0 %v6338_v24  ;;  %4673 = vmatprep.mubr.bf16.mxu1 %v6340_v18 }
 0x301   :  { %3544 = vmatmul.mubr.bf16.gmra.mrb[160].mxu0 %v6342_v29  ;;  %4674 = vmatmul.mubr.bf16.gmra.mrb[160].mxu1 %v6343_v53  ;;  %v5334_v29 = vld.sshfl [vmem:[%s8367_s7] sm:$0x33 pattern:$0x75316420] }
 0x302   :  { %3551 = vmatprep.mubr.bf16.mxu0 %v6344_v30  ;;  %4681 = vmatprep.mubr.bf16.mxu1 %v6346_v1  ;;  %v4865_v1 = vcombine.high %v5334_v29, %v5334_v29 }
 0x309   :  { %3552 = vmatmul.mubr.bf16.gmra.mrb[164].mxu0 %v6348_v2  ;;  %4682 = vmatmul.mubr.bf16.gmra.mrb[164].mxu1 %v6349_v59  ;;  %v4871_v2 = vsub.s32 %v4868_v60, %v8134_v20 }
 0x30a   :  { %3559 = vmatprep.mubr.bf16.mxu0 %v6350_v31  ;;  %4689 = vmatprep.mubr.bf16.mxu1 %v6352_v50 }
 0x30b   :  { %v8154_v17 = vrot.slane %v5334_v29, %v4871_v2 }
 0x311   :  { %3560 = vmatmul.mubr.bf16.gmra.mrb[168].mxu0 %v6354_v47  ;;  %4690 = vmatmul.mubr.bf16.gmra.mrb[168].mxu1 %v6355_v32 }
 0x312   :  { %3567 = vmatprep.mubr.bf16.mxu0 %v6356_v5  ;;  %4697 = vmatprep.mubr.bf16.mxu1 %v6358_v21 }
 0x314   :  { %v3353_v25 = vpop.f32.mrb[64].mxu0  ;;  %v4483_v15 = vpop.f32.mrb[64].mxu1 }
 0x315   :  { %v5598_v63 = vadd.f32 %v3353_v25, %v7956_v36  ;;  %v5654_v28 = vadd.f32 %v4483_v15, %v7956_v36  ;;  %v3355_v24 = vpop.f32.mrb[65].mxu0  ;;  %v4485_v18 = vpop.f32.mrb[65].mxu1  ;;  %v8150_v36 = vrot.slane %v4865_v1, %v4871_v2 }
 0x316   :  { %v3356_v53 = vpop.f32.mrb[66].mxu0  ;;  %v4486_v30 = vpop.f32.mrb[66].mxu1 }
 0x317   :  { %v3576_v59 = vmax.f32 %v5598_v63, 0.0  ;;  %v4706_v31 = vmax.f32 %v5654_v28, 0.0  ;;  %v5599_v50 = vadd.f32 %v3356_v53, %v7954_v57  ;;  %v5655_v47 = vadd.f32 %v4486_v30, %v7954_v57  ;;  %v3358_v32 = vpop.f32.mrb[67].mxu0  ;;  %v4488_v5 = vpop.f32.mrb[67].mxu1 }
 0x318   :  { %v8157_v25 = vpop.permute.xlu1 %2279  ;;  %v8159_v15 = vpop.permute.xlu0 %2274 }
 0x319   :  { %v8152_v21 = vmax.f32 %v3576_v59, %v4706_v31  ;;  %v3577_v26 = vmax.f32 %v5599_v50, 0.0  ;;  %v4707_v8 = vmax.f32 %v5655_v47, 0.0  ;;  %3568 = vmatmul.mubr.bf16.gmra.mrb[172].mxu0 %v6360_v16  ;;  %4698 = vmatmul.mubr.bf16.gmra.mrb[172].mxu1 %v6361_v42 }
 0x31a   :  { %4921 = vmatprep.mubr.bf16.mxu0 %v8150_v36 }
 0x31b   :  { %v8161_v60 = vmax.f32 %v3577_v26, %v4707_v8 }
 0x31c   :  { %v3361_v57 = vpop.f32.mrb[68].mxu0  ;;  %v4491_v63 = vpop.f32.mrb[68].mxu1 }
 0x31d   :  { %v5600_v24 = vadd.f32 %v3361_v57, %v7992_v49  ;;  %v5656_v16 = vadd.f32 %v4491_v63, %v7992_v49  ;;  %v3363_v42 = vpop.f32.mrb[69].mxu0  ;;  %v4493_v18 = vpop.f32.mrb[69].mxu1 }
 0x31e   :  { %v3364_v29 = vpop.f32.mrb[70].mxu0  ;;  %v4494_v53 = vpop.f32.mrb[70].mxu1 }
 0x31f   :  { %v3578_v30 = vmax.f32 %v5600_v24, 0.0  ;;  %v4708_v1 = vmax.f32 %v5656_v16, 0.0  ;;  %v5601_v2 = vadd.f32 %v3364_v29, %v7990_v62  ;;  %v5657_v59 = vadd.f32 %v4494_v53, %v7990_v62  ;;  %v3366_v31 = vpop.f32.mrb[71].mxu0  ;;  %v4496_v50 = vpop.f32.mrb[71].mxu1 }
 0x320   :  { %v8171_v26 = vpop.permute.xlu1 %2469  ;;  %v8173_v8 = vpop.permute.xlu0 %2464 }
 0x321   :  { %v8169_v47 = vmax.f32 %v3578_v30, %v4708_v1  ;;  %v3579_v32 = vmax.f32 %v5601_v2, 0.0  ;;  %v4709_v5 = vmax.f32 %v5657_v59, 0.0  ;;  %8391 = vst [vmem:[#allocation11_spill] sm:$0xff] %v8171_v26  ;;  %8392 = vst [vmem:[#allocation12_spill] sm:$0xff] %v8173_v8 }
 0x323   :  { %v8175_v49 = vmax.f32 %v3579_v32, %v4709_v5 }
 0x324   :  { %v3369_v57 = vpop.f32.mrb[72].mxu0  ;;  %v4499_v63 = vpop.f32.mrb[72].mxu1 }
 0x325   :  { %v5602_v16 = vadd.f32 %v3369_v57, %v8028_v48  ;;  %v5658_v62 = vadd.f32 %v4499_v63, %v8028_v48  ;;  %v3371_v42 = vpop.f32.mrb[73].mxu0  ;;  %v4501_v18 = vpop.f32.mrb[73].mxu1 }
 0x326   :  { %v3372_v29 = vpop.f32.mrb[74].mxu0  ;;  %v4502_v53 = vpop.f32.mrb[74].mxu1 }
 0x327   :  { %v3580_v30 = vmax.f32 %v5602_v16, 0.0  ;;  %v4710_v1 = vmax.f32 %v5658_v62, 0.0  ;;  %v5603_v2 = vadd.f32 %v3372_v29, %v8026_v44  ;;  %v5659_v59 = vadd.f32 %v4502_v53, %v8026_v44  ;;  %v3374_v31 = vpop.f32.mrb[75].mxu0  ;;  %v4504_v50 = vpop.f32.mrb[75].mxu1 }
 0x328   :  { %v8185_v24 = vpop.permute.xlu1 %2369  ;;  %v8187_v57 = vpop.permute.xlu0 %2364 }
 0x329   :  { %v8183_v32 = vmax.f32 %v3580_v30, %v4710_v1  ;;  %v3581_v5 = vmax.f32 %v5603_v2, 0.0  ;;  %v4711_v0 = vmax.f32 %v5659_v59, 0.0 }
 0x32b   :  { %v8189_v48 = vmax.f32 %v3581_v5, %v4711_v0 }
 0x32c   :  { %v3377_v63 = vpop.f32.mrb[76].mxu0  ;;  %v4507_v42 = vpop.f32.mrb[76].mxu1 }
 0x32d   :  { %v5604_v62 = vadd.f32 %v3377_v63, %v8064_v22  ;;  %v5660_v44 = vadd.f32 %v4507_v42, %v8064_v22  ;;  %v3379_v18 = vpop.f32.mrb[77].mxu0  ;;  %v4509_v29 = vpop.f32.mrb[77].mxu1 }
 0x32e   :  { %v3380_v53 = vpop.f32.mrb[78].mxu0  ;;  %v4510_v30 = vpop.f32.mrb[78].mxu1 }
 0x32f   :  { %v3582_v1 = vmax.f32 %v5604_v62, 0.0  ;;  %v4712_v2 = vmax.f32 %v5660_v44, 0.0  ;;  %v5605_v59 = vadd.f32 %v3380_v53, %v8062_v14  ;;  %v5661_v0 = vadd.f32 %v4510_v30, %v8062_v14  ;;  %v3382_v31 = vpop.f32.mrb[79].mxu0  ;;  %v4512_v50 = vpop.f32.mrb[79].mxu1 }
 0x330   :  { %v2290_v20 = vpop.permute.xlu1 %2289  ;;  %v2285_v63 = vpop.permute.xlu0 %2284 }
 0x331   :  { %v8197_v5 = vmax.f32 %v3582_v1, %v4712_v2  ;;  %v3583_v28 = vmax.f32 %v5605_v59, 0.0  ;;  %v4713_v16 = vmax.f32 %v5661_v0, 0.0 }
 0x333   :  { %v8199_v26 = vmax.f32 %v3583_v28, %v4713_v16 }
 0x334   :  { %v3385_v22 = vpop.f32.mrb[80].mxu0  ;;  %v4515_v42 = vpop.f32.mrb[80].mxu1 }
 0x335   :  { %v5606_v44 = vadd.f32 %v3385_v22, %v8112_v12  ;;  %v5662_v18 = vadd.f32 %v4515_v42, %v8112_v12  ;;  %v3387_v14 = vpop.f32.mrb[81].mxu0  ;;  %v4517_v29 = vpop.f32.mrb[81].mxu1 }
 0x336   :  { %v3388_v53 = vpop.f32.mrb[82].mxu0  ;;  %v4518_v30 = vpop.f32.mrb[82].mxu1 }
 0x337   :  { %v3584_v1 = vmax.f32 %v5606_v44, 0.0  ;;  %v4714_v2 = vmax.f32 %v5662_v18, 0.0  ;;  %v5607_v59 = vadd.f32 %v3388_v53, %v8110_v37  ;;  %v5663_v28 = vadd.f32 %v4518_v30, %v8110_v37  ;;  %v3390_v16 = vpop.f32.mrb[83].mxu0  ;;  %v4520_v0 = vpop.f32.mrb[83].mxu1 }
 0x338   :  { %v8209_v8 = vpop.permute.xlu1 %2479  ;;  %v8211_v22 = vpop.permute.xlu0 %2474 }
 0x339   :  { %v8207_v31 = vmax.f32 %v3584_v1, %v4714_v2  ;;  %v3585_v50 = vmax.f32 %v5607_v59, 0.0  ;;  %v4715_v62 = vmax.f32 %v5663_v28, 0.0  ;;  %8393 = vst [vmem:[#allocation13_spill] sm:$0xff] %v8209_v8  ;;  %8394 = vst [vmem:[#allocation14_spill] sm:$0xff] %v8211_v22 }
 0x33b   :  { %v8213_v12 = vmax.f32 %v3585_v50, %v4715_v62 }
 0x33c   :  { %v3393_v42 = vpop.f32.mrb[84].mxu0  ;;  %v4523_v14 = vpop.f32.mrb[84].mxu1 }
 0x33d   :  { %v5608_v18 = vadd.f32 %v3393_v42, %v8159_v15  ;;  %v5664_v37 = vadd.f32 %v4523_v14, %v8159_v15  ;;  %v3395_v29 = vpop.f32.mrb[85].mxu0  ;;  %v4525_v53 = vpop.f32.mrb[85].mxu1 }
 0x33e   :  { %v3396_v30 = vpop.f32.mrb[86].mxu0  ;;  %v4526_v1 = vpop.f32.mrb[86].mxu1 }
 0x33f   :  { %v3586_v2 = vmax.f32 %v5608_v18, 0.0  ;;  %v4716_v59 = vmax.f32 %v5664_v37, 0.0  ;;  %v5609_v28 = vadd.f32 %v3396_v30, %v8157_v25  ;;  %v5665_v62 = vadd.f32 %v4526_v1, %v8157_v25  ;;  %v3398_v16 = vpop.f32.mrb[87].mxu0  ;;  %v4528_v0 = vpop.f32.mrb[87].mxu1 }
 0x340   :  { %v8223_v22 = vpop.permute.xlu1 %2379  ;;  %v8225_v42 = vpop.permute.xlu0 %2374 }
 0x341   :  { %v8221_v50 = vmax.f32 %v3586_v2, %v4716_v59  ;;  %v3587_v8 = vmax.f32 %v5609_v28, 0.0  ;;  %v4717_v44 = vmax.f32 %v5665_v62, 0.0 }
 0x343   :  { %v8227_v15 = vmax.f32 %v3587_v8, %v4717_v44 }
 0x344   :  { %v3401_v14 = vpop.f32.mrb[88].mxu0  ;;  %v4531_v29 = vpop.f32.mrb[88].mxu1 }
 0x345   :  { %v5610_v37 = vadd.f32 %v3401_v14, %v2285_v63  ;;  %v5666_v53 = vadd.f32 %v4531_v29, %v2285_v63  ;;  %v3403_v25 = vpop.f32.mrb[89].mxu0  ;;  %v4533_v30 = vpop.f32.mrb[89].mxu1 }
 0x346   :  { %v3404_v1 = vpop.f32.mrb[90].mxu0  ;;  %v4534_v2 = vpop.f32.mrb[90].mxu1 }
 0x347   :  { %v3588_v59 = vmax.f32 %v5610_v37, 0.0  ;;  %v4718_v28 = vmax.f32 %v5666_v53, 0.0  ;;  %v5611_v62 = vadd.f32 %v3404_v1, %v2290_v20  ;;  %v5667_v16 = vadd.f32 %v4534_v2, %v2290_v20  ;;  %v3406_v0 = vpop.f32.mrb[91].mxu0  ;;  %v4536_v61 = vpop.f32.mrb[91].mxu1 }
 0x348   :  { %v2300_v4 = vpop.permute.xlu1 %2299  ;;  %v2295_v41 = vpop.permute.xlu0 %2294 }
 0x349   :  { %v8231_v55 = vmax.f32 %v3588_v59, %v4718_v28  ;;  %v3589_v8 = vmax.f32 %v5611_v62, 0.0  ;;  %v4719_v44 = vmax.f32 %v5667_v16, 0.0 }
 0x34b   :  { %v8233_v46 = vmax.f32 %v3589_v8, %v4719_v44 }
 0x34c   :  { %v3409_v14 = vpop.f32.mrb[92].mxu0  ;;  %v4539_v63 = vpop.f32.mrb[92].mxu1 }
 0x34d   :  { %v5612_v25 = vadd.f32 %v3409_v14, %v2295_v41  ;;  %v5668_v37 = vadd.f32 %v4539_v63, %v2295_v41  ;;  %v3411_v53 = vpop.f32.mrb[93].mxu0  ;;  %v4541_v30 = vpop.f32.mrb[93].mxu1 }
 0x34e   :  { %v3412_v20 = vpop.f32.mrb[94].mxu0  ;;  %v4542_v1 = vpop.f32.mrb[94].mxu1 }
 0x34f   :  { %v3590_v61 = vmax.f32 %v5612_v25, 0.0  ;;  %v4720_v2 = vmax.f32 %v5668_v37, 0.0  ;;  %v5613_v59 = vadd.f32 %v3412_v20, %v2300_v4  ;;  %v5669_v28 = vadd.f32 %v4542_v1, %v2300_v4  ;;  %v3414_v62 = vpop.f32.mrb[95].mxu0  ;;  %v4544_v16 = vpop.f32.mrb[95].mxu1 }
 0x351   :  { %v8237_v0 = vmax.f32 %v3590_v61, %v4720_v2  ;;  %v3591_v8 = vmax.f32 %v5613_v59, 0.0  ;;  %v4721_v44 = vmax.f32 %v5669_v28, 0.0 }
 0x353   :  { %v8239_v18 = vmax.f32 %v3591_v8, %v4721_v44 }
 0x354   :  { %v3417_v3 = vpop.f32.mrb[96].mxu0  ;;  %v4547_v29 = vpop.f32.mrb[96].mxu1 }
 0x355   :  { %v5614_v14 = vadd.f32 %v3417_v3, %v7940_v35  ;;  %v5670_v63 = vadd.f32 %v4547_v29, %v7940_v35  ;;  %v3419_v25 = vpop.f32.mrb[97].mxu0  ;;  %v4549_v37 = vpop.f32.mrb[97].mxu1 }
 0x356   :  { %v3420_v4 = vpop.f32.mrb[98].mxu0  ;;  %v4550_v53 = vpop.f32.mrb[98].mxu1 }
 0x357   :  { %v3592_v30 = vmax.f32 %v5614_v14, 0.0  ;;  %v4722_v20 = vmax.f32 %v5670_v63, 0.0  ;;  %v5615_v1 = vadd.f32 %v3420_v4, %v7938_v27  ;;  %v5671_v61 = vadd.f32 %v4550_v53, %v7938_v27  ;;  %v3422_v2 = vpop.f32.mrb[99].mxu0  ;;  %v4552_v59 = vpop.f32.mrb[99].mxu1 }
 0x359   :  { %v4778_v28 = vmax.f32 %v3592_v30, %v4722_v20  ;;  %v3593_v62 = vmax.f32 %v5615_v1, 0.0  ;;  %v4723_v16 = vmax.f32 %v5671_v61, 0.0  ;;  %v8395_v1 = vpack.c.bf16 %v8161_v60, %v8152_v21 }
 0x35b   :  { %v4779_v8 = vmax.f32 %v3593_v62, %v4723_v16 }
 0x35c   :  { %v3425_v44 = vpop.f32.mrb[100].mxu0  ;;  %v4555_v3 = vpop.f32.mrb[100].mxu1 }
 0x35d   :  { %v5616_v35 = vadd.f32 %v3425_v44, %v7976_v52  ;;  %v5672_v29 = vadd.f32 %v4555_v3, %v7976_v52  ;;  %v3427_v25 = vpop.f32.mrb[101].mxu0  ;;  %v4557_v37 = vpop.f32.mrb[101].mxu1  ;;  %v4826_v14 = vpack.c.bf16 %v4779_v8, %v4778_v28 }
 0x35e   :  { %v3428_v63 = vpop.f32.mrb[102].mxu0  ;;  %v4558_v41 = vpop.f32.mrb[102].mxu1 }
 0x35f   :  { %v3594_v4 = vmax.f32 %v5616_v35, 0.0  ;;  %v4724_v43 = vmax.f32 %v5672_v29, 0.0  ;;  %v5617_v27 = vadd.f32 %v3428_v63, %v7974_v23  ;;  %v5673_v53 = vadd.f32 %v4558_v41, %v7974_v23  ;;  %v3430_v30 = vpop.f32.mrb[103].mxu0  ;;  %v4560_v20 = vpop.f32.mrb[103].mxu1  ;;  %5416 = vmatprep.subr.bf16.mxu0 %v4826_v14 }
 0x360   :  { %5417 = vmatpush3.bf16.msra.mxu0 %v8395_v1  ;;  %v8396_v14 = vpack.c.bf16 %v8175_v49, %v8169_v47 }
 0x361   :  { %v4780_v61 = vmax.f32 %v3594_v4, %v4724_v43  ;;  %v3595_v52 = vmax.f32 %v5617_v27, 0.0  ;;  %v4725_v2 = vmax.f32 %v5673_v53, 0.0 }
 0x363   :  { %v4781_v59 = vmax.f32 %v3595_v52, %v4725_v2 }
 0x364   :  { %v3433_v28 = vpop.f32.mrb[104].mxu0  ;;  %v4563_v62 = vpop.f32.mrb[104].mxu1 }
 0x365   :  { %v5618_v16 = vadd.f32 %v3433_v28, %v8012_v13  ;;  %v5674_v8 = vadd.f32 %v4563_v62, %v8012_v13  ;;  %v3435_v44 = vpop.f32.mrb[105].mxu0  ;;  %v4565_v3 = vpop.f32.mrb[105].mxu1  ;;  %v4827_v23 = vpack.c.bf16 %v4781_v59, %v4780_v61 }
 0x366   :  { %v3436_v41 = vpop.f32.mrb[106].mxu0  ;;  %v4566_v35 = vpop.f32.mrb[106].mxu1  ;;  %v8397_v44 = vpack.c.bf16 %v8189_v48, %v8183_v32 }
 0x367   :  { %v3596_v29 = vmax.f32 %v5618_v16, 0.0  ;;  %v4726_v25 = vmax.f32 %v5674_v8, 0.0  ;;  %v5619_v21 = vadd.f32 %v3436_v41, %v8010_v51  ;;  %v5675_v43 = vadd.f32 %v4566_v35, %v8010_v51  ;;  %v3438_v60 = vpop.f32.mrb[107].mxu0  ;;  %v4568_v37 = vpop.f32.mrb[107].mxu1  ;;  %5418 = vmatprep.subr.bf16.mxu0 %v4827_v23 }
 0x368   :  { %5419 = vmatpush3.bf16.msra.mxu0 %v8396_v14  ;;  %v4881_v37 = vcombine.high %v8150_v36, %v8150_v36 }
 0x369   :  { %v4782_v63 = vmax.f32 %v3596_v29, %v4726_v25  ;;  %v3597_v13 = vmax.f32 %v5619_v21, 0.0  ;;  %v4727_v4 = vmax.f32 %v5675_v43, 0.0 }
 0x36a   :  { %5335 = vmatprep.mubr.msk.bf16.mxu1 %vm4885_vm1, %v4881_v37 }
 0x36b   :  { %v4783_v27 = vmax.f32 %v3597_v13, %v4727_v4 }
 0x36c   :  { %v3441_v53 = vpop.f32.mrb[108].mxu0  ;;  %v4571_v30 = vpop.f32.mrb[108].mxu1 }
 0x36d   :  { %v5620_v20 = vadd.f32 %v3441_v53, %v8060_v39  ;;  %v5676_v1 = vadd.f32 %v4571_v30, %v8060_v39  ;;  %v3443_v61 = vpop.f32.mrb[109].mxu0  ;;  %v4573_v52 = vpop.f32.mrb[109].mxu1  ;;  %v4828_v51 = vpack.c.bf16 %v4783_v27, %v4782_v63 }
 0x36e   :  { %v3444_v2 = vpop.f32.mrb[110].mxu0  ;;  %v4574_v59 = vpop.f32.mrb[110].mxu1 }
 0x36f   :  { %v3598_v28 = vmax.f32 %v5620_v20, 0.0  ;;  %v4728_v62 = vmax.f32 %v5676_v1, 0.0  ;;  %v5621_v47 = vadd.f32 %v3444_v2, %v8058_v56  ;;  %v5677_v49 = vadd.f32 %v4574_v59, %v8058_v56  ;;  %v3446_v16 = vpop.f32.mrb[111].mxu0  ;;  %v4576_v8 = vpop.f32.mrb[111].mxu1  ;;  %5420 = vmatprep.subr.bf16.mxu0 %v4828_v51 }
 0x370   :  { %5421 = vmatpush3.bf16.msra.mxu0 %v8397_v44 }
 0x371   :  { %v4784_v3 = vmax.f32 %v3598_v28, %v4728_v62  ;;  %v3599_v39 = vmax.f32 %v5621_v47, 0.0  ;;  %v4729_v23 = vmax.f32 %v5677_v49, 0.0 }
 0x373   :  { %v4785_v41 = vmax.f32 %v3599_v39, %v4729_v23 }
 0x374   :  { %v3449_v35 = vpop.f32.mrb[112].mxu0  ;;  %v4579_v29 = vpop.f32.mrb[112].mxu1 }
 0x375   :  { %v5622_v25 = vadd.f32 %v3449_v35, %v8096_v19  ;;  %v5678_v21 = vadd.f32 %v4579_v29, %v8096_v19  ;;  %v3451_v43 = vpop.f32.mrb[113].mxu0  ;;  %v4581_v60 = vpop.f32.mrb[113].mxu1  ;;  %v4829_v56 = vpack.c.bf16 %v4785_v41, %v4784_v3  ;;  %v8398_v19 = vpack.c.bf16 %v8199_v26, %v8197_v5 }
 0x376   :  { %v3452_v14 = vpop.f32.mrb[114].mxu0  ;;  %v4582_v63 = vpop.f32.mrb[114].mxu1  ;;  %v8399_v3 = vpack.c.bf16 %v8213_v12, %v8207_v31 }
 0x377   :  { %v3600_v32 = vmax.f32 %v5622_v25, 0.0  ;;  %v4730_v48 = vmax.f32 %v5678_v21, 0.0  ;;  %v5623_v13 = vadd.f32 %v3452_v14, %v8094_v33  ;;  %v5679_v4 = vadd.f32 %v4582_v63, %v8094_v33  ;;  %v3454_v27 = vpop.f32.mrb[115].mxu0  ;;  %v4584_v53 = vpop.f32.mrb[115].mxu1  ;;  %5422 = vmatprep.subr.bf16.mxu0 %v4829_v56 }
 0x378   :  { %5423 = vmatpush3.bf16.msra.mxu0 %v8398_v19 }
 0x379   :  { %v4786_v30 = vmax.f32 %v3600_v32, %v4730_v48  ;;  %v3601_v20 = vmax.f32 %v5623_v13, 0.0  ;;  %v4731_v1 = vmax.f32 %v5679_v4, 0.0  ;;  %v8400_v13 = vpack.c.bf16 %v8227_v15, %v8221_v50 }
 0x37b   :  { %v4787_v36 = vmax.f32 %v3601_v20, %v4731_v1 }
 0x37c   :  { %v3457_v61 = vpop.f32.mrb[116].mxu0  ;;  %v4587_v52 = vpop.f32.mrb[116].mxu1 }
 0x37d   :  { %v5624_v51 = vadd.f32 %v3457_v61, %v8132_v9  ;;  %v5680_v2 = vadd.f32 %v4587_v52, %v8132_v9  ;;  %v3459_v33 = vpop.f32.mrb[117].mxu0  ;;  %v4589_v59 = vpop.f32.mrb[117].mxu1  ;;  %v4830_v28 = vpack.c.bf16 %v4787_v36, %v4786_v30 }
 0x37e   :  { %v3460_v62 = vpop.f32.mrb[118].mxu0  ;;  %v4590_v47 = vpop.f32.mrb[118].mxu1 }
 0x37f   :  { %v3602_v49 = vmax.f32 %v5624_v51, 0.0  ;;  %v4732_v26 = vmax.f32 %v5680_v2, 0.0  ;;  %v5625_v5 = vadd.f32 %v3460_v62, %v8130_v11  ;;  %v5681_v16 = vadd.f32 %v4590_v47, %v8130_v11  ;;  %v3462_v8 = vpop.f32.mrb[119].mxu0  ;;  %v4592_v44 = vpop.f32.mrb[119].mxu1  ;;  %5424 = vmatprep.subr.bf16.mxu0 %v4830_v28 }
 0x380   :  { %5425 = vmatpush3.bf16.msra.mxu0 %v8399_v3  ;;  %v8401_v62 = vpack.c.bf16 %v8233_v46, %v8231_v55 }
 0x381   :  { %v4788_v39 = vmax.f32 %v3602_v49, %v4732_v26  ;;  %v3603_v9 = vmax.f32 %v5625_v5, 0.0  ;;  %v4733_v23 = vmax.f32 %v5681_v16, 0.0 }
 0x383   :  { %v4789_v41 = vmax.f32 %v3603_v9, %v4733_v23 }
 0x384   :  { %v3465_v35 = vpop.f32.mrb[120].mxu0  ;;  %v4595_v29 = vpop.f32.mrb[120].mxu1 }
 0x385   :  { %v5626_v25 = vadd.f32 %v3465_v35, %v8187_v57  ;;  %v5682_v21 = vadd.f32 %v4595_v29, %v8187_v57  ;;  %v3467_v43 = vpop.f32.mrb[121].mxu0  ;;  %v4597_v60 = vpop.f32.mrb[121].mxu1  ;;  %v4831_v11 = vpack.c.bf16 %v4789_v41, %v4788_v39 }
 0x386   :  { %v3468_v56 = vpop.f32.mrb[122].mxu0  ;;  %v4598_v37 = vpop.f32.mrb[122].mxu1 }
 0x387   :  { %v3604_v14 = vmax.f32 %v5626_v25, 0.0  ;;  %v4734_v63 = vmax.f32 %v5682_v21, 0.0  ;;  %v5627_v31 = vadd.f32 %v3468_v56, %v8185_v24  ;;  %v5683_v12 = vadd.f32 %v4598_v37, %v8185_v24  ;;  %v3470_v32 = vpop.f32.mrb[123].mxu0  ;;  %v4600_v48 = vpop.f32.mrb[123].mxu1  ;;  %5426 = vmatprep.subr.bf16.mxu0 %v4831_v11 }
 0x388   :  { %5427 = vmatpush3.bf16.msra.mxu0 %v8400_v13  ;;  %v8402_v21 = vpack.c.bf16 %v8239_v18, %v8237_v0 }
 0x389   :  { %v4790_v4 = vmax.f32 %v3604_v14, %v4734_v63  ;;  %v3605_v57 = vmax.f32 %v5627_v31, 0.0  ;;  %v4735_v27 = vmax.f32 %v5683_v12, 0.0 }
 0x38b   :  { %v4791_v53 = vmax.f32 %v3605_v57, %v4735_v27 }
 0x38c   :  { %v3473_v19 = vpop.f32.mrb[124].mxu0  ;;  %v4603_v30 = vpop.f32.mrb[124].mxu1 }
 0x38d   :  { %v5628_v20 = vadd.f32 %v3473_v19, %v8225_v42  ;;  %v5684_v1 = vadd.f32 %v4603_v30, %v8225_v42  ;;  %v3475_v36 = vpop.f32.mrb[125].mxu0  ;;  %v4605_v61 = vpop.f32.mrb[125].mxu1  ;;  %v4832_v24 = vpack.c.bf16 %v4791_v53, %v4790_v4  ;;  %v8403_v53 = vmov 0  }
 0x38e   :  { %v3476_v52 = vpop.f32.mrb[126].mxu0  ;;  %v4606_v51 = vpop.f32.mrb[126].mxu1 }
 0x38f   :  { %v3606_v2 = vmax.f32 %v5628_v20, 0.0  ;;  %v4736_v33 = vmax.f32 %v5684_v1, 0.0  ;;  %v5629_v50 = vadd.f32 %v3476_v52, %v8223_v22  ;;  %v5685_v15 = vadd.f32 %v4606_v51, %v8223_v22  ;;  %v3478_v59 = vpop.f32.mrb[127].mxu0  ;;  %v4608_v28 = vpop.f32.mrb[127].mxu1  ;;  %5428 = vmatprep.subr.bf16.mxu0 %v4832_v24 }
 0x390   :  { %5429 = vmatpush3.bf16.msra.mxu0 %v8401_v62 }
 0x391   :  { %v4792_v47 = vmax.f32 %v3606_v2, %v4736_v33  ;;  %v3607_v42 = vmax.f32 %v5629_v50, 0.0  ;;  %v4737_v49 = vmax.f32 %v5685_v15, 0.0 }
 0x393   :  { %v4793_v26 = vmax.f32 %v3607_v42, %v4737_v49 }
 0x394   :  { %v3481_v5 = vpop.f32.mrb[128].mxu0  ;;  %v4611_v16 = vpop.f32.mrb[128].mxu1 }
 0x395   :  { %v5630_v8 = vadd.f32 %v3481_v5, %v7904_v38  ;;  %v5686_v44 = vadd.f32 %v4611_v16, %v7904_v38  ;;  %v3483_v3 = vpop.f32.mrb[129].mxu0  ;;  %v4613_v39 = vpop.f32.mrb[129].mxu1  ;;  %v4833_v22 = vpack.c.bf16 %v4793_v26, %v4792_v47 }
 0x396   :  { %v3484_v9 = vpop.f32.mrb[130].mxu0  ;;  %v4614_v23 = vpop.f32.mrb[130].mxu1 }
 0x397   :  { %v3608_v41 = vmax.f32 %v5630_v8, 0.0  ;;  %v4738_v35 = vmax.f32 %v5686_v44, 0.0  ;;  %v5631_v46 = vadd.f32 %v3484_v9, %v7902_v10  ;;  %v5687_v55 = vadd.f32 %v4614_v23, %v7902_v10  ;;  %v3486_v29 = vpop.f32.mrb[131].mxu0  ;;  %v4616_v25 = vpop.f32.mrb[131].mxu1  ;;  %5430 = vmatprep.subr.bf16.mxu0 %v4833_v22 }
 0x398   :  { %5431 = vmatpush3.bf16.msra.mxu0 %v8402_v21 }
 0x399   :  { %v4794_v43 = vmax.f32 %v3608_v41, %v4738_v35  ;;  %v3609_v38 = vmax.f32 %v5631_v46, 0.0  ;;  %v4739_v60 = vmax.f32 %v5687_v55, 0.0 }
 0x39b   :  { %v4795_v11 = vmax.f32 %v3609_v38, %v4739_v60  ;;  %4922 = vmatmul.mubr.bf16.vlgmr.msra.gmra.mrb[176].mxu0 %v8154_v17 }
 0x39c   :  { %v3489_v56 = vpop.f32.mrb[132].mxu0  ;;  %v4619_v37 = vpop.f32.mrb[132].mxu1 }
 0x39d   :  { %v4834_v14 = vpack.c.bf16 %v4795_v11, %v4794_v43  ;;  %v5632_v63 = vadd.f32 %v3489_v56, %v7908_v7  ;;  %v5688_v10 = vadd.f32 %v4619_v37, %v7908_v7  ;;  %v3491_v31 = vpop.f32.mrb[133].mxu0  ;;  %v4621_v12 = vpop.f32.mrb[133].mxu1 }
 0x39e   :  { %v3492_v32 = vpop.f32.mrb[134].mxu0  ;;  %v4622_v48 = vpop.f32.mrb[134].mxu1 }
 0x39f   :  { %v3610_v13 = vmax.f32 %v5632_v63, 0.0  ;;  %v4740_v18 = vmax.f32 %v5688_v10, 0.0  ;;  %v5633_v0 = vadd.f32 %v3492_v32, %v7906_v45  ;;  %v5689_v4 = vadd.f32 %v4622_v48, %v7906_v45  ;;  %v3494_v57 = vpop.f32.mrb[135].mxu0  ;;  %v4624_v27 = vpop.f32.mrb[135].mxu1  ;;  %4930 = vmatpush1.bf16.msra.mxu1 %v4834_v14  ;;  %v8404_v32 = vld [vmem:[#allocation3_spill] sm:$0xff] }
 0x3a0   :  { %4931 = vmatprep.subr.bf16.mxu1 %v8403_v53 }
 0x3a1   :  { %v4796_v19 = vmax.f32 %v3610_v13, %v4740_v18  ;;  %v3611_v30 = vmax.f32 %v5633_v0, 0.0  ;;  %v4741_v20 = vmax.f32 %v5689_v4, 0.0 }
 0x3a3   :  { %v4797_v1 = vmax.f32 %v3611_v30, %v4741_v20 }
 0x3a4   :  { %v3497_v7 = vpop.f32.mrb[136].mxu0  ;;  %v4627_v36 = vpop.f32.mrb[136].mxu1 }
 0x3a5   :  { %v4835_v61 = vpack.c.bf16 %v4797_v1, %v4796_v19  ;;  %v5634_v24 = vadd.f32 %v3497_v7, %v7924_v34  ;;  %v5690_v52 = vadd.f32 %v4627_v36, %v7924_v34  ;;  %v3499_v51 = vpop.f32.mrb[137].mxu0  ;;  %v4629_v2 = vpop.f32.mrb[137].mxu1  ;;  %v8405_v1 = vld [vmem:[#allocation5_spill] sm:$0xff] }
 0x3a6   :  { %v3500_v33 = vpop.f32.mrb[138].mxu0  ;;  %v4630_v45 = vpop.f32.mrb[138].mxu1 }
 0x3a7   :  { %v3612_v50 = vmax.f32 %v5634_v24, 0.0  ;;  %v4742_v15 = vmax.f32 %v5690_v52, 0.0  ;;  %v5635_v59 = vadd.f32 %v3500_v33, %v7922_v40  ;;  %v5691_v28 = vadd.f32 %v4630_v45, %v7922_v40  ;;  %v3502_v62 = vpop.f32.mrb[139].mxu0  ;;  %v4632_v47 = vpop.f32.mrb[139].mxu1  ;;  %4932 = vmatpush1.bf16.msra.mxu1 %v4835_v61  ;;  %v8406_v45 = vld [vmem:[#allocation4_spill] sm:$0xff] }
 0x3a8   :  { %4933 = vmatprep.subr.bf16.mxu1 %v8403_v53 }
 0x3a9   :  { %v4798_v42 = vmax.f32 %v3612_v50, %v4742_v15  ;;  %v3613_v49 = vmax.f32 %v5635_v59, 0.0  ;;  %v4743_v26 = vmax.f32 %v5691_v28, 0.0 }
 0x3ab   :  { %v4799_v5 = vmax.f32 %v3613_v49, %v4743_v26 }
 0x3ac   :  { %v3505_v34 = vpop.f32.mrb[140].mxu0  ;;  %v4635_v16 = vpop.f32.mrb[140].mxu1 }
 0x3ad   :  { %v4836_v8 = vpack.c.bf16 %v4799_v5, %v4798_v42  ;;  %v5636_v44 = vadd.f32 %v3505_v34, %v7960_v58  ;;  %v5692_v3 = vadd.f32 %v4635_v16, %v7960_v58  ;;  %v3507_v39 = vpop.f32.mrb[141].mxu0  ;;  %v4637_v22 = vpop.f32.mrb[141].mxu1  ;;  %v8407_v16 = vld [vmem:[#allocation7_spill] sm:$0xff] }
 0x3ae   :  { %v3508_v9 = vpop.f32.mrb[142].mxu0  ;;  %v4638_v40 = vpop.f32.mrb[142].mxu1 }
 0x3af   :  { %v3614_v23 = vmax.f32 %v5636_v44, 0.0  ;;  %v4744_v41 = vmax.f32 %v5692_v3, 0.0  ;;  %v5637_v35 = vadd.f32 %v3508_v9, %v7958_v54  ;;  %v5693_v46 = vadd.f32 %v4638_v40, %v7958_v54  ;;  %v3510_v55 = vpop.f32.mrb[143].mxu0  ;;  %v4640_v29 = vpop.f32.mrb[143].mxu1  ;;  %4934 = vmatpush1.bf16.msra.mxu1 %v4836_v8 }
 0x3b0   :  { %4935 = vmatprep.subr.bf16.mxu1 %v8403_v53 }
 0x3b1   :  { %v4800_v25 = vmax.f32 %v3614_v23, %v4744_v41  ;;  %v3615_v21 = vmax.f32 %v5637_v35, 0.0  ;;  %v4745_v43 = vmax.f32 %v5693_v46, 0.0  ;;  %v8408_v41 = vld [vmem:[#allocation6_spill] sm:$0xff] }
 0x3b3   :  { %v4801_v38 = vmax.f32 %v3615_v21, %v4745_v43 }
 0x3b4   :  { %v3513_v58 = vpop.f32.mrb[144].mxu0  ;;  %v4643_v60 = vpop.f32.mrb[144].mxu1 }
 0x3b5   :  { %v4837_v11 = vpack.c.bf16 %v4801_v38, %v4800_v25  ;;  %v5638_v56 = vadd.f32 %v3513_v58, %v8008_v6  ;;  %v5694_v37 = vadd.f32 %v4643_v60, %v8008_v6  ;;  %v3515_v14 = vpop.f32.mrb[145].mxu0  ;;  %v4645_v63 = vpop.f32.mrb[145].mxu1 }
 0x3b6   :  { %v3516_v10 = vpop.f32.mrb[146].mxu0  ;;  %v4646_v54 = vpop.f32.mrb[146].mxu1 }
 0x3b7   :  { %v3616_v31 = vmax.f32 %v5638_v56, 0.0  ;;  %v4746_v12 = vmax.f32 %v5694_v37, 0.0  ;;  %v5639_v48 = vadd.f32 %v3516_v10, %v8404_v32  ;;  %v5695_v13 = vadd.f32 %v4646_v54, %v8404_v32  ;;  %v3518_v18 = vpop.f32.mrb[147].mxu0  ;;  %v4648_v0 = vpop.f32.mrb[147].mxu1  ;;  %4936 = vmatpush1.bf16.msra.mxu1 %v4837_v11  ;;  %v8409_v56 = vld [vmem:[#allocation9_spill] sm:$0xff] }
 0x3b8   :  { %4937 = vmatprep.subr.bf16.mxu1 %v8403_v53 }
 0x3b9   :  { %v4802_v4 = vmax.f32 %v3616_v31, %v4746_v12  ;;  %v3617_v57 = vmax.f32 %v5639_v48, 0.0  ;;  %v4747_v27 = vmax.f32 %v5695_v13, 0.0  ;;  %v8410_v48 = vld [vmem:[#allocation8_spill] sm:$0xff] }
 0x3bb   :  { %v4803_v19 = vmax.f32 %v3617_v57, %v4747_v27 }
 0x3bc   :  { %v3521_v6 = vpop.f32.mrb[148].mxu0  ;;  %v4651_v30 = vpop.f32.mrb[148].mxu1 }
 0x3bd   :  { %v4838_v20 = vpack.c.bf16 %v4803_v19, %v4802_v4  ;;  %v5640_v7 = vadd.f32 %v3521_v6, %v8405_v1  ;;  %v5696_v36 = vadd.f32 %v4651_v30, %v8405_v1  ;;  %v3523_v61 = vpop.f32.mrb[149].mxu0  ;;  %v4653_v24 = vpop.f32.mrb[149].mxu1 }
 0x3be   :  { %v3524_v52 = vpop.f32.mrb[150].mxu0  ;;  %v4654_v51 = vpop.f32.mrb[150].mxu1 }
 0x3bf   :  { %v3618_v2 = vmax.f32 %v5640_v7, 0.0  ;;  %v4748_v33 = vmax.f32 %v5696_v36, 0.0  ;;  %v5641_v50 = vadd.f32 %v3524_v52, %v8406_v45  ;;  %v5697_v15 = vadd.f32 %v4654_v51, %v8406_v45  ;;  %v3526_v59 = vpop.f32.mrb[151].mxu0  ;;  %v4656_v28 = vpop.f32.mrb[151].mxu1  ;;  %4938 = vmatpush1.bf16.msra.mxu1 %v4838_v20  ;;  %v8411_v7 = vld [vmem:[#allocation12_spill] sm:$0xff] }
 0x3c0   :  { %4939 = vmatprep.subr.bf16.mxu1 %v8403_v53 }
 0x3c1   :  { %v4804_v62 = vmax.f32 %v3618_v2, %v4748_v33  ;;  %v3619_v47 = vmax.f32 %v5641_v50, 0.0  ;;  %v4749_v42 = vmax.f32 %v5697_v15, 0.0  ;;  %v8412_v50 = vld [vmem:[#allocation11_spill] sm:$0xff] }
 0x3c3   :  { %v4805_v49 = vmax.f32 %v3619_v47, %v4749_v42 }
 0x3c4   :  { %v3529_v26 = vpop.f32.mrb[152].mxu0  ;;  %v4659_v5 = vpop.f32.mrb[152].mxu1 }
 0x3c5   :  { %v4839_v34 = vpack.c.bf16 %v4805_v49, %v4804_v62  ;;  %v5642_v8 = vadd.f32 %v3529_v26, %v8407_v16  ;;  %v5698_v44 = vadd.f32 %v4659_v5, %v8407_v16  ;;  %v3531_v3 = vpop.f32.mrb[153].mxu0  ;;  %v4661_v39 = vpop.f32.mrb[153].mxu1 }
 0x3c6   :  { %v3532_v22 = vpop.f32.mrb[154].mxu0  ;;  %v4662_v9 = vpop.f32.mrb[154].mxu1 }
 0x3c7   :  { %v3620_v40 = vmax.f32 %v5642_v8, 0.0  ;;  %v4750_v23 = vmax.f32 %v5698_v44, 0.0  ;;  %v5643_v35 = vadd.f32 %v3532_v22, %v8408_v41  ;;  %v5699_v46 = vadd.f32 %v4662_v9, %v8408_v41  ;;  %v3534_v55 = vpop.f32.mrb[155].mxu0  ;;  %v4664_v29 = vpop.f32.mrb[155].mxu1  ;;  %4940 = vmatpush1.bf16.msra.mxu1 %v4839_v34  ;;  %v8413_v8 = vld [vmem:[#allocation14_spill] sm:$0xff] }
 0x3c8   :  { %4941 = vmatprep.subr.bf16.mxu1 %v8403_v53 }
 0x3c9   :  { %v4806_v25 = vmax.f32 %v3620_v40, %v4750_v23  ;;  %v3621_v21 = vmax.f32 %v5643_v35, 0.0  ;;  %v4751_v43 = vmax.f32 %v5699_v46, 0.0  ;;  %v8414_v35 = vld [vmem:[#allocation13_spill] sm:$0xff] }
 0x3cb   :  { %v4807_v38 = vmax.f32 %v3621_v21, %v4751_v43 }
 0x3cc   :  { %v3537_v58 = vpop.f32.mrb[156].mxu0  ;;  %v4667_v60 = vpop.f32.mrb[156].mxu1 }
 0x3cd   :  { %v4840_v11 = vpack.c.bf16 %v4807_v38, %v4806_v25  ;;  %v5644_v37 = vadd.f32 %v3537_v58, %v8409_v56  ;;  %v5700_v14 = vadd.f32 %v4667_v60, %v8409_v56  ;;  %v3539_v63 = vpop.f32.mrb[157].mxu0  ;;  %v4669_v10 = vpop.f32.mrb[157].mxu1 }
 0x3ce   :  { %v3540_v54 = vpop.f32.mrb[158].mxu0  ;;  %v4670_v31 = vpop.f32.mrb[158].mxu1 }
 0x3cf   :  { %v3622_v12 = vmax.f32 %v5644_v37, 0.0  ;;  %v4752_v32 = vmax.f32 %v5700_v14, 0.0  ;;  %v5645_v13 = vadd.f32 %v3540_v54, %v8410_v48  ;;  %v5701_v18 = vadd.f32 %v4670_v31, %v8410_v48  ;;  %v3542_v0 = vpop.f32.mrb[159].mxu0  ;;  %v4672_v4 = vpop.f32.mrb[159].mxu1  ;;  %4942 = vmatpush1.bf16.msra.mxu1 %v4840_v11 }
 0x3d0   :  { %4943 = vmatprep.subr.bf16.mxu1 %v8403_v53  ;;  %v2490_v58 = vpop.permute.xlu1 %2489  ;;  %v2485_v60 = vpop.permute.xlu0 %2484 }
 0x3d1   :  { %v4808_v57 = vmax.f32 %v3622_v12, %v4752_v32  ;;  %v3623_v27 = vmax.f32 %v5645_v13, 0.0  ;;  %v4753_v19 = vmax.f32 %v5701_v18, 0.0 }
 0x3d3   :  { %v4809_v6 = vmax.f32 %v3623_v27, %v4753_v19 }
 0x3d4   :  { %v3545_v30 = vpop.f32.mrb[160].mxu0  ;;  %v4675_v20 = vpop.f32.mrb[160].mxu1 }
 0x3d5   :  { %v4841_v1 = vpack.c.bf16 %v4809_v6, %v4808_v57  ;;  %v5646_v36 = vadd.f32 %v3545_v30, %v8411_v7  ;;  %v5702_v61 = vadd.f32 %v4675_v20, %v8411_v7  ;;  %v3547_v24 = vpop.f32.mrb[161].mxu0  ;;  %v4677_v52 = vpop.f32.mrb[161].mxu1 }
 0x3d6   :  { %v3548_v51 = vpop.f32.mrb[162].mxu0  ;;  %v4678_v2 = vpop.f32.mrb[162].mxu1 }
 0x3d7   :  { %v3624_v33 = vmax.f32 %v5646_v36, 0.0  ;;  %v4754_v45 = vmax.f32 %v5702_v61, 0.0  ;;  %v5647_v15 = vadd.f32 %v3548_v51, %v8412_v50  ;;  %v5703_v59 = vadd.f32 %v4678_v2, %v8412_v50  ;;  %v3550_v28 = vpop.f32.mrb[163].mxu0  ;;  %v4680_v62 = vpop.f32.mrb[163].mxu1  ;;  %4944 = vmatpush1.bf16.msra.mxu1 %v4841_v1 }
 0x3d8   :  { %4945 = vmatprep.subr.bf16.mxu1 %v8403_v53  ;;  %v2500_v30 = vpop.permute.xlu1 %2499  ;;  %v2495_v20 = vpop.permute.xlu0 %2494 }
 0x3d9   :  { %v4810_v47 = vmax.f32 %v3624_v33, %v4754_v45  ;;  %v3625_v42 = vmax.f32 %v5647_v15, 0.0  ;;  %v4755_v49 = vmax.f32 %v5703_v59, 0.0 }
 0x3db   :  { %v4811_v26 = vmax.f32 %v3625_v42, %v4755_v49 }
 0x3dc   :  { %v3553_v5 = vpop.f32.mrb[164].mxu0  ;;  %v4683_v34 = vpop.f32.mrb[164].mxu1 }
 0x3dd   :  { %v4842_v16 = vpack.c.bf16 %v4811_v26, %v4810_v47  ;;  %v5648_v44 = vadd.f32 %v3553_v5, %v8413_v8  ;;  %v5704_v3 = vadd.f32 %v4683_v34, %v8413_v8  ;;  %v3555_v39 = vpop.f32.mrb[165].mxu0  ;;  %v4685_v22 = vpop.f32.mrb[165].mxu1 }
 0x3de   :  { %v3556_v9 = vpop.f32.mrb[166].mxu0  ;;  %v4686_v40 = vpop.f32.mrb[166].mxu1 }
 0x3df   :  { %v3626_v23 = vmax.f32 %v5648_v44, 0.0  ;;  %v4756_v41 = vmax.f32 %v5704_v3, 0.0  ;;  %v5649_v46 = vadd.f32 %v3556_v9, %v8414_v35  ;;  %v5705_v55 = vadd.f32 %v4686_v40, %v8414_v35  ;;  %v3558_v29 = vpop.f32.mrb[167].mxu0  ;;  %v4688_v25 = vpop.f32.mrb[167].mxu1  ;;  %4946 = vmatpush1.bf16.msra.mxu1 %v4842_v16  ;;  %v8415_v9 = vld [vmem:[#allocation10_spill] sm:$0xff] }
 0x3e0   :  { %4947 = vmatprep.subr.bf16.mxu1 %v8403_v53  ;;  %v4880_v16 = vcombine.high %v8154_v17, %v8154_v17  ;;  %v4855_v40 = vsub.s32 0, %v8415_v9 }
 0x3e1   :  { %v4812_v21 = vmax.f32 %v3626_v23, %v4756_v41  ;;  %v3627_v43 = vmax.f32 %v5649_v46, 0.0  ;;  %v4757_v38 = vmax.f32 %v5705_v55, 0.0  ;;  %v4851_v23 = vpop.permute.xlu0 %4850 }
 0x3e2   :  { %v4856_v41 = vrot.slane %v4851_v23, %v4855_v40 }
 0x3e3   :  { %v4813_v11 = vmax.f32 %v3627_v43, %v4757_v38 }
 0x3e4   :  { %v3561_v56 = vpop.f32.mrb[168].mxu0  ;;  %v4691_v37 = vpop.f32.mrb[168].mxu1 }
 0x3e5   :  { %v4843_v14 = vpack.c.bf16 %v4813_v11, %v4812_v21  ;;  %v5650_v63 = vadd.f32 %v3561_v56, %v2485_v60  ;;  %v5706_v10 = vadd.f32 %v4691_v37, %v2485_v60  ;;  %v3563_v54 = vpop.f32.mrb[169].mxu0  ;;  %v4693_v31 = vpop.f32.mrb[169].mxu1 }
 0x3e6   :  { %v3564_v12 = vpop.f32.mrb[170].mxu0  ;;  %v4694_v32 = vpop.f32.mrb[170].mxu1 }
 0x3e7   :  { %v3628_v48 = vmax.f32 %v5650_v63, 0.0  ;;  %v4758_v13 = vmax.f32 %v5706_v10, 0.0  ;;  %v5651_v18 = vadd.f32 %v3564_v12, %v2490_v58  ;;  %v5707_v0 = vadd.f32 %v4694_v32, %v2490_v58  ;;  %v3566_v4 = vpop.f32.mrb[171].mxu0  ;;  %v4696_v57 = vpop.f32.mrb[171].mxu1  ;;  %4948 = vmatpush1.bf16.msra.mxu1 %v4843_v14 }
 0x3e8   :  { %4949 = vmatprep.subr.bf16.mxu1 %v8403_v53 }
 0x3e9   :  { %v4814_v27 = vmax.f32 %v3628_v48, %v4758_v13  ;;  %v3629_v19 = vmax.f32 %v5651_v18, 0.0  ;;  %v4759_v6 = vmax.f32 %v5707_v0, 0.0 }
 0x3eb   :  { %v4815_v1 = vmax.f32 %v3629_v19, %v4759_v6 }
 0x3ec   :  { %v3569_v7 = vpop.f32.mrb[172].mxu0  ;;  %v4699_v36 = vpop.f32.mrb[172].mxu1 }
 0x3ed   :  { %v4844_v61 = vpack.c.bf16 %v4815_v1, %v4814_v27  ;;  %v5652_v24 = vadd.f32 %v3569_v7, %v2495_v20  ;;  %v5708_v52 = vadd.f32 %v4699_v36, %v2495_v20  ;;  %v3571_v51 = vpop.f32.mrb[173].mxu0  ;;  %v4701_v2 = vpop.f32.mrb[173].mxu1 }
 0x3ee   :  { %v3572_v33 = vpop.f32.mrb[174].mxu0  ;;  %v4702_v45 = vpop.f32.mrb[174].mxu1 }
 0x3ef   :  { %v3630_v50 = vmax.f32 %v5652_v24, 0.0  ;;  %v4760_v15 = vmax.f32 %v5708_v52, 0.0  ;;  %v5653_v59 = vadd.f32 %v3572_v33, %v2500_v30  ;;  %v5709_v28 = vadd.f32 %v4702_v45, %v2500_v30  ;;  %v3574_v62 = vpop.f32.mrb[175].mxu0  ;;  %v4704_v47 = vpop.f32.mrb[175].mxu1  ;;  %4950 = vmatpush1.bf16.msra.mxu1 %v4844_v61 }
 0x3f0   :  { %4951 = vmatprep.subr.bf16.mxu1 %v8403_v53 }
 0x3f1   :  { %v4816_v42 = vmax.f32 %v3630_v50, %v4760_v15  ;;  %v3631_v49 = vmax.f32 %v5653_v59, 0.0  ;;  %v4761_v26 = vmax.f32 %v5709_v28, 0.0 }
 0x3f3   :  { %v4817_v5 = vmax.f32 %v3631_v49, %v4761_v26 }
 0x3f5   :  { %v4845_v34 = vpack.c.bf16 %v4817_v5, %v4816_v42 }
 0x3f7   :  { %4952 = vmatpush1.bf16.msra.mxu1 %v4845_v34 }
 0x3fa   :  { %4962 = vmatmul.mubr.bf16.vlgmr.msra.gmra.mrb[176].mxu1 %v4880_v16 }
 0x46e   :  { %v5432_v8 = vpop.f32.mrb[176].mxu0 }
 0x46f   :  { %v5433_v44 = vpop.f32.mrb[177].mxu0 }
 0x470   :  { %v5434_v3 = vadd.f32 %v5433_v44, %v5432_v8  ;;  %v5435_v39 = vpop.f32.mrb[178].mxu0 }
 0x471   :  { %v5436_v22 = vpop.f32.mrb[179].mxu0 }
 0x472   :  { %v4924_v53 = vadd.f32 %v5434_v3, %v4856_v41 }
 0x4cd   :  { %v4963_v35 = vpop.f32.mrb[176].mxu1 }
 0x4ce   :  { %v4964_v46 = vadd.f32 %v4963_v35, %v4924_v53  ;;  %v4965_v55 = vpop.f32.mrb[177].mxu1 }
 0x4cf   :  { %v4966_v29 = vpop.f32.mrb[178].mxu1 }
 0x4d0   :  { %4969 = vst [vmem:[%s8368_s9] sm:$0x1] %v4964_v46  ;;  %v4967_v17 = vpop.f32.mrb[179].mxu1 }

</bundles_post_ra>
